<compile_context>
chip_gen: v5e
topology: v5e:2x2
jax: 0.10.0
libtpu: 0.0.40
codegen_flags: <defaults>
</compile_context>

<pallas_src>
import functools

import jax
import jax.numpy as jnp
from jax import lax
from jax.experimental import pallas as pl
from jax.experimental.pallas import tpu as pltpu


def _sigmoid(x):
    # sigmoid(x) == 0.5 * (tanh(x / 2) + 1): one EUP op, no f32 divide on the chain.
    return 0.5 * (jnp.tanh(0.5 * x) + 1.0)


def actor_kernel(
    ch_ref, rw_ref, noise_ref,
    wn_ref, bn_ref,                      # embedding_noise            (2, Dn), (1, Dn)
    wxe_ref, b1_ref, w1r_ref, w1n_ref,   # embedding_layer folded into linear1
    wgi_ref, bgi_ref,                    # linear2 folded into enc/dec W_ih (HS, 6H), (1, 6H)
    whe_ref, bhe_ref,                    # encoder W_hh, fused & lane-padded (H, 3Hp), (1, 3Hp)
    wpost_ref, bpost_ref,                # [Encoder_affine | dec W_hh]  (H, WD+3H), (1, WD+3H)
    wdec_ref, bdec_ref,                  # [Decoder_affine | dec W_hh]  (H, WD+3H), (1, WD+3H)
    v_ref, enc_init_ref, gi_dec0_ref,    # V (1, WD), init hidden (1, H), dec init gates (1, 3H)
    logp_ref, sched_ref, count_ref,      # outputs
    enc_scratch,                         # VMEM scratch (T, H): encoder hidden states
    *, num_users, hidden_dim, weight_dim,
):
    f32 = jnp.float32
    N = num_users
    T = N + 1
    H = hidden_dim
    WD = weight_dim

    # ---------------- embedding / MLP front-end ----------------
    x = ch_ref[...] * 100000.0                                                     # (N, F)
    noise_emb = jnp.tanh(
        jnp.dot(noise_ref[...], wn_ref[...], preferred_element_type=f32) + bn_ref[...])  # (1, Dn)
    # linear1(cat([embedding_layer(x), reward, noise_rep], 1)); embedding_layer
    # is folded into wxe / b1 on the host (no nonlinearity in between).
    pre = (jnp.dot(x, wxe_ref[...], preferred_element_type=f32)
           + rw_ref[...] * w1r_ref[...]                                            # (N,1)*(1,HS)
           + jnp.dot(noise_emb, w1n_ref[...], preferred_element_type=f32)          # (1,HS) bcast
           + b1_ref[...])
    h1 = jnp.tanh(pre)                                                             # (N, HS)

    # Encoder & decoder input-gate tables in ONE matmul (linear2 folded in).
    gi_all = jnp.dot(h1, wgi_ref[...], preferred_element_type=f32) + bgi_ref[...]  # (N, 6H)
    gi_enc = gi_all[:, 0:3 * H]                                                    # (N, 3H)
    gi_dec_tab = gi_all[:, 3 * H:6 * H]                                            # (N, 3H)

    # ---------------- Encoder GRU (fully unrolled, 1 fused MXU push / step) -------
    whe = whe_ref[...]                                                             # (H, 3Hp)
    bhe = bhe_ref[...]

    h = enc_init_ref[...]                                                          # (1, H)
    enc_scratch[0:1, :] = h                                                        # row 0 = init hidden
    for t in range(N):
        gh = jnp.dot(h, whe, preferred_element_type=f32) + bhe                     # (1, 3Hp)
        gi_t = gi_enc[t:t + 1, :]                                                  # (1, 3H)
        rz = _sigmoid(gi_t[:, 0:2 * H] + gh[:, 0:2 * H])                           # r,z in one EUP op
        r = rz[:, 0:H]
        z = rz[:, H:2 * H]
        n = jnp.tanh(gi_t[:, 2 * H:3 * H] + r * gh[:, 2 * H:3 * H])
        h = (1.0 - z) * n + z * h
        enc_scratch[t + 1:t + 2, :] = h

    # Post-encoder fused matmul: Encoder_affine for all T hidden states AND the
    # first decoder gh (h_enc @ dec W_hh) in a single push.
    post = (jnp.dot(enc_scratch[...], wpost_ref[...], preferred_element_type=f32)
            + bpost_ref[...])                                                      # (T, WD+3H)
    aff_enc = post[:, 0:WD]                                                        # (T, WD)
    gh = post[N:N + 1, WD:WD + 3 * H]                                              # (1, 3H)

    # ---------------- Pointer decoder loop (argmax, fully unrolled) ----------------
    wdec = wdec_ref[...]                                                           # (H, WD+3H)
    bdec = bdec_ref[...]
    v_row = v_ref[...]                                                             # (1, WD)

    rows_T = lax.broadcasted_iota(jnp.int32, (T, 1), 0)
    rows_N = lax.broadcasted_iota(jnp.int32, (N, 1), 0)
    lane_N = lax.broadcasted_iota(jnp.int32, (1, N), 1)

    h_dec = h                                                                      # Encoder_hidden_output
    gi = gi_dec0_ref[...]                                                          # Decoder_init_input gates
    masked = jnp.zeros((T, 1), f32)                                                # pointer mask
    done = jnp.zeros((1, 1), jnp.int32)
    logp_sum = jnp.zeros((1, 1), f32)                                              # sum of log p(selected)
    count = jnp.zeros((1, 1), jnp.int32)                                           # scheduled users
    sched = jnp.full((1, N), -1, jnp.int32)                                        # schedule (padded -1)

    for _ in range(T):
        # GRU step: gh (hidden-gate pre-activations for the current h_dec) is loop
        # state produced by the previous step's fused matmul -> no MXU work here.
        rz = _sigmoid(gi[:, 0:2 * H] + gh[:, 0:2 * H])
        r = rz[:, 0:H]
        z = rz[:, H:2 * H]
        n = jnp.tanh(gi[:, 2 * H:3 * H] + r * gh[:, 2 * H:3 * H])
        h_new = (1.0 - z) * n + z * h_dec                                          # (1, H)

        # ONE fused MXU push: this step's Decoder_affine + next step's gh.
        fused = jnp.dot(h_new, wdec, preferred_element_type=f32) + bdec            # (1, WD+3H)
        dec_aff = fused[:, 0:WD]
        gh_next = fused[:, WD:WD + 3 * H]

        u = jnp.tanh(aff_enc + dec_aff)                                            # (T, WD)
        w = jnp.sum(u * v_row, axis=1, keepdims=True)                              # (T, 1) = V @ u^T
        w = jnp.where(masked > 0.0, -1e30, w)                                      # mask_weight

        # log-space softmax of the argmax entry: w_sel == wmax  =>  log p = -log(denom)
        wmax = jnp.max(w, keepdims=True)                                           # (1, 1)
        denom = jnp.sum(jnp.exp(w - wmax), keepdims=True)                          # (1, 1)
        logp_sel = -jnp.log(denom)                                                 # (1, 1)
        sel = jnp.min(jnp.where(w == wmax, rows_T, T), keepdims=True)              # first argmax

        active = (done == 0)
        sel_is_zero = (sel == 0)
        take = jnp.logical_and(active, jnp.logical_not(sel_is_zero))

        # (the reference's prod(result) includes the stop-token step's probability)
        logp_sum = jnp.where(active, logp_sum + logp_sel, logp_sum)
        masked = jnp.where(jnp.logical_and(take, rows_T == sel), jnp.float32(1.0), masked)
        sched = jnp.where(jnp.logical_and(take, lane_N == count), sel - 1, sched)
        count = jnp.where(take, count + 1, count)

        # next decoder input gates = row (sel - 1) of the precomputed table
        # (single mask + sublane reduce on the un-split (N, 3H) table; MXU stays off
        # the data-dependent chain)
        rowmask = rows_N == (sel - 1)                                              # (N, 1)
        gi_next = jnp.sum(jnp.where(rowmask, gi_dec_tab, 0.0), axis=0, keepdims=True)  # (1, 3H)
        gi = jnp.where(take, gi_next, gi)
        gh = jnp.where(active, gh_next, gh)
        h_dec = jnp.where(active, h_new, h_dec)
        done = jnp.where(jnp.logical_and(active, sel_is_zero), jnp.ones_like(done), done)

    logp_ref[...] = logp_sum        # == log(prod(result)) accumulated in log space
    sched_ref[...] = sched
    count_ref[...] = count


# ---------------------------------------------------------------------------
# Host-side parameter construction, folding, and pallas_call wrapper (plain JAX)
# ---------------------------------------------------------------------------
def _linear_init(key, fan_in, fan_out):
    k1, k2 = jax.random.split(key)
    bound = fan_in ** -0.5
    w_t = jax.random.uniform(k1, (fan_in, fan_out), jnp.float32, -bound, bound)
    b = jax.random.uniform(k2, (1, fan_out), jnp.float32, -bound, bound)
    return w_t, b


def _gru_init(key, input_dim, hidden_dim):
    k1, k2, k3, k4 = jax.random.split(key, 4)
    bound = hidden_dim ** -0.5
    wi_t = jax.random.uniform(k1, (input_dim, 3 * hidden_dim), jnp.float32, -bound, bound)
    wh_t = jax.random.uniform(k2, (hidden_dim, 3 * hidden_dim), jnp.float32, -bound, bound)
    bi = jax.random.uniform(k3, (1, 3 * hidden_dim), jnp.float32, -bound, bound)
    bh = jax.random.uniform(k4, (1, 3 * hidden_dim), jnp.float32, -bound, bound)
    return wi_t, wh_t, bi, bh


def make_actor_params(key, *, flatten_dim, embedding_dim, noise_dim,
                      high_space_dim, rnn_input_dim, hidden_dim, weight_dim):
    ks = jax.random.split(key, 12)
    params = {}
    params["wn_t"], params["bn"] = _linear_init(ks[0], 2, noise_dim)
    params["we_t"], params["be"] = _linear_init(ks[1], flatten_dim, embedding_dim)
    fan1 = embedding_dim + 1 + noise_dim
    w1_t, b1 = _linear_init(ks[2], fan1, high_space_dim)
    params["w1e_t"] = w1_t[:embedding_dim]
    params["w1r_t"] = w1_t[embedding_dim:embedding_dim + 1]
    params["w1n_t"] = w1_t[embedding_dim + 1:]
    params["b1"] = b1
    params["w2_t"], params["b2"] = _linear_init(ks[3], high_space_dim, rnn_input_dim)
    (params["enc_wi_t"], params["enc_wh_t"],
     params["enc_bi"], params["enc_bh"]) = _gru_init(ks[4], rnn_input_dim, hidden_dim)
    (params["dec_wi_t"], params["dec_wh_t"],
     params["dec_bi"], params["dec_bh"]) = _gru_init(ks[5], rnn_input_dim, hidden_dim)
    params["wea_t"], params["bea"] = _linear_init(ks[6], hidden_dim, weight_dim)
    params["wda_t"], params["bda"] = _linear_init(ks[7], hidden_dim, weight_dim)
    params["v"] = jax.random.uniform(ks[8], (1, weight_dim), jnp.float32)             # torch.rand
    params["enc_init"] = jax.random.uniform(ks[9], (1, hidden_dim), jnp.float32)       # torch.rand
    params["dec_init"] = jax.random.uniform(ks[10], (1, rnn_input_dim), jnp.float32)   # torch.rand
    return params


def prepare_kernel_params(params):
    """Pure host-side parameter folding / fusion (no runtime semantics change)."""
    H = params["enc_init"].shape[1]
    p = {}
    p["wn_t"] = params["wn_t"]
    p["bn"] = params["bn"]
    # embedding_layer folded into linear1 (no nonlinearity between them).
    p["wxe"] = params["we_t"] @ params["w1e_t"]
    p["b1"] = params["b1"] + params["be"] @ params["w1e_t"]
    p["w1r_t"] = params["w1r_t"]
    p["w1n_t"] = params["w1n_t"]
    # linear2 folded into enc/dec GRU input-gate projections; the two projections
    # are fused into one (HS, 6H) matmul.
    w_ie = params["w2_t"] @ params["enc_wi_t"]
    b_ie = params["b2"] @ params["enc_wi_t"] + params["enc_bi"]
    w_id = params["w2_t"] @ params["dec_wi_t"]
    b_id = params["b2"] @ params["dec_wi_t"] + params["dec_bi"]
    p["wgi"] = jnp.concatenate([w_ie, w_id], axis=1)
    p["bgi"] = jnp.concatenate([b_ie, b_id], axis=1)
    # Encoder hidden-gate weight: single fused per-step matmul, lane-padded to a
    # multiple of 128 so the push is lane-dense on all generations (incl. v5e).
    pad = (-3 * H) % 128
    p["whe"] = jnp.pad(params["enc_wh_t"], ((0, 0), (0, pad)))
    p["bhe"] = jnp.pad(params["enc_bh"], ((0, 0), (0, pad)))
    # Post-encoder fused matmul: [Encoder_affine | decoder W_hh].
    p["wpost"] = jnp.concatenate([params["wea_t"], params["dec_wh_t"]], axis=1)
    p["bpost"] = jnp.concatenate([params["bea"], params["dec_bh"]], axis=1)
    # Per-decoder-step fused matmul: [Decoder_affine | decoder W_hh].
    p["wdec"] = jnp.concatenate([params["wda_t"], params["dec_wh_t"]], axis=1)
    p["bdec"] = jnp.concatenate([params["bda"], params["dec_bh"]], axis=1)
    p["v"] = params["v"]
    p["enc_init"] = params["enc_init"]
    # Decoder init-input gates are a pure parameter function -> precompute.
    p["gi_dec0"] = params["dec_init"] @ params["dec_wi_t"] + params["dec_bi"]
    return p


def actor_forward(params, channel_matrix, reward_array, noise):
    N, _ = channel_matrix.shape
    H = params["enc_init"].shape[1]
    WD = params["v"].shape[1]
    T = N + 1
    kp = prepare_kernel_params(params)

    kernel = functools.partial(actor_kernel, num_users=N, hidden_dim=H, weight_dim=WD)
    args = (channel_matrix, reward_array, noise,
            kp["wn_t"], kp["bn"],
            kp["wxe"], kp["b1"], kp["w1r_t"], kp["w1n_t"],
            kp["wgi"], kp["bgi"],
            kp["whe"], kp["bhe"],
            kp["wpost"], kp["bpost"],
            kp["wdec"], kp["bdec"],
            kp["v"], kp["enc_init"], kp["gi_dec0"])

    vmem = pl.BlockSpec(memory_space=pltpu.MemorySpace.VMEM)
    out_shapes = (
        jax.ShapeDtypeStruct((1, 1), jnp.float32),   # log_prob
        jax.ShapeDtypeStruct((1, N), jnp.int32),     # schedule (padded with -1)
        jax.ShapeDtypeStruct((1, 1), jnp.int32),     # number of scheduled users
    )
    # No grid / no BlockSpec pipelining on purpose: the whole working set is a few
    # hundred KB and the kernel is latency-bound, so a single VMEM-resident
    # invocation avoids per-grid-step overhead.
    logp, sched, count = pl.pallas_call(
        kernel,
        out_shape=out_shapes,
        in_specs=[vmem] * len(args),
        out_specs=(vmem, vmem, vmem),
        scratch_shapes=[pltpu.VMEM((T, H), jnp.float32)],   # encoder hidden states [init; h_1..h_N]
    )(*args)
    return logp[0, 0], sched[0], count[0, 0]


if __name__ == "__main__":
    # Small, module-consistent sizes.
    num_users = 8          # sequence length of the pointer network
    flatten_dim = 16
    embedding_dim = 32
    noise_dim = 8
    high_space_dim = 32
    rnn_input_dim = 32
    hidden_dim = 32        # rnn_hidden
    weight_dim = 32

    key = jax.random.PRNGKey(0)
    kp, kc, kr, kn = jax.random.split(key, 4)

    params = make_actor_params(
        kp, flatten_dim=flatten_dim, embedding_dim=embedding_dim,
        noise_dim=noise_dim, high_space_dim=high_space_dim,
        rnn_input_dim=rnn_input_dim, hidden_dim=hidden_dim,
        weight_dim=weight_dim)

    # channel gains are tiny (they get multiplied by 1e5 inside the forward)
    channel_matrix = jax.random.uniform(kc, (num_users, flatten_dim), jnp.float32) * 1e-5
    reward_array = jax.random.uniform(kr, (num_users, 1), jnp.float32)
    noise = jax.random.normal(kn, (1, 2), jnp.float32)

    log_prob, schedule_padded, n_sched = actor_forward(
        params, channel_matrix, reward_array, noise)
    jax.block_until_ready((log_prob, schedule_padded, n_sched))
    print("KERNEL_OK")
</pallas_src>

<mosaic_0001>
module attributes {stable_mosaic.version = 11 : i64} {
  func.func @actor_kernel(%arg0: memref<8x16xf32, #tpu.memory_space<vmem>>, %arg1: memref<8x1xf32, #tpu.memory_space<vmem>>, %arg2: memref<1x2xf32, #tpu.memory_space<vmem>>, %arg3: memref<2x8xf32, #tpu.memory_space<vmem>>, %arg4: memref<1x8xf32, #tpu.memory_space<vmem>>, %arg5: memref<16x32xf32, #tpu.memory_space<vmem>>, %arg6: memref<1x32xf32, #tpu.memory_space<vmem>>, %arg7: memref<1x32xf32, #tpu.memory_space<vmem>>, %arg8: memref<8x32xf32, #tpu.memory_space<vmem>>, %arg9: memref<32x192xf32, #tpu.memory_space<vmem>>, %arg10: memref<1x192xf32, #tpu.memory_space<vmem>>, %arg11: memref<32x128xf32, #tpu.memory_space<vmem>>, %arg12: memref<1x128xf32, #tpu.memory_space<vmem>>, %arg13: memref<32x128xf32, #tpu.memory_space<vmem>>, %arg14: memref<1x128xf32, #tpu.memory_space<vmem>>, %arg15: memref<32x128xf32, #tpu.memory_space<vmem>>, %arg16: memref<1x128xf32, #tpu.memory_space<vmem>>, %arg17: memref<1x32xf32, #tpu.memory_space<vmem>>, %arg18: memref<1x32xf32, #tpu.memory_space<vmem>>, %arg19: memref<1x96xf32, #tpu.memory_space<vmem>>, %arg20: memref<1x1xf32, #tpu.memory_space<vmem>>, %arg21: memref<1x8xi32, #tpu.memory_space<vmem>>, %arg22: memref<1x1xi32, #tpu.memory_space<vmem>>, %arg23: memref<9x32xf32, #tpu.memory_space<vmem>>) attributes {dimension_semantics = [], scalar_prefetch = 0 : i64, scratch_operands = 1 : i64, tpu.core_type = #tpu.core_type<tc>} {
    %c0 = arith.constant 0 : index
    %c0_0 = arith.constant 0 : index
    %0 = vector.load %arg0[%c0, %c0_0] : memref<8x16xf32, #tpu.memory_space<vmem>>, vector<8x16xf32>
    %cst = arith.constant 1.000000e+05 : f32
    %1 = vector.broadcast %cst : f32 to vector<8x16xf32>
    %2 = arith.mulf %0, %1 : vector<8x16xf32>
    %c0_1 = arith.constant 0 : index
    %c0_2 = arith.constant 0 : index
    %3 = vector.load %arg2[%c0_1, %c0_2] : memref<1x2xf32, #tpu.memory_space<vmem>>, vector<1x2xf32>
    %c0_3 = arith.constant 0 : index
    %c0_4 = arith.constant 0 : index
    %4 = vector.load %arg3[%c0_3, %c0_4] : memref<2x8xf32, #tpu.memory_space<vmem>>, vector<2x8xf32>
    %cst_5 = arith.constant dense<0.000000e+00> : vector<1x8xf32>
    %5 = tpu.matmul %3, %4, %cst_5 {dimension_numbers = #tpu.dot_dimension_numbers<[1], [0], [0], [1], [0, 0, 1, 1], [], []>} : vector<1x2xf32>, vector<2x8xf32>, vector<1x8xf32> -> vector<1x8xf32>
    %c0_6 = arith.constant 0 : index
    %c0_7 = arith.constant 0 : index
    %6 = vector.load %arg4[%c0_6, %c0_7] : memref<1x8xf32, #tpu.memory_space<vmem>>, vector<1x8xf32>
    %7 = arith.addf %5, %6 : vector<1x8xf32>
    %8 = math.tanh %7 : vector<1x8xf32>
    %c0_8 = arith.constant 0 : index
    %c0_9 = arith.constant 0 : index
    %9 = vector.load %arg5[%c0_8, %c0_9] : memref<16x32xf32, #tpu.memory_space<vmem>>, vector<16x32xf32>
    %cst_10 = arith.constant dense<0.000000e+00> : vector<8x32xf32>
    %10 = tpu.matmul %2, %9, %cst_10 {dimension_numbers = #tpu.dot_dimension_numbers<[1], [0], [0], [1], [0, 0, 1, 1], [], []>} : vector<8x16xf32>, vector<16x32xf32>, vector<8x32xf32> -> vector<8x32xf32>
    %c0_11 = arith.constant 0 : index
    %c0_12 = arith.constant 0 : index
    %11 = vector.load %arg1[%c0_11, %c0_12] : memref<8x1xf32, #tpu.memory_space<vmem>>, vector<8x1xf32>
    %c0_13 = arith.constant 0 : index
    %c0_14 = arith.constant 0 : index
    %12 = vector.load %arg7[%c0_13, %c0_14] : memref<1x32xf32, #tpu.memory_space<vmem>>, vector<1x32xf32>
    %13 = vector.broadcast %11 : vector<8x1xf32> to vector<8x32xf32>
    %14 = vector.broadcast %12 : vector<1x32xf32> to vector<8x32xf32>
    %15 = arith.mulf %13, %14 : vector<8x32xf32>
    %16 = arith.addf %10, %15 : vector<8x32xf32>
    %c0_15 = arith.constant 0 : index
    %c0_16 = arith.constant 0 : index
    %17 = vector.load %arg8[%c0_15, %c0_16] : memref<8x32xf32, #tpu.memory_space<vmem>>, vector<8x32xf32>
    %cst_17 = arith.constant dense<0.000000e+00> : vector<1x32xf32>
    %18 = tpu.matmul %8, %17, %cst_17 {dimension_numbers = #tpu.dot_dimension_numbers<[1], [0], [0], [1], [0, 0, 1, 1], [], []>} : vector<1x8xf32>, vector<8x32xf32>, vector<1x32xf32> -> vector<1x32xf32>
    %19 = vector.broadcast %18 : vector<1x32xf32> to vector<8x32xf32>
    %20 = arith.addf %16, %19 : vector<8x32xf32>
    %c0_18 = arith.constant 0 : index
    %c0_19 = arith.constant 0 : index
    %21 = vector.load %arg6[%c0_18, %c0_19] : memref<1x32xf32, #tpu.memory_space<vmem>>, vector<1x32xf32>
    %22 = vector.broadcast %21 : vector<1x32xf32> to vector<8x32xf32>
    %23 = arith.addf %20, %22 : vector<8x32xf32>
    %24 = math.tanh %23 : vector<8x32xf32>
    %c0_20 = arith.constant 0 : index
    %c0_21 = arith.constant 0 : index
    %25 = vector.load %arg9[%c0_20, %c0_21] : memref<32x192xf32, #tpu.memory_space<vmem>>, vector<32x192xf32>
    %cst_22 = arith.constant dense<0.000000e+00> : vector<8x192xf32>
    %26 = tpu.matmul %24, %25, %cst_22 {dimension_numbers = #tpu.dot_dimension_numbers<[1], [0], [0], [1], [0, 0, 1, 1], [], []>} : vector<8x32xf32>, vector<32x192xf32>, vector<8x192xf32> -> vector<8x192xf32>
    %c0_23 = arith.constant 0 : index
    %c0_24 = arith.constant 0 : index
    %27 = vector.load %arg10[%c0_23, %c0_24] : memref<1x192xf32, #tpu.memory_space<vmem>>, vector<1x192xf32>
    %28 = vector.broadcast %27 : vector<1x192xf32> to vector<8x192xf32>
    %29 = arith.addf %26, %28 : vector<8x192xf32>
    %30 = vector.extract_strided_slice %29 {offsets = [0, 0], sizes = [8, 96], strides = [1, 1]} : vector<8x192xf32> to vector<8x96xf32>
    %31 = vector.extract_strided_slice %29 {offsets = [0, 96], sizes = [8, 96], strides = [1, 1]} : vector<8x192xf32> to vector<8x96xf32>
    %c0_25 = arith.constant 0 : index
    %c0_26 = arith.constant 0 : index
    %32 = vector.load %arg11[%c0_25, %c0_26] : memref<32x128xf32, #tpu.memory_space<vmem>>, vector<32x128xf32>
    %c0_27 = arith.constant 0 : index
    %c0_28 = arith.constant 0 : index
    %33 = vector.load %arg12[%c0_27, %c0_28] : memref<1x128xf32, #tpu.memory_space<vmem>>, vector<1x128xf32>
    %c0_29 = arith.constant 0 : index
    %c0_30 = arith.constant 0 : index
    %34 = vector.load %arg18[%c0_29, %c0_30] : memref<1x32xf32, #tpu.memory_space<vmem>>, vector<1x32xf32>
    %c0_31 = arith.constant 0 : index
    %c0_32 = arith.constant 0 : index
    %35 = vector.load %arg23[%c0_31, %c0_32] : memref<9x32xf32, #tpu.memory_space<vmem>>, vector<1x32xf32>
    tpu.vector_store %arg23[%c0_31, %c0_32], %34 {strides = array<i32>} : memref<9x32xf32, #tpu.memory_space<vmem>>, vector<1x32xf32>,
    %cst_33 = arith.constant dense<0.000000e+00> : vector<1x128xf32>
    %36 = tpu.matmul %34, %32, %cst_33 {dimension_numbers = #tpu.dot_dimension_numbers<[1], [0], [0], [1], [0, 0, 1, 1], [], []>} : vector<1x32xf32>, vector<32x128xf32>, vector<1x128xf32> -> vector<1x128xf32>
    %37 = arith.addf %36, %33 : vector<1x128xf32>
    %38 = vector.extract_strided_slice %30 {offsets = [0, 0], sizes = [1, 96], strides = [1, 1]} : vector<8x96xf32> to vector<1x96xf32>
    %39 = vector.extract_strided_slice %38 {offsets = [0, 0], sizes = [1, 64], strides = [1, 1]} : vector<1x96xf32> to vector<1x64xf32>
    %40 = vector.extract_strided_slice %37 {offsets = [0, 0], sizes = [1, 64], strides = [1, 1]} : vector<1x128xf32> to vector<1x64xf32>
    %41 = arith.addf %39, %40 : vector<1x64xf32>
    %cst_34 = arith.constant 5.000000e-01 : f32
    %42 = vector.broadcast %cst_34 : f32 to vector<1x64xf32>
    %43 = arith.mulf %42, %41 : vector<1x64xf32>
    %44 = math.tanh %43 : vector<1x64xf32>
    %cst_35 = arith.constant 1.000000e+00 : f32
    %45 = vector.broadcast %cst_35 : f32 to vector<1x64xf32>
    %46 = arith.addf %44, %45 : vector<1x64xf32>
    %cst_36 = arith.constant 5.000000e-01 : f32
    %47 = vector.broadcast %cst_36 : f32 to vector<1x64xf32>
    %48 = arith.mulf %47, %46 : vector<1x64xf32>
    %49 = vector.extract_strided_slice %48 {offsets = [0, 0], sizes = [1, 32], strides = [1, 1]} : vector<1x64xf32> to vector<1x32xf32>
    %50 = vector.extract_strided_slice %48 {offsets = [0, 32], sizes = [1, 32], strides = [1, 1]} : vector<1x64xf32> to vector<1x32xf32>
    %51 = vector.extract_strided_slice %38 {offsets = [0, 64], sizes = [1, 32], strides = [1, 1]} : vector<1x96xf32> to vector<1x32xf32>
    %52 = vector.extract_strided_slice %37 {offsets = [0, 64], sizes = [1, 32], strides = [1, 1]} : vector<1x128xf32> to vector<1x32xf32>
    %53 = arith.mulf %49, %52 : vector<1x32xf32>
    %54 = arith.addf %51, %53 : vector<1x32xf32>
    %55 = math.tanh %54 : vector<1x32xf32>
    %cst_37 = arith.constant 1.000000e+00 : f32
    %56 = vector.broadcast %cst_37 : f32 to vector<1x32xf32>
    %57 = arith.subf %56, %50 : vector<1x32xf32>
    %58 = arith.mulf %57, %55 : vector<1x32xf32>
    %59 = arith.mulf %50, %34 : vector<1x32xf32>
    %60 = arith.addf %58, %59 : vector<1x32xf32>
    %c1 = arith.constant 1 : index
    %c0_38 = arith.constant 0 : index
    %61 = vector.load %arg23[%c1, %c0_38] : memref<9x32xf32, #tpu.memory_space<vmem>>, vector<1x32xf32>
    tpu.vector_store %arg23[%c1, %c0_38], %60 {strides = array<i32>} : memref<9x32xf32, #tpu.memory_space<vmem>>, vector<1x32xf32>,
    %cst_39 = arith.constant dense<0.000000e+00> : vector<1x128xf32>
    %62 = tpu.matmul %60, %32, %cst_39 {dimension_numbers = #tpu.dot_dimension_numbers<[1], [0], [0], [1], [0, 0, 1, 1], [], []>} : vector<1x32xf32>, vector<32x128xf32>, vector<1x128xf32> -> vector<1x128xf32>
    %63 = arith.addf %62, %33 : vector<1x128xf32>
    %64 = vector.extract_strided_slice %30 {offsets = [1, 0], sizes = [1, 96], strides = [1, 1]} : vector<8x96xf32> to vector<1x96xf32>
    %65 = vector.extract_strided_slice %64 {offsets = [0, 0], sizes = [1, 64], strides = [1, 1]} : vector<1x96xf32> to vector<1x64xf32>
    %66 = vector.extract_strided_slice %63 {offsets = [0, 0], sizes = [1, 64], strides = [1, 1]} : vector<1x128xf32> to vector<1x64xf32>
    %67 = arith.addf %65, %66 : vector<1x64xf32>
    %cst_40 = arith.constant 5.000000e-01 : f32
    %68 = vector.broadcast %cst_40 : f32 to vector<1x64xf32>
    %69 = arith.mulf %68, %67 : vector<1x64xf32>
    %70 = math.tanh %69 : vector<1x64xf32>
    %cst_41 = arith.constant 1.000000e+00 : f32
    %71 = vector.broadcast %cst_41 : f32 to vector<1x64xf32>
    %72 = arith.addf %70, %71 : vector<1x64xf32>
    %cst_42 = arith.constant 5.000000e-01 : f32
    %73 = vector.broadcast %cst_42 : f32 to vector<1x64xf32>
    %74 = arith.mulf %73, %72 : vector<1x64xf32>
    %75 = vector.extract_strided_slice %74 {offsets = [0, 0], sizes = [1, 32], strides = [1, 1]} : vector<1x64xf32> to vector<1x32xf32>
    %76 = vector.extract_strided_slice %74 {offsets = [0, 32], sizes = [1, 32], strides = [1, 1]} : vector<1x64xf32> to vector<1x32xf32>
    %77 = vector.extract_strided_slice %64 {offsets = [0, 64], sizes = [1, 32], strides = [1, 1]} : vector<1x96xf32> to vector<1x32xf32>
    %78 = vector.extract_strided_slice %63 {offsets = [0, 64], sizes = [1, 32], strides = [1, 1]} : vector<1x128xf32> to vector<1x32xf32>
    %79 = arith.mulf %75, %78 : vector<1x32xf32>
    %80 = arith.addf %77, %79 : vector<1x32xf32>
    %81 = math.tanh %80 : vector<1x32xf32>
    %cst_43 = arith.constant 1.000000e+00 : f32
    %82 = vector.broadcast %cst_43 : f32 to vector<1x32xf32>
    %83 = arith.subf %82, %76 : vector<1x32xf32>
    %84 = arith.mulf %83, %81 : vector<1x32xf32>
    %85 = arith.mulf %76, %60 : vector<1x32xf32>
    %86 = arith.addf %84, %85 : vector<1x32xf32>
    %c2 = arith.constant 2 : index
    %c0_44 = arith.constant 0 : index
    %87 = vector.load %arg23[%c2, %c0_44] : memref<9x32xf32, #tpu.memory_space<vmem>>, vector<1x32xf32>
    tpu.vector_store %arg23[%c2, %c0_44], %86 {strides = array<i32>} : memref<9x32xf32, #tpu.memory_space<vmem>>, vector<1x32xf32>,
    %cst_45 = arith.constant dense<0.000000e+00> : vector<1x128xf32>
    %88 = tpu.matmul %86, %32, %cst_45 {dimension_numbers = #tpu.dot_dimension_numbers<[1], [0], [0], [1], [0, 0, 1, 1], [], []>} : vector<1x32xf32>, vector<32x128xf32>, vector<1x128xf32> -> vector<1x128xf32>
    %89 = arith.addf %88, %33 : vector<1x128xf32>
    %90 = vector.extract_strided_slice %30 {offsets = [2, 0], sizes = [1, 96], strides = [1, 1]} : vector<8x96xf32> to vector<1x96xf32>
    %91 = vector.extract_strided_slice %90 {offsets = [0, 0], sizes = [1, 64], strides = [1, 1]} : vector<1x96xf32> to vector<1x64xf32>
    %92 = vector.extract_strided_slice %89 {offsets = [0, 0], sizes = [1, 64], strides = [1, 1]} : vector<1x128xf32> to vector<1x64xf32>
    %93 = arith.addf %91, %92 : vector<1x64xf32>
    %cst_46 = arith.constant 5.000000e-01 : f32
    %94 = vector.broadcast %cst_46 : f32 to vector<1x64xf32>
    %95 = arith.mulf %94, %93 : vector<1x64xf32>
    %96 = math.tanh %95 : vector<1x64xf32>
    %cst_47 = arith.constant 1.000000e+00 : f32
    %97 = vector.broadcast %cst_47 : f32 to vector<1x64xf32>
    %98 = arith.addf %96, %97 : vector<1x64xf32>
    %cst_48 = arith.constant 5.000000e-01 : f32
    %99 = vector.broadcast %cst_48 : f32 to vector<1x64xf32>
    %100 = arith.mulf %99, %98 : vector<1x64xf32>
    %101 = vector.extract_strided_slice %100 {offsets = [0, 0], sizes = [1, 32], strides = [1, 1]} : vector<1x64xf32> to vector<1x32xf32>
    %102 = vector.extract_strided_slice %100 {offsets = [0, 32], sizes = [1, 32], strides = [1, 1]} : vector<1x64xf32> to vector<1x32xf32>
    %103 = vector.extract_strided_slice %90 {offsets = [0, 64], sizes = [1, 32], strides = [1, 1]} : vector<1x96xf32> to vector<1x32xf32>
    %104 = vector.extract_strided_slice %89 {offsets = [0, 64], sizes = [1, 32], strides = [1, 1]} : vector<1x128xf32> to vector<1x32xf32>
    %105 = arith.mulf %101, %104 : vector<1x32xf32>
    %106 = arith.addf %103, %105 : vector<1x32xf32>
    %107 = math.tanh %106 : vector<1x32xf32>
    %cst_49 = arith.constant 1.000000e+00 : f32
    %108 = vector.broadcast %cst_49 : f32 to vector<1x32xf32>
    %109 = arith.subf %108, %102 : vector<1x32xf32>
    %110 = arith.mulf %109, %107 : vector<1x32xf32>
    %111 = arith.mulf %102, %86 : vector<1x32xf32>
    %112 = arith.addf %110, %111 : vector<1x32xf32>
    %c3 = arith.constant 3 : index
    %c0_50 = arith.constant 0 : index
    %113 = vector.load %arg23[%c3, %c0_50] : memref<9x32xf32, #tpu.memory_space<vmem>>, vector<1x32xf32>
    tpu.vector_store %arg23[%c3, %c0_50], %112 {strides = array<i32>} : memref<9x32xf32, #tpu.memory_space<vmem>>, vector<1x32xf32>,
    %cst_51 = arith.constant dense<0.000000e+00> : vector<1x128xf32>
    %114 = tpu.matmul %112, %32, %cst_51 {dimension_numbers = #tpu.dot_dimension_numbers<[1], [0], [0], [1], [0, 0, 1, 1], [], []>} : vector<1x32xf32>, vector<32x128xf32>, vector<1x128xf32> -> vector<1x128xf32>
    %115 = arith.addf %114, %33 : vector<1x128xf32>
    %116 = vector.extract_strided_slice %30 {offsets = [3, 0], sizes = [1, 96], strides = [1, 1]} : vector<8x96xf32> to vector<1x96xf32>
    %117 = vector.extract_strided_slice %116 {offsets = [0, 0], sizes = [1, 64], strides = [1, 1]} : vector<1x96xf32> to vector<1x64xf32>
    %118 = vector.extract_strided_slice %115 {offsets = [0, 0], sizes = [1, 64], strides = [1, 1]} : vector<1x128xf32> to vector<1x64xf32>
    %119 = arith.addf %117, %118 : vector<1x64xf32>
    %cst_52 = arith.constant 5.000000e-01 : f32
    %120 = vector.broadcast %cst_52 : f32 to vector<1x64xf32>
    %121 = arith.mulf %120, %119 : vector<1x64xf32>
    %122 = math.tanh %121 : vector<1x64xf32>
    %cst_53 = arith.constant 1.000000e+00 : f32
    %123 = vector.broadcast %cst_53 : f32 to vector<1x64xf32>
    %124 = arith.addf %122, %123 : vector<1x64xf32>
    %cst_54 = arith.constant 5.000000e-01 : f32
    %125 = vector.broadcast %cst_54 : f32 to vector<1x64xf32>
    %126 = arith.mulf %125, %124 : vector<1x64xf32>
    %127 = vector.extract_strided_slice %126 {offsets = [0, 0], sizes = [1, 32], strides = [1, 1]} : vector<1x64xf32> to vector<1x32xf32>
    %128 = vector.extract_strided_slice %126 {offsets = [0, 32], sizes = [1, 32], strides = [1, 1]} : vector<1x64xf32> to vector<1x32xf32>
    %129 = vector.extract_strided_slice %116 {offsets = [0, 64], sizes = [1, 32], strides = [1, 1]} : vector<1x96xf32> to vector<1x32xf32>
    %130 = vector.extract_strided_slice %115 {offsets = [0, 64], sizes = [1, 32], strides = [1, 1]} : vector<1x128xf32> to vector<1x32xf32>
    %131 = arith.mulf %127, %130 : vector<1x32xf32>
    %132 = arith.addf %129, %131 : vector<1x32xf32>
    %133 = math.tanh %132 : vector<1x32xf32>
    %cst_55 = arith.constant 1.000000e+00 : f32
    %134 = vector.broadcast %cst_55 : f32 to vector<1x32xf32>
    %135 = arith.subf %134, %128 : vector<1x32xf32>
    %136 = arith.mulf %135, %133 : vector<1x32xf32>
    %137 = arith.mulf %128, %112 : vector<1x32xf32>
    %138 = arith.addf %136, %137 : vector<1x32xf32>
    %c4 = arith.constant 4 : index
    %c0_56 = arith.constant 0 : index
    %139 = vector.load %arg23[%c4, %c0_56] : memref<9x32xf32, #tpu.memory_space<vmem>>, vector<1x32xf32>
    tpu.vector_store %arg23[%c4, %c0_56], %138 {strides = array<i32>} : memref<9x32xf32, #tpu.memory_space<vmem>>, vector<1x32xf32>,
    %cst_57 = arith.constant dense<0.000000e+00> : vector<1x128xf32>
    %140 = tpu.matmul %138, %32, %cst_57 {dimension_numbers = #tpu.dot_dimension_numbers<[1], [0], [0], [1], [0, 0, 1, 1], [], []>} : vector<1x32xf32>, vector<32x128xf32>, vector<1x128xf32> -> vector<1x128xf32>
    %141 = arith.addf %140, %33 : vector<1x128xf32>
    %142 = vector.extract_strided_slice %30 {offsets = [4, 0], sizes = [1, 96], strides = [1, 1]} : vector<8x96xf32> to vector<1x96xf32>
    %143 = vector.extract_strided_slice %142 {offsets = [0, 0], sizes = [1, 64], strides = [1, 1]} : vector<1x96xf32> to vector<1x64xf32>
    %144 = vector.extract_strided_slice %141 {offsets = [0, 0], sizes = [1, 64], strides = [1, 1]} : vector<1x128xf32> to vector<1x64xf32>
    %145 = arith.addf %143, %144 : vector<1x64xf32>
    %cst_58 = arith.constant 5.000000e-01 : f32
    %146 = vector.broadcast %cst_58 : f32 to vector<1x64xf32>
    %147 = arith.mulf %146, %145 : vector<1x64xf32>
    %148 = math.tanh %147 : vector<1x64xf32>
    %cst_59 = arith.constant 1.000000e+00 : f32
    %149 = vector.broadcast %cst_59 : f32 to vector<1x64xf32>
    %150 = arith.addf %148, %149 : vector<1x64xf32>
    %cst_60 = arith.constant 5.000000e-01 : f32
    %151 = vector.broadcast %cst_60 : f32 to vector<1x64xf32>
    %152 = arith.mulf %151, %150 : vector<1x64xf32>
    %153 = vector.extract_strided_slice %152 {offsets = [0, 0], sizes = [1, 32], strides = [1, 1]} : vector<1x64xf32> to vector<1x32xf32>
    %154 = vector.extract_strided_slice %152 {offsets = [0, 32], sizes = [1, 32], strides = [1, 1]} : vector<1x64xf32> to vector<1x32xf32>
    %155 = vector.extract_strided_slice %142 {offsets = [0, 64], sizes = [1, 32], strides = [1, 1]} : vector<1x96xf32> to vector<1x32xf32>
    %156 = vector.extract_strided_slice %141 {offsets = [0, 64], sizes = [1, 32], strides = [1, 1]} : vector<1x128xf32> to vector<1x32xf32>
    %157 = arith.mulf %153, %156 : vector<1x32xf32>
    %158 = arith.addf %155, %157 : vector<1x32xf32>
    %159 = math.tanh %158 : vector<1x32xf32>
    %cst_61 = arith.constant 1.000000e+00 : f32
    %160 = vector.broadcast %cst_61 : f32 to vector<1x32xf32>
    %161 = arith.subf %160, %154 : vector<1x32xf32>
    %162 = arith.mulf %161, %159 : vector<1x32xf32>
    %163 = arith.mulf %154, %138 : vector<1x32xf32>
    %164 = arith.addf %162, %163 : vector<1x32xf32>
    %c5 = arith.constant 5 : index
    %c0_62 = arith.constant 0 : index
    %165 = vector.load %arg23[%c5, %c0_62] : memref<9x32xf32, #tpu.memory_space<vmem>>, vector<1x32xf32>
    tpu.vector_store %arg23[%c5, %c0_62], %164 {strides = array<i32>} : memref<9x32xf32, #tpu.memory_space<vmem>>, vector<1x32xf32>,
    %cst_63 = arith.constant dense<0.000000e+00> : vector<1x128xf32>
    %166 = tpu.matmul %164, %32, %cst_63 {dimension_numbers = #tpu.dot_dimension_numbers<[1], [0], [0], [1], [0, 0, 1, 1], [], []>} : vector<1x32xf32>, vector<32x128xf32>, vector<1x128xf32> -> vector<1x128xf32>
    %167 = arith.addf %166, %33 : vector<1x128xf32>
    %168 = vector.extract_strided_slice %30 {offsets = [5, 0], sizes = [1, 96], strides = [1, 1]} : vector<8x96xf32> to vector<1x96xf32>
    %169 = vector.extract_strided_slice %168 {offsets = [0, 0], sizes = [1, 64], strides = [1, 1]} : vector<1x96xf32> to vector<1x64xf32>
    %170 = vector.extract_strided_slice %167 {offsets = [0, 0], sizes = [1, 64], strides = [1, 1]} : vector<1x128xf32> to vector<1x64xf32>
    %171 = arith.addf %169, %170 : vector<1x64xf32>
    %cst_64 = arith.constant 5.000000e-01 : f32
    %172 = vector.broadcast %cst_64 : f32 to vector<1x64xf32>
    %173 = arith.mulf %172, %171 : vector<1x64xf32>
    %174 = math.tanh %173 : vector<1x64xf32>
    %cst_65 = arith.constant 1.000000e+00 : f32
    %175 = vector.broadcast %cst_65 : f32 to vector<1x64xf32>
    %176 = arith.addf %174, %175 : vector<1x64xf32>
    %cst_66 = arith.constant 5.000000e-01 : f32
    %177 = vector.broadcast %cst_66 : f32 to vector<1x64xf32>
    %178 = arith.mulf %177, %176 : vector<1x64xf32>
    %179 = vector.extract_strided_slice %178 {offsets = [0, 0], sizes = [1, 32], strides = [1, 1]} : vector<1x64xf32> to vector<1x32xf32>
    %180 = vector.extract_strided_slice %178 {offsets = [0, 32], sizes = [1, 32], strides = [1, 1]} : vector<1x64xf32> to vector<1x32xf32>
    %181 = vector.extract_strided_slice %168 {offsets = [0, 64], sizes = [1, 32], strides = [1, 1]} : vector<1x96xf32> to vector<1x32xf32>
    %182 = vector.extract_strided_slice %167 {offsets = [0, 64], sizes = [1, 32], strides = [1, 1]} : vector<1x128xf32> to vector<1x32xf32>
    %183 = arith.mulf %179, %182 : vector<1x32xf32>
    %184 = arith.addf %181, %183 : vector<1x32xf32>
    %185 = math.tanh %184 : vector<1x32xf32>
    %cst_67 = arith.constant 1.000000e+00 : f32
    %186 = vector.broadcast %cst_67 : f32 to vector<1x32xf32>
    %187 = arith.subf %186, %180 : vector<1x32xf32>
    %188 = arith.mulf %187, %185 : vector<1x32xf32>
    %189 = arith.mulf %180, %164 : vector<1x32xf32>
    %190 = arith.addf %188, %189 : vector<1x32xf32>
    %c6 = arith.constant 6 : index
    %c0_68 = arith.constant 0 : index
    %191 = vector.load %arg23[%c6, %c0_68] : memref<9x32xf32, #tpu.memory_space<vmem>>, vector<1x32xf32>
    tpu.vector_store %arg23[%c6, %c0_68], %190 {strides = array<i32>} : memref<9x32xf32, #tpu.memory_space<vmem>>, vector<1x32xf32>,
    %cst_69 = arith.constant dense<0.000000e+00> : vector<1x128xf32>
    %192 = tpu.matmul %190, %32, %cst_69 {dimension_numbers = #tpu.dot_dimension_numbers<[1], [0], [0], [1], [0, 0, 1, 1], [], []>} : vector<1x32xf32>, vector<32x128xf32>, vector<1x128xf32> -> vector<1x128xf32>
    %193 = arith.addf %192, %33 : vector<1x128xf32>
    %194 = vector.extract_strided_slice %30 {offsets = [6, 0], sizes = [1, 96], strides = [1, 1]} : vector<8x96xf32> to vector<1x96xf32>
    %195 = vector.extract_strided_slice %194 {offsets = [0, 0], sizes = [1, 64], strides = [1, 1]} : vector<1x96xf32> to vector<1x64xf32>
    %196 = vector.extract_strided_slice %193 {offsets = [0, 0], sizes = [1, 64], strides = [1, 1]} : vector<1x128xf32> to vector<1x64xf32>
    %197 = arith.addf %195, %196 : vector<1x64xf32>
    %cst_70 = arith.constant 5.000000e-01 : f32
    %198 = vector.broadcast %cst_70 : f32 to vector<1x64xf32>
    %199 = arith.mulf %198, %197 : vector<1x64xf32>
    %200 = math.tanh %199 : vector<1x64xf32>
    %cst_71 = arith.constant 1.000000e+00 : f32
    %201 = vector.broadcast %cst_71 : f32 to vector<1x64xf32>
    %202 = arith.addf %200, %201 : vector<1x64xf32>
    %cst_72 = arith.constant 5.000000e-01 : f32
    %203 = vector.broadcast %cst_72 : f32 to vector<1x64xf32>
    %204 = arith.mulf %203, %202 : vector<1x64xf32>
    %205 = vector.extract_strided_slice %204 {offsets = [0, 0], sizes = [1, 32], strides = [1, 1]} : vector<1x64xf32> to vector<1x32xf32>
    %206 = vector.extract_strided_slice %204 {offsets = [0, 32], sizes = [1, 32], strides = [1, 1]} : vector<1x64xf32> to vector<1x32xf32>
    %207 = vector.extract_strided_slice %194 {offsets = [0, 64], sizes = [1, 32], strides = [1, 1]} : vector<1x96xf32> to vector<1x32xf32>
    %208 = vector.extract_strided_slice %193 {offsets = [0, 64], sizes = [1, 32], strides = [1, 1]} : vector<1x128xf32> to vector<1x32xf32>
    %209 = arith.mulf %205, %208 : vector<1x32xf32>
    %210 = arith.addf %207, %209 : vector<1x32xf32>
    %211 = math.tanh %210 : vector<1x32xf32>
    %cst_73 = arith.constant 1.000000e+00 : f32
    %212 = vector.broadcast %cst_73 : f32 to vector<1x32xf32>
    %213 = arith.subf %212, %206 : vector<1x32xf32>
    %214 = arith.mulf %213, %211 : vector<1x32xf32>
    %215 = arith.mulf %206, %190 : vector<1x32xf32>
    %216 = arith.addf %214, %215 : vector<1x32xf32>
    %c7 = arith.constant 7 : index
    %c0_74 = arith.constant 0 : index
    %217 = vector.load %arg23[%c7, %c0_74] : memref<9x32xf32, #tpu.memory_space<vmem>>, vector<1x32xf32>
    tpu.vector_store %arg23[%c7, %c0_74], %216 {strides = array<i32>} : memref<9x32xf32, #tpu.memory_space<vmem>>, vector<1x32xf32>,
    %cst_75 = arith.constant dense<0.000000e+00> : vector<1x128xf32>
    %218 = tpu.matmul %216, %32, %cst_75 {dimension_numbers = #tpu.dot_dimension_numbers<[1], [0], [0], [1], [0, 0, 1, 1], [], []>} : vector<1x32xf32>, vector<32x128xf32>, vector<1x128xf32> -> vector<1x128xf32>
    %219 = arith.addf %218, %33 : vector<1x128xf32>
    %220 = vector.extract_strided_slice %30 {offsets = [7, 0], sizes = [1, 96], strides = [1, 1]} : vector<8x96xf32> to vector<1x96xf32>
    %221 = vector.extract_strided_slice %220 {offsets = [0, 0], sizes = [1, 64], strides = [1, 1]} : vector<1x96xf32> to vector<1x64xf32>
    %222 = vector.extract_strided_slice %219 {offsets = [0, 0], sizes = [1, 64], strides = [1, 1]} : vector<1x128xf32> to vector<1x64xf32>
    %223 = arith.addf %221, %222 : vector<1x64xf32>
    %cst_76 = arith.constant 5.000000e-01 : f32
    %224 = vector.broadcast %cst_76 : f32 to vector<1x64xf32>
    %225 = arith.mulf %224, %223 : vector<1x64xf32>
    %226 = math.tanh %225 : vector<1x64xf32>
    %cst_77 = arith.constant 1.000000e+00 : f32
    %227 = vector.broadcast %cst_77 : f32 to vector<1x64xf32>
    %228 = arith.addf %226, %227 : vector<1x64xf32>
    %cst_78 = arith.constant 5.000000e-01 : f32
    %229 = vector.broadcast %cst_78 : f32 to vector<1x64xf32>
    %230 = arith.mulf %229, %228 : vector<1x64xf32>
    %231 = vector.extract_strided_slice %230 {offsets = [0, 0], sizes = [1, 32], strides = [1, 1]} : vector<1x64xf32> to vector<1x32xf32>
    %232 = vector.extract_strided_slice %230 {offsets = [0, 32], sizes = [1, 32], strides = [1, 1]} : vector<1x64xf32> to vector<1x32xf32>
    %233 = vector.extract_strided_slice %220 {offsets = [0, 64], sizes = [1, 32], strides = [1, 1]} : vector<1x96xf32> to vector<1x32xf32>
    %234 = vector.extract_strided_slice %219 {offsets = [0, 64], sizes = [1, 32], strides = [1, 1]} : vector<1x128xf32> to vector<1x32xf32>
    %235 = arith.mulf %231, %234 : vector<1x32xf32>
    %236 = arith.addf %233, %235 : vector<1x32xf32>
    %237 = math.tanh %236 : vector<1x32xf32>
    %cst_79 = arith.constant 1.000000e+00 : f32
    %238 = vector.broadcast %cst_79 : f32 to vector<1x32xf32>
    %239 = arith.subf %238, %232 : vector<1x32xf32>
    %240 = arith.mulf %239, %237 : vector<1x32xf32>
    %241 = arith.mulf %232, %216 : vector<1x32xf32>
    %242 = arith.addf %240, %241 : vector<1x32xf32>
    %c8 = arith.constant 8 : index
    %c0_80 = arith.constant 0 : index
    %243 = vector.load %arg23[%c8, %c0_80] : memref<9x32xf32, #tpu.memory_space<vmem>>, vector<1x32xf32>
    tpu.vector_store %arg23[%c8, %c0_80], %242 {strides = array<i32>} : memref<9x32xf32, #tpu.memory_space<vmem>>, vector<1x32xf32>,
    %c0_81 = arith.constant 0 : index
    %c0_82 = arith.constant 0 : index
    %244 = vector.load %arg23[%c0_81, %c0_82] : memref<9x32xf32, #tpu.memory_space<vmem>>, vector<9x32xf32>
    %c0_83 = arith.constant 0 : index
    %c0_84 = arith.constant 0 : index
    %245 = vector.load %arg13[%c0_83, %c0_84] : memref<32x128xf32, #tpu.memory_space<vmem>>, vector<32x128xf32>
    %cst_85 = arith.constant dense<0.000000e+00> : vector<9x128xf32>
    %246 = tpu.matmul %244, %245, %cst_85 {dimension_numbers = #tpu.dot_dimension_numbers<[1], [0], [0], [1], [0, 0, 1, 1], [], []>} : vector<9x32xf32>, vector<32x128xf32>, vector<9x128xf32> -> vector<9x128xf32>
    %c0_86 = arith.constant 0 : index
    %c0_87 = arith.constant 0 : index
    %247 = vector.load %arg14[%c0_86, %c0_87] : memref<1x128xf32, #tpu.memory_space<vmem>>, vector<1x128xf32>
    %248 = vector.broadcast %247 : vector<1x128xf32> to vector<9x128xf32>
    %249 = arith.addf %246, %248 : vector<9x128xf32>
    %250 = vector.extract_strided_slice %249 {offsets = [0, 0], sizes = [9, 32], strides = [1, 1]} : vector<9x128xf32> to vector<9x32xf32>
    %251 = vector.extract_strided_slice %249 {offsets = [8, 32], sizes = [1, 96], strides = [1, 1]} : vector<9x128xf32> to vector<1x96xf32>
    %c0_88 = arith.constant 0 : index
    %c0_89 = arith.constant 0 : index
    %252 = vector.load %arg15[%c0_88, %c0_89] : memref<32x128xf32, #tpu.memory_space<vmem>>, vector<32x128xf32>
    %c0_90 = arith.constant 0 : index
    %c0_91 = arith.constant 0 : index
    %253 = vector.load %arg16[%c0_90, %c0_91] : memref<1x128xf32, #tpu.memory_space<vmem>>, vector<1x128xf32>
    %c0_92 = arith.constant 0 : index
    %c0_93 = arith.constant 0 : index
    %254 = vector.load %arg17[%c0_92, %c0_93] : memref<1x32xf32, #tpu.memory_space<vmem>>, vector<1x32xf32>
    %255 = tpu.iota {dimensions = array<i32: 0>} : vector<9x1xi32>
    %256 = tpu.iota {dimensions = array<i32: 0>} : vector<8x1xi32>
    %257 = tpu.iota {dimensions = array<i32: 1>} : vector<1x8xi32>
    %c0_94 = arith.constant 0 : index
    %c0_95 = arith.constant 0 : index
    %258 = vector.load %arg19[%c0_94, %c0_95] : memref<1x96xf32, #tpu.memory_space<vmem>>, vector<1x96xf32>
    %cst_96 = arith.constant 0.000000e+00 : f32
    %259 = vector.broadcast %cst_96 : f32 to vector<9x1xf32>
    %c0_i32 = arith.constant 0 : i32
    %260 = vector.broadcast %c0_i32 : i32 to vector<1x1xi32>
    %cst_97 = arith.constant 0.000000e+00 : f32
    %261 = vector.broadcast %cst_97 : f32 to vector<1x1xf32>
    %c0_i32_98 = arith.constant 0 : i32
    %262 = vector.broadcast %c0_i32_98 : i32 to vector<1x1xi32>
    %c-1_i32 = arith.constant -1 : i32
    %263 = vector.broadcast %c-1_i32 : i32 to vector<1x8xi32>
    %264 = vector.extract_strided_slice %258 {offsets = [0, 0], sizes = [1, 64], strides = [1, 1]} : vector<1x96xf32> to vector<1x64xf32>
    %265 = vector.extract_strided_slice %251 {offsets = [0, 0], sizes = [1, 64], strides = [1, 1]} : vector<1x96xf32> to vector<1x64xf32>
    %266 = arith.addf %264, %265 : vector<1x64xf32>
    %cst_99 = arith.constant 5.000000e-01 : f32
    %267 = vector.broadcast %cst_99 : f32 to vector<1x64xf32>
    %268 = arith.mulf %267, %266 : vector<1x64xf32>
    %269 = math.tanh %268 : vector<1x64xf32>
    %cst_100 = arith.constant 1.000000e+00 : f32
    %270 = vector.broadcast %cst_100 : f32 to vector<1x64xf32>
    %271 = arith.addf %269, %270 : vector<1x64xf32>
    %cst_101 = arith.constant 5.000000e-01 : f32
    %272 = vector.broadcast %cst_101 : f32 to vector<1x64xf32>
    %273 = arith.mulf %272, %271 : vector<1x64xf32>
    %274 = vector.extract_strided_slice %273 {offsets = [0, 0], sizes = [1, 32], strides = [1, 1]} : vector<1x64xf32> to vector<1x32xf32>
    %275 = vector.extract_strided_slice %273 {offsets = [0, 32], sizes = [1, 32], strides = [1, 1]} : vector<1x64xf32> to vector<1x32xf32>
    %276 = vector.extract_strided_slice %258 {offsets = [0, 64], sizes = [1, 32], strides = [1, 1]} : vector<1x96xf32> to vector<1x32xf32>
    %277 = vector.extract_strided_slice %251 {offsets = [0, 64], sizes = [1, 32], strides = [1, 1]} : vector<1x96xf32> to vector<1x32xf32>
    %278 = arith.mulf %274, %277 : vector<1x32xf32>
    %279 = arith.addf %276, %278 : vector<1x32xf32>
    %280 = math.tanh %279 : vector<1x32xf32>
    %cst_102 = arith.constant 1.000000e+00 : f32
    %281 = vector.broadcast %cst_102 : f32 to vector<1x32xf32>
    %282 = arith.subf %281, %275 : vector<1x32xf32>
    %283 = arith.mulf %282, %280 : vector<1x32xf32>
    %284 = arith.mulf %275, %242 : vector<1x32xf32>
    %285 = arith.addf %283, %284 : vector<1x32xf32>
    %cst_103 = arith.constant dense<0.000000e+00> : vector<1x128xf32>
    %286 = tpu.matmul %285, %252, %cst_103 {dimension_numbers = #tpu.dot_dimension_numbers<[1], [0], [0], [1], [0, 0, 1, 1], [], []>} : vector<1x32xf32>, vector<32x128xf32>, vector<1x128xf32> -> vector<1x128xf32>
    %287 = arith.addf %286, %253 : vector<1x128xf32>
    %288 = vector.extract_strided_slice %287 {offsets = [0, 0], sizes = [1, 32], strides = [1, 1]} : vector<1x128xf32> to vector<1x32xf32>
    %289 = vector.extract_strided_slice %287 {offsets = [0, 32], sizes = [1, 96], strides = [1, 1]} : vector<1x128xf32> to vector<1x96xf32>
    %290 = vector.broadcast %288 : vector<1x32xf32> to vector<9x32xf32>
    %291 = arith.addf %250, %290 : vector<9x32xf32>
    %292 = math.tanh %291 : vector<9x32xf32>
    %293 = vector.broadcast %254 : vector<1x32xf32> to vector<9x32xf32>
    %294 = arith.mulf %292, %293 : vector<9x32xf32>
    %cst_104 = arith.constant dense<0.000000e+00> : vector<9xf32>
    %295 = vector.multi_reduction <add>, %294, %cst_104 [1] : vector<9x32xf32> to vector<9xf32>
    %296 = vector.shape_cast %295 : vector<9xf32> to vector<9x1xf32>
    %cst_105 = arith.constant 0.000000e+00 : f32
    %297 = vector.broadcast %cst_105 : f32 to vector<9x1xf32>
    %298 = arith.cmpf ogt, %259, %297 : vector<9x1xf32>
    %cst_106 = arith.constant -1.000000e+30 : f32
    %299 = vector.broadcast %cst_106 : f32 to vector<9x1xf32>
    %300 = arith.select %298, %299, %296 : vector<9x1xi1>, vector<9x1xf32>
    %301 = vector.shape_cast %300 : vector<9x1xf32> to vector<1x9x1xf32>
    %cst_107 = arith.constant dense<0xFF800000> : vector<1xf32>
    %302 = vector.multi_reduction <maximumf>, %301, %cst_107 [1, 2] : vector<1x9x1xf32> to vector<1xf32>
    %303 = vector.shape_cast %302 : vector<1xf32> to vector<1x1x1xf32>
    %304 = vector.extract %303[0, 0, 0] : f32 from vector<1x1x1xf32>
    %305 = vector.broadcast %304 : f32 to vector<1x1xf32>
    %306 = vector.broadcast %305 : vector<1x1xf32> to vector<9x1xf32>
    %307 = arith.subf %300, %306 : vector<9x1xf32>
    %308 = math.exp %307 : vector<9x1xf32>
    %309 = vector.shape_cast %308 : vector<9x1xf32> to vector<1x9x1xf32>
    %cst_108 = arith.constant dense<0.000000e+00> : vector<1xf32>
    %310 = vector.multi_reduction <add>, %309, %cst_108 [1, 2] : vector<1x9x1xf32> to vector<1xf32>
    %311 = vector.shape_cast %310 : vector<1xf32> to vector<1x1x1xf32>
    %312 = vector.extract %311[0, 0, 0] : f32 from vector<1x1x1xf32>
    %313 = vector.broadcast %312 : f32 to vector<1x1xf32>
    %314 = math.log %313 : vector<1x1xf32>
    %cst_109 = arith.constant 0.000000e+00 : f32
    %315 = vector.broadcast %cst_109 : f32 to vector<1x1xf32>
    %316 = arith.subf %315, %314 : vector<1x1xf32>
    %317 = vector.broadcast %305 : vector<1x1xf32> to vector<9x1xf32>
    %318 = arith.cmpf oeq, %300, %317 : vector<9x1xf32>
    %c9_i32 = arith.constant 9 : i32
    %319 = vector.broadcast %c9_i32 : i32 to vector<9x1xi32>
    %320 = arith.select %318, %255, %319 : vector<9x1xi1>, vector<9x1xi32>
    %321 = vector.shape_cast %320 : vector<9x1xi32> to vector<1x9x1xi32>
    %cst_110 = arith.constant dense<2147483647> : vector<1xi32>
    %322 = vector.multi_reduction <minsi>, %321, %cst_110 [1, 2] : vector<1x9x1xi32> to vector<1xi32>
    %323 = vector.shape_cast %322 : vector<1xi32> to vector<1x1x1xi32>
    %324 = vector.extract %323[0, 0, 0] : i32 from vector<1x1x1xi32>
    %325 = vector.broadcast %324 : i32 to vector<1x1xi32>
    %c0_i32_111 = arith.constant 0 : i32
    %326 = vector.broadcast %c0_i32_111 : i32 to vector<1x1xi32>
    %327 = arith.cmpi eq, %260, %326 : vector<1x1xi32>
    %c0_i32_112 = arith.constant 0 : i32
    %328 = vector.broadcast %c0_i32_112 : i32 to vector<1x1xi32>
    %329 = arith.cmpi eq, %325, %328 : vector<1x1xi32>
    %cst_113 = arith.constant dense<true> : vector<1x1xi1>
    %330 = arith.xori %329, %cst_113 : vector<1x1xi1>
    %331 = arith.andi %327, %330 : vector<1x1xi1>
    %332 = arith.addf %261, %316 : vector<1x1xf32>
    %333 = arith.select %327, %332, %261 : vector<1x1xi1>, vector<1x1xf32>
    %334 = vector.broadcast %325 : vector<1x1xi32> to vector<9x1xi32>
    %335 = arith.cmpi eq, %255, %334 : vector<9x1xi32>
    %336 = vector.broadcast %331 : vector<1x1xi1> to vector<9x1xi1>
    %337 = arith.andi %336, %335 : vector<9x1xi1>
    %cst_114 = arith.constant 1.000000e+00 : f32
    %338 = vector.broadcast %cst_114 : f32 to vector<9x1xf32>
    %339 = arith.select %337, %338, %259 : vector<9x1xi1>, vector<9x1xf32>
    %340 = vector.broadcast %262 : vector<1x1xi32> to vector<1x8xi32>
    %341 = arith.cmpi eq, %257, %340 : vector<1x8xi32>
    %342 = vector.broadcast %331 : vector<1x1xi1> to vector<1x8xi1>
    %343 = arith.andi %342, %341 : vector<1x8xi1>
    %c1_i32 = arith.constant 1 : i32
    %344 = vector.broadcast %c1_i32 : i32 to vector<1x1xi32>
    %345 = arith.subi %325, %344 : vector<1x1xi32>
    %346 = vector.shape_cast %345 : vector<1x1xi32> to vector<1x1xi32>
    %347 = vector.broadcast %346 : vector<1x1xi32> to vector<1x8xi32>
    %348 = arith.select %343, %347, %263 : vector<1x8xi1>, vector<1x8xi32>
    %c1_i32_115 = arith.constant 1 : i32
    %349 = vector.broadcast %c1_i32_115 : i32 to vector<1x1xi32>
    %350 = arith.addi %262, %349 : vector<1x1xi32>
    %351 = arith.select %331, %350, %262 : vector<1x1xi1>, vector<1x1xi32>
    %c1_i32_116 = arith.constant 1 : i32
    %352 = vector.broadcast %c1_i32_116 : i32 to vector<1x1xi32>
    %353 = arith.subi %325, %352 : vector<1x1xi32>
    %354 = vector.broadcast %353 : vector<1x1xi32> to vector<8x1xi32>
    %355 = arith.cmpi eq, %256, %354 : vector<8x1xi32>
    %cst_117 = arith.constant 0.000000e+00 : f32
    %356 = vector.shape_cast %355 : vector<8x1xi1> to vector<8x1xi1>
    %357 = vector.broadcast %356 : vector<8x1xi1> to vector<8x96xi1>
    %358 = vector.broadcast %cst_117 : f32 to vector<8x96xf32>
    %359 = arith.select %357, %31, %358 : vector<8x96xi1>, vector<8x96xf32>
    %cst_118 = arith.constant dense<0.000000e+00> : vector<96xf32>
    %360 = vector.multi_reduction <add>, %359, %cst_118 [0] : vector<8x96xf32> to vector<96xf32>
    %361 = vector.shape_cast %360 : vector<96xf32> to vector<1x96xf32>
    %362 = vector.shape_cast %331 : vector<1x1xi1> to vector<1x1xi1>
    %363 = vector.broadcast %362 : vector<1x1xi1> to vector<1x96xi1>
    %364 = arith.select %363, %361, %258 : vector<1x96xi1>, vector<1x96xf32>
    %365 = vector.shape_cast %327 : vector<1x1xi1> to vector<1x1xi1>
    %366 = vector.broadcast %365 : vector<1x1xi1> to vector<1x96xi1>
    %367 = arith.select %366, %289, %251 : vector<1x96xi1>, vector<1x96xf32>
    %368 = vector.shape_cast %327 : vector<1x1xi1> to vector<1x1xi1>
    %369 = vector.broadcast %368 : vector<1x1xi1> to vector<1x32xi1>
    %370 = arith.select %369, %285, %242 : vector<1x32xi1>, vector<1x32xf32>
    %371 = arith.andi %327, %329 : vector<1x1xi1>
    %c1_i32_119 = arith.constant 1 : i32
    %372 = vector.broadcast %c1_i32_119 : i32 to vector<1x1xi32>
    %373 = arith.select %371, %372, %260 : vector<1x1xi1>, vector<1x1xi32>
    %374 = vector.extract_strided_slice %364 {offsets = [0, 0], sizes = [1, 64], strides = [1, 1]} : vector<1x96xf32> to vector<1x64xf32>
    %375 = vector.extract_strided_slice %367 {offsets = [0, 0], sizes = [1, 64], strides = [1, 1]} : vector<1x96xf32> to vector<1x64xf32>
    %376 = arith.addf %374, %375 : vector<1x64xf32>
    %cst_120 = arith.constant 5.000000e-01 : f32
    %377 = vector.broadcast %cst_120 : f32 to vector<1x64xf32>
    %378 = arith.mulf %377, %376 : vector<1x64xf32>
    %379 = math.tanh %378 : vector<1x64xf32>
    %cst_121 = arith.constant 1.000000e+00 : f32
    %380 = vector.broadcast %cst_121 : f32 to vector<1x64xf32>
    %381 = arith.addf %379, %380 : vector<1x64xf32>
    %cst_122 = arith.constant 5.000000e-01 : f32
    %382 = vector.broadcast %cst_122 : f32 to vector<1x64xf32>
    %383 = arith.mulf %382, %381 : vector<1x64xf32>
    %384 = vector.extract_strided_slice %383 {offsets = [0, 0], sizes = [1, 32], strides = [1, 1]} : vector<1x64xf32> to vector<1x32xf32>
    %385 = vector.extract_strided_slice %383 {offsets = [0, 32], sizes = [1, 32], strides = [1, 1]} : vector<1x64xf32> to vector<1x32xf32>
    %386 = vector.extract_strided_slice %364 {offsets = [0, 64], sizes = [1, 32], strides = [1, 1]} : vector<1x96xf32> to vector<1x32xf32>
    %387 = vector.extract_strided_slice %367 {offsets = [0, 64], sizes = [1, 32], strides = [1, 1]} : vector<1x96xf32> to vector<1x32xf32>
    %388 = arith.mulf %384, %387 : vector<1x32xf32>
    %389 = arith.addf %386, %388 : vector<1x32xf32>
    %390 = math.tanh %389 : vector<1x32xf32>
    %cst_123 = arith.constant 1.000000e+00 : f32
    %391 = vector.broadcast %cst_123 : f32 to vector<1x32xf32>
    %392 = arith.subf %391, %385 : vector<1x32xf32>
    %393 = arith.mulf %392, %390 : vector<1x32xf32>
    %394 = arith.mulf %385, %370 : vector<1x32xf32>
    %395 = arith.addf %393, %394 : vector<1x32xf32>
    %cst_124 = arith.constant dense<0.000000e+00> : vector<1x128xf32>
    %396 = tpu.matmul %395, %252, %cst_124 {dimension_numbers = #tpu.dot_dimension_numbers<[1], [0], [0], [1], [0, 0, 1, 1], [], []>} : vector<1x32xf32>, vector<32x128xf32>, vector<1x128xf32> -> vector<1x128xf32>
    %397 = arith.addf %396, %253 : vector<1x128xf32>
    %398 = vector.extract_strided_slice %397 {offsets = [0, 0], sizes = [1, 32], strides = [1, 1]} : vector<1x128xf32> to vector<1x32xf32>
    %399 = vector.extract_strided_slice %397 {offsets = [0, 32], sizes = [1, 96], strides = [1, 1]} : vector<1x128xf32> to vector<1x96xf32>
    %400 = vector.broadcast %398 : vector<1x32xf32> to vector<9x32xf32>
    %401 = arith.addf %250, %400 : vector<9x32xf32>
    %402 = math.tanh %401 : vector<9x32xf32>
    %403 = vector.broadcast %254 : vector<1x32xf32> to vector<9x32xf32>
    %404 = arith.mulf %402, %403 : vector<9x32xf32>
    %cst_125 = arith.constant dense<0.000000e+00> : vector<9xf32>
    %405 = vector.multi_reduction <add>, %404, %cst_125 [1] : vector<9x32xf32> to vector<9xf32>
    %406 = vector.shape_cast %405 : vector<9xf32> to vector<9x1xf32>
    %cst_126 = arith.constant 0.000000e+00 : f32
    %407 = vector.broadcast %cst_126 : f32 to vector<9x1xf32>
    %408 = arith.cmpf ogt, %339, %407 : vector<9x1xf32>
    %cst_127 = arith.constant -1.000000e+30 : f32
    %409 = vector.broadcast %cst_127 : f32 to vector<9x1xf32>
    %410 = arith.select %408, %409, %406 : vector<9x1xi1>, vector<9x1xf32>
    %411 = vector.shape_cast %410 : vector<9x1xf32> to vector<1x9x1xf32>
    %cst_128 = arith.constant dense<0xFF800000> : vector<1xf32>
    %412 = vector.multi_reduction <maximumf>, %411, %cst_128 [1, 2] : vector<1x9x1xf32> to vector<1xf32>
    %413 = vector.shape_cast %412 : vector<1xf32> to vector<1x1x1xf32>
    %414 = vector.extract %413[0, 0, 0] : f32 from vector<1x1x1xf32>
    %415 = vector.broadcast %414 : f32 to vector<1x1xf32>
    %416 = vector.broadcast %415 : vector<1x1xf32> to vector<9x1xf32>
    %417 = arith.subf %410, %416 : vector<9x1xf32>
    %418 = math.exp %417 : vector<9x1xf32>
    %419 = vector.shape_cast %418 : vector<9x1xf32> to vector<1x9x1xf32>
    %cst_129 = arith.constant dense<0.000000e+00> : vector<1xf32>
    %420 = vector.multi_reduction <add>, %419, %cst_129 [1, 2] : vector<1x9x1xf32> to vector<1xf32>
    %421 = vector.shape_cast %420 : vector<1xf32> to vector<1x1x1xf32>
    %422 = vector.extract %421[0, 0, 0] : f32 from vector<1x1x1xf32>
    %423 = vector.broadcast %422 : f32 to vector<1x1xf32>
    %424 = math.log %423 : vector<1x1xf32>
    %cst_130 = arith.constant 0.000000e+00 : f32
    %425 = vector.broadcast %cst_130 : f32 to vector<1x1xf32>
    %426 = arith.subf %425, %424 : vector<1x1xf32>
    %427 = vector.broadcast %415 : vector<1x1xf32> to vector<9x1xf32>
    %428 = arith.cmpf oeq, %410, %427 : vector<9x1xf32>
    %c9_i32_131 = arith.constant 9 : i32
    %429 = vector.broadcast %c9_i32_131 : i32 to vector<9x1xi32>
    %430 = arith.select %428, %255, %429 : vector<9x1xi1>, vector<9x1xi32>
    %431 = vector.shape_cast %430 : vector<9x1xi32> to vector<1x9x1xi32>
    %cst_132 = arith.constant dense<2147483647> : vector<1xi32>
    %432 = vector.multi_reduction <minsi>, %431, %cst_132 [1, 2] : vector<1x9x1xi32> to vector<1xi32>
    %433 = vector.shape_cast %432 : vector<1xi32> to vector<1x1x1xi32>
    %434 = vector.extract %433[0, 0, 0] : i32 from vector<1x1x1xi32>
    %435 = vector.broadcast %434 : i32 to vector<1x1xi32>
    %c0_i32_133 = arith.constant 0 : i32
    %436 = vector.broadcast %c0_i32_133 : i32 to vector<1x1xi32>
    %437 = arith.cmpi eq, %373, %436 : vector<1x1xi32>
    %c0_i32_134 = arith.constant 0 : i32
    %438 = vector.broadcast %c0_i32_134 : i32 to vector<1x1xi32>
    %439 = arith.cmpi eq, %435, %438 : vector<1x1xi32>
    %cst_135 = arith.constant dense<true> : vector<1x1xi1>
    %440 = arith.xori %439, %cst_135 : vector<1x1xi1>
    %441 = arith.andi %437, %440 : vector<1x1xi1>
    %442 = arith.addf %333, %426 : vector<1x1xf32>
    %443 = arith.select %437, %442, %333 : vector<1x1xi1>, vector<1x1xf32>
    %444 = vector.broadcast %435 : vector<1x1xi32> to vector<9x1xi32>
    %445 = arith.cmpi eq, %255, %444 : vector<9x1xi32>
    %446 = vector.broadcast %441 : vector<1x1xi1> to vector<9x1xi1>
    %447 = arith.andi %446, %445 : vector<9x1xi1>
    %cst_136 = arith.constant 1.000000e+00 : f32
    %448 = vector.broadcast %cst_136 : f32 to vector<9x1xf32>
    %449 = arith.select %447, %448, %339 : vector<9x1xi1>, vector<9x1xf32>
    %450 = vector.broadcast %351 : vector<1x1xi32> to vector<1x8xi32>
    %451 = arith.cmpi eq, %257, %450 : vector<1x8xi32>
    %452 = vector.broadcast %441 : vector<1x1xi1> to vector<1x8xi1>
    %453 = arith.andi %452, %451 : vector<1x8xi1>
    %c1_i32_137 = arith.constant 1 : i32
    %454 = vector.broadcast %c1_i32_137 : i32 to vector<1x1xi32>
    %455 = arith.subi %435, %454 : vector<1x1xi32>
    %456 = vector.shape_cast %455 : vector<1x1xi32> to vector<1x1xi32>
    %457 = vector.broadcast %456 : vector<1x1xi32> to vector<1x8xi32>
    %458 = arith.select %453, %457, %348 : vector<1x8xi1>, vector<1x8xi32>
    %c1_i32_138 = arith.constant 1 : i32
    %459 = vector.broadcast %c1_i32_138 : i32 to vector<1x1xi32>
    %460 = arith.addi %351, %459 : vector<1x1xi32>
    %461 = arith.select %441, %460, %351 : vector<1x1xi1>, vector<1x1xi32>
    %c1_i32_139 = arith.constant 1 : i32
    %462 = vector.broadcast %c1_i32_139 : i32 to vector<1x1xi32>
    %463 = arith.subi %435, %462 : vector<1x1xi32>
    %464 = vector.broadcast %463 : vector<1x1xi32> to vector<8x1xi32>
    %465 = arith.cmpi eq, %256, %464 : vector<8x1xi32>
    %cst_140 = arith.constant 0.000000e+00 : f32
    %466 = vector.shape_cast %465 : vector<8x1xi1> to vector<8x1xi1>
    %467 = vector.broadcast %466 : vector<8x1xi1> to vector<8x96xi1>
    %468 = vector.broadcast %cst_140 : f32 to vector<8x96xf32>
    %469 = arith.select %467, %31, %468 : vector<8x96xi1>, vector<8x96xf32>
    %cst_141 = arith.constant dense<0.000000e+00> : vector<96xf32>
    %470 = vector.multi_reduction <add>, %469, %cst_141 [0] : vector<8x96xf32> to vector<96xf32>
    %471 = vector.shape_cast %470 : vector<96xf32> to vector<1x96xf32>
    %472 = vector.shape_cast %441 : vector<1x1xi1> to vector<1x1xi1>
    %473 = vector.broadcast %472 : vector<1x1xi1> to vector<1x96xi1>
    %474 = arith.select %473, %471, %364 : vector<1x96xi1>, vector<1x96xf32>
    %475 = vector.shape_cast %437 : vector<1x1xi1> to vector<1x1xi1>
    %476 = vector.broadcast %475 : vector<1x1xi1> to vector<1x96xi1>
    %477 = arith.select %476, %399, %367 : vector<1x96xi1>, vector<1x96xf32>
    %478 = vector.shape_cast %437 : vector<1x1xi1> to vector<1x1xi1>
    %479 = vector.broadcast %478 : vector<1x1xi1> to vector<1x32xi1>
    %480 = arith.select %479, %395, %370 : vector<1x32xi1>, vector<1x32xf32>
    %481 = arith.andi %437, %439 : vector<1x1xi1>
    %c1_i32_142 = arith.constant 1 : i32
    %482 = vector.broadcast %c1_i32_142 : i32 to vector<1x1xi32>
    %483 = arith.select %481, %482, %373 : vector<1x1xi1>, vector<1x1xi32>
    %484 = vector.extract_strided_slice %474 {offsets = [0, 0], sizes = [1, 64], strides = [1, 1]} : vector<1x96xf32> to vector<1x64xf32>
    %485 = vector.extract_strided_slice %477 {offsets = [0, 0], sizes = [1, 64], strides = [1, 1]} : vector<1x96xf32> to vector<1x64xf32>
    %486 = arith.addf %484, %485 : vector<1x64xf32>
    %cst_143 = arith.constant 5.000000e-01 : f32
    %487 = vector.broadcast %cst_143 : f32 to vector<1x64xf32>
    %488 = arith.mulf %487, %486 : vector<1x64xf32>
    %489 = math.tanh %488 : vector<1x64xf32>
    %cst_144 = arith.constant 1.000000e+00 : f32
    %490 = vector.broadcast %cst_144 : f32 to vector<1x64xf32>
    %491 = arith.addf %489, %490 : vector<1x64xf32>
    %cst_145 = arith.constant 5.000000e-01 : f32
    %492 = vector.broadcast %cst_145 : f32 to vector<1x64xf32>
    %493 = arith.mulf %492, %491 : vector<1x64xf32>
    %494 = vector.extract_strided_slice %493 {offsets = [0, 0], sizes = [1, 32], strides = [1, 1]} : vector<1x64xf32> to vector<1x32xf32>
    %495 = vector.extract_strided_slice %493 {offsets = [0, 32], sizes = [1, 32], strides = [1, 1]} : vector<1x64xf32> to vector<1x32xf32>
    %496 = vector.extract_strided_slice %474 {offsets = [0, 64], sizes = [1, 32], strides = [1, 1]} : vector<1x96xf32> to vector<1x32xf32>
    %497 = vector.extract_strided_slice %477 {offsets = [0, 64], sizes = [1, 32], strides = [1, 1]} : vector<1x96xf32> to vector<1x32xf32>
    %498 = arith.mulf %494, %497 : vector<1x32xf32>
    %499 = arith.addf %496, %498 : vector<1x32xf32>
    %500 = math.tanh %499 : vector<1x32xf32>
    %cst_146 = arith.constant 1.000000e+00 : f32
    %501 = vector.broadcast %cst_146 : f32 to vector<1x32xf32>
    %502 = arith.subf %501, %495 : vector<1x32xf32>
    %503 = arith.mulf %502, %500 : vector<1x32xf32>
    %504 = arith.mulf %495, %480 : vector<1x32xf32>
    %505 = arith.addf %503, %504 : vector<1x32xf32>
    %cst_147 = arith.constant dense<0.000000e+00> : vector<1x128xf32>
    %506 = tpu.matmul %505, %252, %cst_147 {dimension_numbers = #tpu.dot_dimension_numbers<[1], [0], [0], [1], [0, 0, 1, 1], [], []>} : vector<1x32xf32>, vector<32x128xf32>, vector<1x128xf32> -> vector<1x128xf32>
    %507 = arith.addf %506, %253 : vector<1x128xf32>
    %508 = vector.extract_strided_slice %507 {offsets = [0, 0], sizes = [1, 32], strides = [1, 1]} : vector<1x128xf32> to vector<1x32xf32>
    %509 = vector.extract_strided_slice %507 {offsets = [0, 32], sizes = [1, 96], strides = [1, 1]} : vector<1x128xf32> to vector<1x96xf32>
    %510 = vector.broadcast %508 : vector<1x32xf32> to vector<9x32xf32>
    %511 = arith.addf %250, %510 : vector<9x32xf32>
    %512 = math.tanh %511 : vector<9x32xf32>
    %513 = vector.broadcast %254 : vector<1x32xf32> to vector<9x32xf32>
    %514 = arith.mulf %512, %513 : vector<9x32xf32>
    %cst_148 = arith.constant dense<0.000000e+00> : vector<9xf32>
    %515 = vector.multi_reduction <add>, %514, %cst_148 [1] : vector<9x32xf32> to vector<9xf32>
    %516 = vector.shape_cast %515 : vector<9xf32> to vector<9x1xf32>
    %cst_149 = arith.constant 0.000000e+00 : f32
    %517 = vector.broadcast %cst_149 : f32 to vector<9x1xf32>
    %518 = arith.cmpf ogt, %449, %517 : vector<9x1xf32>
    %cst_150 = arith.constant -1.000000e+30 : f32
    %519 = vector.broadcast %cst_150 : f32 to vector<9x1xf32>
    %520 = arith.select %518, %519, %516 : vector<9x1xi1>, vector<9x1xf32>
    %521 = vector.shape_cast %520 : vector<9x1xf32> to vector<1x9x1xf32>
    %cst_151 = arith.constant dense<0xFF800000> : vector<1xf32>
    %522 = vector.multi_reduction <maximumf>, %521, %cst_151 [1, 2] : vector<1x9x1xf32> to vector<1xf32>
    %523 = vector.shape_cast %522 : vector<1xf32> to vector<1x1x1xf32>
    %524 = vector.extract %523[0, 0, 0] : f32 from vector<1x1x1xf32>
    %525 = vector.broadcast %524 : f32 to vector<1x1xf32>
    %526 = vector.broadcast %525 : vector<1x1xf32> to vector<9x1xf32>
    %527 = arith.subf %520, %526 : vector<9x1xf32>
    %528 = math.exp %527 : vector<9x1xf32>
    %529 = vector.shape_cast %528 : vector<9x1xf32> to vector<1x9x1xf32>
    %cst_152 = arith.constant dense<0.000000e+00> : vector<1xf32>
    %530 = vector.multi_reduction <add>, %529, %cst_152 [1, 2] : vector<1x9x1xf32> to vector<1xf32>
    %531 = vector.shape_cast %530 : vector<1xf32> to vector<1x1x1xf32>
    %532 = vector.extract %531[0, 0, 0] : f32 from vector<1x1x1xf32>
    %533 = vector.broadcast %532 : f32 to vector<1x1xf32>
    %534 = math.log %533 : vector<1x1xf32>
    %cst_153 = arith.constant 0.000000e+00 : f32
    %535 = vector.broadcast %cst_153 : f32 to vector<1x1xf32>
    %536 = arith.subf %535, %534 : vector<1x1xf32>
    %537 = vector.broadcast %525 : vector<1x1xf32> to vector<9x1xf32>
    %538 = arith.cmpf oeq, %520, %537 : vector<9x1xf32>
    %c9_i32_154 = arith.constant 9 : i32
    %539 = vector.broadcast %c9_i32_154 : i32 to vector<9x1xi32>
    %540 = arith.select %538, %255, %539 : vector<9x1xi1>, vector<9x1xi32>
    %541 = vector.shape_cast %540 : vector<9x1xi32> to vector<1x9x1xi32>
    %cst_155 = arith.constant dense<2147483647> : vector<1xi32>
    %542 = vector.multi_reduction <minsi>, %541, %cst_155 [1, 2] : vector<1x9x1xi32> to vector<1xi32>
    %543 = vector.shape_cast %542 : vector<1xi32> to vector<1x1x1xi32>
    %544 = vector.extract %543[0, 0, 0] : i32 from vector<1x1x1xi32>
    %545 = vector.broadcast %544 : i32 to vector<1x1xi32>
    %c0_i32_156 = arith.constant 0 : i32
    %546 = vector.broadcast %c0_i32_156 : i32 to vector<1x1xi32>
    %547 = arith.cmpi eq, %483, %546 : vector<1x1xi32>
    %c0_i32_157 = arith.constant 0 : i32
    %548 = vector.broadcast %c0_i32_157 : i32 to vector<1x1xi32>
    %549 = arith.cmpi eq, %545, %548 : vector<1x1xi32>
    %cst_158 = arith.constant dense<true> : vector<1x1xi1>
    %550 = arith.xori %549, %cst_158 : vector<1x1xi1>
    %551 = arith.andi %547, %550 : vector<1x1xi1>
    %552 = arith.addf %443, %536 : vector<1x1xf32>
    %553 = arith.select %547, %552, %443 : vector<1x1xi1>, vector<1x1xf32>
    %554 = vector.broadcast %545 : vector<1x1xi32> to vector<9x1xi32>
    %555 = arith.cmpi eq, %255, %554 : vector<9x1xi32>
    %556 = vector.broadcast %551 : vector<1x1xi1> to vector<9x1xi1>
    %557 = arith.andi %556, %555 : vector<9x1xi1>
    %cst_159 = arith.constant 1.000000e+00 : f32
    %558 = vector.broadcast %cst_159 : f32 to vector<9x1xf32>
    %559 = arith.select %557, %558, %449 : vector<9x1xi1>, vector<9x1xf32>
    %560 = vector.broadcast %461 : vector<1x1xi32> to vector<1x8xi32>
    %561 = arith.cmpi eq, %257, %560 : vector<1x8xi32>
    %562 = vector.broadcast %551 : vector<1x1xi1> to vector<1x8xi1>
    %563 = arith.andi %562, %561 : vector<1x8xi1>
    %c1_i32_160 = arith.constant 1 : i32
    %564 = vector.broadcast %c1_i32_160 : i32 to vector<1x1xi32>
    %565 = arith.subi %545, %564 : vector<1x1xi32>
    %566 = vector.shape_cast %565 : vector<1x1xi32> to vector<1x1xi32>
    %567 = vector.broadcast %566 : vector<1x1xi32> to vector<1x8xi32>
    %568 = arith.select %563, %567, %458 : vector<1x8xi1>, vector<1x8xi32>
    %c1_i32_161 = arith.constant 1 : i32
    %569 = vector.broadcast %c1_i32_161 : i32 to vector<1x1xi32>
    %570 = arith.addi %461, %569 : vector<1x1xi32>
    %571 = arith.select %551, %570, %461 : vector<1x1xi1>, vector<1x1xi32>
    %c1_i32_162 = arith.constant 1 : i32
    %572 = vector.broadcast %c1_i32_162 : i32 to vector<1x1xi32>
    %573 = arith.subi %545, %572 : vector<1x1xi32>
    %574 = vector.broadcast %573 : vector<1x1xi32> to vector<8x1xi32>
    %575 = arith.cmpi eq, %256, %574 : vector<8x1xi32>
    %cst_163 = arith.constant 0.000000e+00 : f32
    %576 = vector.shape_cast %575 : vector<8x1xi1> to vector<8x1xi1>
    %577 = vector.broadcast %576 : vector<8x1xi1> to vector<8x96xi1>
    %578 = vector.broadcast %cst_163 : f32 to vector<8x96xf32>
    %579 = arith.select %577, %31, %578 : vector<8x96xi1>, vector<8x96xf32>
    %cst_164 = arith.constant dense<0.000000e+00> : vector<96xf32>
    %580 = vector.multi_reduction <add>, %579, %cst_164 [0] : vector<8x96xf32> to vector<96xf32>
    %581 = vector.shape_cast %580 : vector<96xf32> to vector<1x96xf32>
    %582 = vector.shape_cast %551 : vector<1x1xi1> to vector<1x1xi1>
    %583 = vector.broadcast %582 : vector<1x1xi1> to vector<1x96xi1>
    %584 = arith.select %583, %581, %474 : vector<1x96xi1>, vector<1x96xf32>
    %585 = vector.shape_cast %547 : vector<1x1xi1> to vector<1x1xi1>
    %586 = vector.broadcast %585 : vector<1x1xi1> to vector<1x96xi1>
    %587 = arith.select %586, %509, %477 : vector<1x96xi1>, vector<1x96xf32>
    %588 = vector.shape_cast %547 : vector<1x1xi1> to vector<1x1xi1>
    %589 = vector.broadcast %588 : vector<1x1xi1> to vector<1x32xi1>
    %590 = arith.select %589, %505, %480 : vector<1x32xi1>, vector<1x32xf32>
    %591 = arith.andi %547, %549 : vector<1x1xi1>
    %c1_i32_165 = arith.constant 1 : i32
    %592 = vector.broadcast %c1_i32_165 : i32 to vector<1x1xi32>
    %593 = arith.select %591, %592, %483 : vector<1x1xi1>, vector<1x1xi32>
    %594 = vector.extract_strided_slice %584 {offsets = [0, 0], sizes = [1, 64], strides = [1, 1]} : vector<1x96xf32> to vector<1x64xf32>
    %595 = vector.extract_strided_slice %587 {offsets = [0, 0], sizes = [1, 64], strides = [1, 1]} : vector<1x96xf32> to vector<1x64xf32>
    %596 = arith.addf %594, %595 : vector<1x64xf32>
    %cst_166 = arith.constant 5.000000e-01 : f32
    %597 = vector.broadcast %cst_166 : f32 to vector<1x64xf32>
    %598 = arith.mulf %597, %596 : vector<1x64xf32>
    %599 = math.tanh %598 : vector<1x64xf32>
    %cst_167 = arith.constant 1.000000e+00 : f32
    %600 = vector.broadcast %cst_167 : f32 to vector<1x64xf32>
    %601 = arith.addf %599, %600 : vector<1x64xf32>
    %cst_168 = arith.constant 5.000000e-01 : f32
    %602 = vector.broadcast %cst_168 : f32 to vector<1x64xf32>
    %603 = arith.mulf %602, %601 : vector<1x64xf32>
    %604 = vector.extract_strided_slice %603 {offsets = [0, 0], sizes = [1, 32], strides = [1, 1]} : vector<1x64xf32> to vector<1x32xf32>
    %605 = vector.extract_strided_slice %603 {offsets = [0, 32], sizes = [1, 32], strides = [1, 1]} : vector<1x64xf32> to vector<1x32xf32>
    %606 = vector.extract_strided_slice %584 {offsets = [0, 64], sizes = [1, 32], strides = [1, 1]} : vector<1x96xf32> to vector<1x32xf32>
    %607 = vector.extract_strided_slice %587 {offsets = [0, 64], sizes = [1, 32], strides = [1, 1]} : vector<1x96xf32> to vector<1x32xf32>
    %608 = arith.mulf %604, %607 : vector<1x32xf32>
    %609 = arith.addf %606, %608 : vector<1x32xf32>
    %610 = math.tanh %609 : vector<1x32xf32>
    %cst_169 = arith.constant 1.000000e+00 : f32
    %611 = vector.broadcast %cst_169 : f32 to vector<1x32xf32>
    %612 = arith.subf %611, %605 : vector<1x32xf32>
    %613 = arith.mulf %612, %610 : vector<1x32xf32>
    %614 = arith.mulf %605, %590 : vector<1x32xf32>
    %615 = arith.addf %613, %614 : vector<1x32xf32>
    %cst_170 = arith.constant dense<0.000000e+00> : vector<1x128xf32>
    %616 = tpu.matmul %615, %252, %cst_170 {dimension_numbers = #tpu.dot_dimension_numbers<[1], [0], [0], [1], [0, 0, 1, 1], [], []>} : vector<1x32xf32>, vector<32x128xf32>, vector<1x128xf32> -> vector<1x128xf32>
    %617 = arith.addf %616, %253 : vector<1x128xf32>
    %618 = vector.extract_strided_slice %617 {offsets = [0, 0], sizes = [1, 32], strides = [1, 1]} : vector<1x128xf32> to vector<1x32xf32>
    %619 = vector.extract_strided_slice %617 {offsets = [0, 32], sizes = [1, 96], strides = [1, 1]} : vector<1x128xf32> to vector<1x96xf32>
    %620 = vector.broadcast %618 : vector<1x32xf32> to vector<9x32xf32>
    %621 = arith.addf %250, %620 : vector<9x32xf32>
    %622 = math.tanh %621 : vector<9x32xf32>
    %623 = vector.broadcast %254 : vector<1x32xf32> to vector<9x32xf32>
    %624 = arith.mulf %622, %623 : vector<9x32xf32>
    %cst_171 = arith.constant dense<0.000000e+00> : vector<9xf32>
    %625 = vector.multi_reduction <add>, %624, %cst_171 [1] : vector<9x32xf32> to vector<9xf32>
    %626 = vector.shape_cast %625 : vector<9xf32> to vector<9x1xf32>
    %cst_172 = arith.constant 0.000000e+00 : f32
    %627 = vector.broadcast %cst_172 : f32 to vector<9x1xf32>
    %628 = arith.cmpf ogt, %559, %627 : vector<9x1xf32>
    %cst_173 = arith.constant -1.000000e+30 : f32
    %629 = vector.broadcast %cst_173 : f32 to vector<9x1xf32>
    %630 = arith.select %628, %629, %626 : vector<9x1xi1>, vector<9x1xf32>
    %631 = vector.shape_cast %630 : vector<9x1xf32> to vector<1x9x1xf32>
    %cst_174 = arith.constant dense<0xFF800000> : vector<1xf32>
    %632 = vector.multi_reduction <maximumf>, %631, %cst_174 [1, 2] : vector<1x9x1xf32> to vector<1xf32>
    %633 = vector.shape_cast %632 : vector<1xf32> to vector<1x1x1xf32>
    %634 = vector.extract %633[0, 0, 0] : f32 from vector<1x1x1xf32>
    %635 = vector.broadcast %634 : f32 to vector<1x1xf32>
    %636 = vector.broadcast %635 : vector<1x1xf32> to vector<9x1xf32>
    %637 = arith.subf %630, %636 : vector<9x1xf32>
    %638 = math.exp %637 : vector<9x1xf32>
    %639 = vector.shape_cast %638 : vector<9x1xf32> to vector<1x9x1xf32>
    %cst_175 = arith.constant dense<0.000000e+00> : vector<1xf32>
    %640 = vector.multi_reduction <add>, %639, %cst_175 [1, 2] : vector<1x9x1xf32> to vector<1xf32>
    %641 = vector.shape_cast %640 : vector<1xf32> to vector<1x1x1xf32>
    %642 = vector.extract %641[0, 0, 0] : f32 from vector<1x1x1xf32>
    %643 = vector.broadcast %642 : f32 to vector<1x1xf32>
    %644 = math.log %643 : vector<1x1xf32>
    %cst_176 = arith.constant 0.000000e+00 : f32
    %645 = vector.broadcast %cst_176 : f32 to vector<1x1xf32>
    %646 = arith.subf %645, %644 : vector<1x1xf32>
    %647 = vector.broadcast %635 : vector<1x1xf32> to vector<9x1xf32>
    %648 = arith.cmpf oeq, %630, %647 : vector<9x1xf32>
    %c9_i32_177 = arith.constant 9 : i32
    %649 = vector.broadcast %c9_i32_177 : i32 to vector<9x1xi32>
    %650 = arith.select %648, %255, %649 : vector<9x1xi1>, vector<9x1xi32>
    %651 = vector.shape_cast %650 : vector<9x1xi32> to vector<1x9x1xi32>
    %cst_178 = arith.constant dense<2147483647> : vector<1xi32>
    %652 = vector.multi_reduction <minsi>, %651, %cst_178 [1, 2] : vector<1x9x1xi32> to vector<1xi32>
    %653 = vector.shape_cast %652 : vector<1xi32> to vector<1x1x1xi32>
    %654 = vector.extract %653[0, 0, 0] : i32 from vector<1x1x1xi32>
    %655 = vector.broadcast %654 : i32 to vector<1x1xi32>
    %c0_i32_179 = arith.constant 0 : i32
    %656 = vector.broadcast %c0_i32_179 : i32 to vector<1x1xi32>
    %657 = arith.cmpi eq, %593, %656 : vector<1x1xi32>
    %c0_i32_180 = arith.constant 0 : i32
    %658 = vector.broadcast %c0_i32_180 : i32 to vector<1x1xi32>
    %659 = arith.cmpi eq, %655, %658 : vector<1x1xi32>
    %cst_181 = arith.constant dense<true> : vector<1x1xi1>
    %660 = arith.xori %659, %cst_181 : vector<1x1xi1>
    %661 = arith.andi %657, %660 : vector<1x1xi1>
    %662 = arith.addf %553, %646 : vector<1x1xf32>
    %663 = arith.select %657, %662, %553 : vector<1x1xi1>, vector<1x1xf32>
    %664 = vector.broadcast %655 : vector<1x1xi32> to vector<9x1xi32>
    %665 = arith.cmpi eq, %255, %664 : vector<9x1xi32>
    %666 = vector.broadcast %661 : vector<1x1xi1> to vector<9x1xi1>
    %667 = arith.andi %666, %665 : vector<9x1xi1>
    %cst_182 = arith.constant 1.000000e+00 : f32
    %668 = vector.broadcast %cst_182 : f32 to vector<9x1xf32>
    %669 = arith.select %667, %668, %559 : vector<9x1xi1>, vector<9x1xf32>
    %670 = vector.broadcast %571 : vector<1x1xi32> to vector<1x8xi32>
    %671 = arith.cmpi eq, %257, %670 : vector<1x8xi32>
    %672 = vector.broadcast %661 : vector<1x1xi1> to vector<1x8xi1>
    %673 = arith.andi %672, %671 : vector<1x8xi1>
    %c1_i32_183 = arith.constant 1 : i32
    %674 = vector.broadcast %c1_i32_183 : i32 to vector<1x1xi32>
    %675 = arith.subi %655, %674 : vector<1x1xi32>
    %676 = vector.shape_cast %675 : vector<1x1xi32> to vector<1x1xi32>
    %677 = vector.broadcast %676 : vector<1x1xi32> to vector<1x8xi32>
    %678 = arith.select %673, %677, %568 : vector<1x8xi1>, vector<1x8xi32>
    %c1_i32_184 = arith.constant 1 : i32
    %679 = vector.broadcast %c1_i32_184 : i32 to vector<1x1xi32>
    %680 = arith.addi %571, %679 : vector<1x1xi32>
    %681 = arith.select %661, %680, %571 : vector<1x1xi1>, vector<1x1xi32>
    %c1_i32_185 = arith.constant 1 : i32
    %682 = vector.broadcast %c1_i32_185 : i32 to vector<1x1xi32>
    %683 = arith.subi %655, %682 : vector<1x1xi32>
    %684 = vector.broadcast %683 : vector<1x1xi32> to vector<8x1xi32>
    %685 = arith.cmpi eq, %256, %684 : vector<8x1xi32>
    %cst_186 = arith.constant 0.000000e+00 : f32
    %686 = vector.shape_cast %685 : vector<8x1xi1> to vector<8x1xi1>
    %687 = vector.broadcast %686 : vector<8x1xi1> to vector<8x96xi1>
    %688 = vector.broadcast %cst_186 : f32 to vector<8x96xf32>
    %689 = arith.select %687, %31, %688 : vector<8x96xi1>, vector<8x96xf32>
    %cst_187 = arith.constant dense<0.000000e+00> : vector<96xf32>
    %690 = vector.multi_reduction <add>, %689, %cst_187 [0] : vector<8x96xf32> to vector<96xf32>
    %691 = vector.shape_cast %690 : vector<96xf32> to vector<1x96xf32>
    %692 = vector.shape_cast %661 : vector<1x1xi1> to vector<1x1xi1>
    %693 = vector.broadcast %692 : vector<1x1xi1> to vector<1x96xi1>
    %694 = arith.select %693, %691, %584 : vector<1x96xi1>, vector<1x96xf32>
    %695 = vector.shape_cast %657 : vector<1x1xi1> to vector<1x1xi1>
    %696 = vector.broadcast %695 : vector<1x1xi1> to vector<1x96xi1>
    %697 = arith.select %696, %619, %587 : vector<1x96xi1>, vector<1x96xf32>
    %698 = vector.shape_cast %657 : vector<1x1xi1> to vector<1x1xi1>
    %699 = vector.broadcast %698 : vector<1x1xi1> to vector<1x32xi1>
    %700 = arith.select %699, %615, %590 : vector<1x32xi1>, vector<1x32xf32>
    %701 = arith.andi %657, %659 : vector<1x1xi1>
    %c1_i32_188 = arith.constant 1 : i32
    %702 = vector.broadcast %c1_i32_188 : i32 to vector<1x1xi32>
    %703 = arith.select %701, %702, %593 : vector<1x1xi1>, vector<1x1xi32>
    %704 = vector.extract_strided_slice %694 {offsets = [0, 0], sizes = [1, 64], strides = [1, 1]} : vector<1x96xf32> to vector<1x64xf32>
    %705 = vector.extract_strided_slice %697 {offsets = [0, 0], sizes = [1, 64], strides = [1, 1]} : vector<1x96xf32> to vector<1x64xf32>
    %706 = arith.addf %704, %705 : vector<1x64xf32>
    %cst_189 = arith.constant 5.000000e-01 : f32
    %707 = vector.broadcast %cst_189 : f32 to vector<1x64xf32>
    %708 = arith.mulf %707, %706 : vector<1x64xf32>
    %709 = math.tanh %708 : vector<1x64xf32>
    %cst_190 = arith.constant 1.000000e+00 : f32
    %710 = vector.broadcast %cst_190 : f32 to vector<1x64xf32>
    %711 = arith.addf %709, %710 : vector<1x64xf32>
    %cst_191 = arith.constant 5.000000e-01 : f32
    %712 = vector.broadcast %cst_191 : f32 to vector<1x64xf32>
    %713 = arith.mulf %712, %711 : vector<1x64xf32>
    %714 = vector.extract_strided_slice %713 {offsets = [0, 0], sizes = [1, 32], strides = [1, 1]} : vector<1x64xf32> to vector<1x32xf32>
    %715 = vector.extract_strided_slice %713 {offsets = [0, 32], sizes = [1, 32], strides = [1, 1]} : vector<1x64xf32> to vector<1x32xf32>
    %716 = vector.extract_strided_slice %694 {offsets = [0, 64], sizes = [1, 32], strides = [1, 1]} : vector<1x96xf32> to vector<1x32xf32>
    %717 = vector.extract_strided_slice %697 {offsets = [0, 64], sizes = [1, 32], strides = [1, 1]} : vector<1x96xf32> to vector<1x32xf32>
    %718 = arith.mulf %714, %717 : vector<1x32xf32>
    %719 = arith.addf %716, %718 : vector<1x32xf32>
    %720 = math.tanh %719 : vector<1x32xf32>
    %cst_192 = arith.constant 1.000000e+00 : f32
    %721 = vector.broadcast %cst_192 : f32 to vector<1x32xf32>
    %722 = arith.subf %721, %715 : vector<1x32xf32>
    %723 = arith.mulf %722, %720 : vector<1x32xf32>
    %724 = arith.mulf %715, %700 : vector<1x32xf32>
    %725 = arith.addf %723, %724 : vector<1x32xf32>
    %cst_193 = arith.constant dense<0.000000e+00> : vector<1x128xf32>
    %726 = tpu.matmul %725, %252, %cst_193 {dimension_numbers = #tpu.dot_dimension_numbers<[1], [0], [0], [1], [0, 0, 1, 1], [], []>} : vector<1x32xf32>, vector<32x128xf32>, vector<1x128xf32> -> vector<1x128xf32>
    %727 = arith.addf %726, %253 : vector<1x128xf32>
    %728 = vector.extract_strided_slice %727 {offsets = [0, 0], sizes = [1, 32], strides = [1, 1]} : vector<1x128xf32> to vector<1x32xf32>
    %729 = vector.extract_strided_slice %727 {offsets = [0, 32], sizes = [1, 96], strides = [1, 1]} : vector<1x128xf32> to vector<1x96xf32>
    %730 = vector.broadcast %728 : vector<1x32xf32> to vector<9x32xf32>
    %731 = arith.addf %250, %730 : vector<9x32xf32>
    %732 = math.tanh %731 : vector<9x32xf32>
    %733 = vector.broadcast %254 : vector<1x32xf32> to vector<9x32xf32>
    %734 = arith.mulf %732, %733 : vector<9x32xf32>
    %cst_194 = arith.constant dense<0.000000e+00> : vector<9xf32>
    %735 = vector.multi_reduction <add>, %734, %cst_194 [1] : vector<9x32xf32> to vector<9xf32>
    %736 = vector.shape_cast %735 : vector<9xf32> to vector<9x1xf32>
    %cst_195 = arith.constant 0.000000e+00 : f32
    %737 = vector.broadcast %cst_195 : f32 to vector<9x1xf32>
    %738 = arith.cmpf ogt, %669, %737 : vector<9x1xf32>
    %cst_196 = arith.constant -1.000000e+30 : f32
    %739 = vector.broadcast %cst_196 : f32 to vector<9x1xf32>
    %740 = arith.select %738, %739, %736 : vector<9x1xi1>, vector<9x1xf32>
    %741 = vector.shape_cast %740 : vector<9x1xf32> to vector<1x9x1xf32>
    %cst_197 = arith.constant dense<0xFF800000> : vector<1xf32>
    %742 = vector.multi_reduction <maximumf>, %741, %cst_197 [1, 2] : vector<1x9x1xf32> to vector<1xf32>
    %743 = vector.shape_cast %742 : vector<1xf32> to vector<1x1x1xf32>
    %744 = vector.extract %743[0, 0, 0] : f32 from vector<1x1x1xf32>
    %745 = vector.broadcast %744 : f32 to vector<1x1xf32>
    %746 = vector.broadcast %745 : vector<1x1xf32> to vector<9x1xf32>
    %747 = arith.subf %740, %746 : vector<9x1xf32>
    %748 = math.exp %747 : vector<9x1xf32>
    %749 = vector.shape_cast %748 : vector<9x1xf32> to vector<1x9x1xf32>
    %cst_198 = arith.constant dense<0.000000e+00> : vector<1xf32>
    %750 = vector.multi_reduction <add>, %749, %cst_198 [1, 2] : vector<1x9x1xf32> to vector<1xf32>
    %751 = vector.shape_cast %750 : vector<1xf32> to vector<1x1x1xf32>
    %752 = vector.extract %751[0, 0, 0] : f32 from vector<1x1x1xf32>
    %753 = vector.broadcast %752 : f32 to vector<1x1xf32>
    %754 = math.log %753 : vector<1x1xf32>
    %cst_199 = arith.constant 0.000000e+00 : f32
    %755 = vector.broadcast %cst_199 : f32 to vector<1x1xf32>
    %756 = arith.subf %755, %754 : vector<1x1xf32>
    %757 = vector.broadcast %745 : vector<1x1xf32> to vector<9x1xf32>
    %758 = arith.cmpf oeq, %740, %757 : vector<9x1xf32>
    %c9_i32_200 = arith.constant 9 : i32
    %759 = vector.broadcast %c9_i32_200 : i32 to vector<9x1xi32>
    %760 = arith.select %758, %255, %759 : vector<9x1xi1>, vector<9x1xi32>
    %761 = vector.shape_cast %760 : vector<9x1xi32> to vector<1x9x1xi32>
    %cst_201 = arith.constant dense<2147483647> : vector<1xi32>
    %762 = vector.multi_reduction <minsi>, %761, %cst_201 [1, 2] : vector<1x9x1xi32> to vector<1xi32>
    %763 = vector.shape_cast %762 : vector<1xi32> to vector<1x1x1xi32>
    %764 = vector.extract %763[0, 0, 0] : i32 from vector<1x1x1xi32>
    %765 = vector.broadcast %764 : i32 to vector<1x1xi32>
    %c0_i32_202 = arith.constant 0 : i32
    %766 = vector.broadcast %c0_i32_202 : i32 to vector<1x1xi32>
    %767 = arith.cmpi eq, %703, %766 : vector<1x1xi32>
    %c0_i32_203 = arith.constant 0 : i32
    %768 = vector.broadcast %c0_i32_203 : i32 to vector<1x1xi32>
    %769 = arith.cmpi eq, %765, %768 : vector<1x1xi32>
    %cst_204 = arith.constant dense<true> : vector<1x1xi1>
    %770 = arith.xori %769, %cst_204 : vector<1x1xi1>
    %771 = arith.andi %767, %770 : vector<1x1xi1>
    %772 = arith.addf %663, %756 : vector<1x1xf32>
    %773 = arith.select %767, %772, %663 : vector<1x1xi1>, vector<1x1xf32>
    %774 = vector.broadcast %765 : vector<1x1xi32> to vector<9x1xi32>
    %775 = arith.cmpi eq, %255, %774 : vector<9x1xi32>
    %776 = vector.broadcast %771 : vector<1x1xi1> to vector<9x1xi1>
    %777 = arith.andi %776, %775 : vector<9x1xi1>
    %cst_205 = arith.constant 1.000000e+00 : f32
    %778 = vector.broadcast %cst_205 : f32 to vector<9x1xf32>
    %779 = arith.select %777, %778, %669 : vector<9x1xi1>, vector<9x1xf32>
    %780 = vector.broadcast %681 : vector<1x1xi32> to vector<1x8xi32>
    %781 = arith.cmpi eq, %257, %780 : vector<1x8xi32>
    %782 = vector.broadcast %771 : vector<1x1xi1> to vector<1x8xi1>
    %783 = arith.andi %782, %781 : vector<1x8xi1>
    %c1_i32_206 = arith.constant 1 : i32
    %784 = vector.broadcast %c1_i32_206 : i32 to vector<1x1xi32>
    %785 = arith.subi %765, %784 : vector<1x1xi32>
    %786 = vector.shape_cast %785 : vector<1x1xi32> to vector<1x1xi32>
    %787 = vector.broadcast %786 : vector<1x1xi32> to vector<1x8xi32>
    %788 = arith.select %783, %787, %678 : vector<1x8xi1>, vector<1x8xi32>
    %c1_i32_207 = arith.constant 1 : i32
    %789 = vector.broadcast %c1_i32_207 : i32 to vector<1x1xi32>
    %790 = arith.addi %681, %789 : vector<1x1xi32>
    %791 = arith.select %771, %790, %681 : vector<1x1xi1>, vector<1x1xi32>
    %c1_i32_208 = arith.constant 1 : i32
    %792 = vector.broadcast %c1_i32_208 : i32 to vector<1x1xi32>
    %793 = arith.subi %765, %792 : vector<1x1xi32>
    %794 = vector.broadcast %793 : vector<1x1xi32> to vector<8x1xi32>
    %795 = arith.cmpi eq, %256, %794 : vector<8x1xi32>
    %cst_209 = arith.constant 0.000000e+00 : f32
    %796 = vector.shape_cast %795 : vector<8x1xi1> to vector<8x1xi1>
    %797 = vector.broadcast %796 : vector<8x1xi1> to vector<8x96xi1>
    %798 = vector.broadcast %cst_209 : f32 to vector<8x96xf32>
    %799 = arith.select %797, %31, %798 : vector<8x96xi1>, vector<8x96xf32>
    %cst_210 = arith.constant dense<0.000000e+00> : vector<96xf32>
    %800 = vector.multi_reduction <add>, %799, %cst_210 [0] : vector<8x96xf32> to vector<96xf32>
    %801 = vector.shape_cast %800 : vector<96xf32> to vector<1x96xf32>
    %802 = vector.shape_cast %771 : vector<1x1xi1> to vector<1x1xi1>
    %803 = vector.broadcast %802 : vector<1x1xi1> to vector<1x96xi1>
    %804 = arith.select %803, %801, %694 : vector<1x96xi1>, vector<1x96xf32>
    %805 = vector.shape_cast %767 : vector<1x1xi1> to vector<1x1xi1>
    %806 = vector.broadcast %805 : vector<1x1xi1> to vector<1x96xi1>
    %807 = arith.select %806, %729, %697 : vector<1x96xi1>, vector<1x96xf32>
    %808 = vector.shape_cast %767 : vector<1x1xi1> to vector<1x1xi1>
    %809 = vector.broadcast %808 : vector<1x1xi1> to vector<1x32xi1>
    %810 = arith.select %809, %725, %700 : vector<1x32xi1>, vector<1x32xf32>
    %811 = arith.andi %767, %769 : vector<1x1xi1>
    %c1_i32_211 = arith.constant 1 : i32
    %812 = vector.broadcast %c1_i32_211 : i32 to vector<1x1xi32>
    %813 = arith.select %811, %812, %703 : vector<1x1xi1>, vector<1x1xi32>
    %814 = vector.extract_strided_slice %804 {offsets = [0, 0], sizes = [1, 64], strides = [1, 1]} : vector<1x96xf32> to vector<1x64xf32>
    %815 = vector.extract_strided_slice %807 {offsets = [0, 0], sizes = [1, 64], strides = [1, 1]} : vector<1x96xf32> to vector<1x64xf32>
    %816 = arith.addf %814, %815 : vector<1x64xf32>
    %cst_212 = arith.constant 5.000000e-01 : f32
    %817 = vector.broadcast %cst_212 : f32 to vector<1x64xf32>
    %818 = arith.mulf %817, %816 : vector<1x64xf32>
    %819 = math.tanh %818 : vector<1x64xf32>
    %cst_213 = arith.constant 1.000000e+00 : f32
    %820 = vector.broadcast %cst_213 : f32 to vector<1x64xf32>
    %821 = arith.addf %819, %820 : vector<1x64xf32>
    %cst_214 = arith.constant 5.000000e-01 : f32
    %822 = vector.broadcast %cst_214 : f32 to vector<1x64xf32>
    %823 = arith.mulf %822, %821 : vector<1x64xf32>
    %824 = vector.extract_strided_slice %823 {offsets = [0, 0], sizes = [1, 32], strides = [1, 1]} : vector<1x64xf32> to vector<1x32xf32>
    %825 = vector.extract_strided_slice %823 {offsets = [0, 32], sizes = [1, 32], strides = [1, 1]} : vector<1x64xf32> to vector<1x32xf32>
    %826 = vector.extract_strided_slice %804 {offsets = [0, 64], sizes = [1, 32], strides = [1, 1]} : vector<1x96xf32> to vector<1x32xf32>
    %827 = vector.extract_strided_slice %807 {offsets = [0, 64], sizes = [1, 32], strides = [1, 1]} : vector<1x96xf32> to vector<1x32xf32>
    %828 = arith.mulf %824, %827 : vector<1x32xf32>
    %829 = arith.addf %826, %828 : vector<1x32xf32>
    %830 = math.tanh %829 : vector<1x32xf32>
    %cst_215 = arith.constant 1.000000e+00 : f32
    %831 = vector.broadcast %cst_215 : f32 to vector<1x32xf32>
    %832 = arith.subf %831, %825 : vector<1x32xf32>
    %833 = arith.mulf %832, %830 : vector<1x32xf32>
    %834 = arith.mulf %825, %810 : vector<1x32xf32>
    %835 = arith.addf %833, %834 : vector<1x32xf32>
    %cst_216 = arith.constant dense<0.000000e+00> : vector<1x128xf32>
    %836 = tpu.matmul %835, %252, %cst_216 {dimension_numbers = #tpu.dot_dimension_numbers<[1], [0], [0], [1], [0, 0, 1, 1], [], []>} : vector<1x32xf32>, vector<32x128xf32>, vector<1x128xf32> -> vector<1x128xf32>
    %837 = arith.addf %836, %253 : vector<1x128xf32>
    %838 = vector.extract_strided_slice %837 {offsets = [0, 0], sizes = [1, 32], strides = [1, 1]} : vector<1x128xf32> to vector<1x32xf32>
    %839 = vector.extract_strided_slice %837 {offsets = [0, 32], sizes = [1, 96], strides = [1, 1]} : vector<1x128xf32> to vector<1x96xf32>
    %840 = vector.broadcast %838 : vector<1x32xf32> to vector<9x32xf32>
    %841 = arith.addf %250, %840 : vector<9x32xf32>
    %842 = math.tanh %841 : vector<9x32xf32>
    %843 = vector.broadcast %254 : vector<1x32xf32> to vector<9x32xf32>
    %844 = arith.mulf %842, %843 : vector<9x32xf32>
    %cst_217 = arith.constant dense<0.000000e+00> : vector<9xf32>
    %845 = vector.multi_reduction <add>, %844, %cst_217 [1] : vector<9x32xf32> to vector<9xf32>
    %846 = vector.shape_cast %845 : vector<9xf32> to vector<9x1xf32>
    %cst_218 = arith.constant 0.000000e+00 : f32
    %847 = vector.broadcast %cst_218 : f32 to vector<9x1xf32>
    %848 = arith.cmpf ogt, %779, %847 : vector<9x1xf32>
    %cst_219 = arith.constant -1.000000e+30 : f32
    %849 = vector.broadcast %cst_219 : f32 to vector<9x1xf32>
    %850 = arith.select %848, %849, %846 : vector<9x1xi1>, vector<9x1xf32>
    %851 = vector.shape_cast %850 : vector<9x1xf32> to vector<1x9x1xf32>
    %cst_220 = arith.constant dense<0xFF800000> : vector<1xf32>
    %852 = vector.multi_reduction <maximumf>, %851, %cst_220 [1, 2] : vector<1x9x1xf32> to vector<1xf32>
    %853 = vector.shape_cast %852 : vector<1xf32> to vector<1x1x1xf32>
    %854 = vector.extract %853[0, 0, 0] : f32 from vector<1x1x1xf32>
    %855 = vector.broadcast %854 : f32 to vector<1x1xf32>
    %856 = vector.broadcast %855 : vector<1x1xf32> to vector<9x1xf32>
    %857 = arith.subf %850, %856 : vector<9x1xf32>
    %858 = math.exp %857 : vector<9x1xf32>
    %859 = vector.shape_cast %858 : vector<9x1xf32> to vector<1x9x1xf32>
    %cst_221 = arith.constant dense<0.000000e+00> : vector<1xf32>
    %860 = vector.multi_reduction <add>, %859, %cst_221 [1, 2] : vector<1x9x1xf32> to vector<1xf32>
    %861 = vector.shape_cast %860 : vector<1xf32> to vector<1x1x1xf32>
    %862 = vector.extract %861[0, 0, 0] : f32 from vector<1x1x1xf32>
    %863 = vector.broadcast %862 : f32 to vector<1x1xf32>
    %864 = math.log %863 : vector<1x1xf32>
    %cst_222 = arith.constant 0.000000e+00 : f32
    %865 = vector.broadcast %cst_222 : f32 to vector<1x1xf32>
    %866 = arith.subf %865, %864 : vector<1x1xf32>
    %867 = vector.broadcast %855 : vector<1x1xf32> to vector<9x1xf32>
    %868 = arith.cmpf oeq, %850, %867 : vector<9x1xf32>
    %c9_i32_223 = arith.constant 9 : i32
    %869 = vector.broadcast %c9_i32_223 : i32 to vector<9x1xi32>
    %870 = arith.select %868, %255, %869 : vector<9x1xi1>, vector<9x1xi32>
    %871 = vector.shape_cast %870 : vector<9x1xi32> to vector<1x9x1xi32>
    %cst_224 = arith.constant dense<2147483647> : vector<1xi32>
    %872 = vector.multi_reduction <minsi>, %871, %cst_224 [1, 2] : vector<1x9x1xi32> to vector<1xi32>
    %873 = vector.shape_cast %872 : vector<1xi32> to vector<1x1x1xi32>
    %874 = vector.extract %873[0, 0, 0] : i32 from vector<1x1x1xi32>
    %875 = vector.broadcast %874 : i32 to vector<1x1xi32>
    %c0_i32_225 = arith.constant 0 : i32
    %876 = vector.broadcast %c0_i32_225 : i32 to vector<1x1xi32>
    %877 = arith.cmpi eq, %813, %876 : vector<1x1xi32>
    %c0_i32_226 = arith.constant 0 : i32
    %878 = vector.broadcast %c0_i32_226 : i32 to vector<1x1xi32>
    %879 = arith.cmpi eq, %875, %878 : vector<1x1xi32>
    %cst_227 = arith.constant dense<true> : vector<1x1xi1>
    %880 = arith.xori %879, %cst_227 : vector<1x1xi1>
    %881 = arith.andi %877, %880 : vector<1x1xi1>
    %882 = arith.addf %773, %866 : vector<1x1xf32>
    %883 = arith.select %877, %882, %773 : vector<1x1xi1>, vector<1x1xf32>
    %884 = vector.broadcast %875 : vector<1x1xi32> to vector<9x1xi32>
    %885 = arith.cmpi eq, %255, %884 : vector<9x1xi32>
    %886 = vector.broadcast %881 : vector<1x1xi1> to vector<9x1xi1>
    %887 = arith.andi %886, %885 : vector<9x1xi1>
    %cst_228 = arith.constant 1.000000e+00 : f32
    %888 = vector.broadcast %cst_228 : f32 to vector<9x1xf32>
    %889 = arith.select %887, %888, %779 : vector<9x1xi1>, vector<9x1xf32>
    %890 = vector.broadcast %791 : vector<1x1xi32> to vector<1x8xi32>
    %891 = arith.cmpi eq, %257, %890 : vector<1x8xi32>
    %892 = vector.broadcast %881 : vector<1x1xi1> to vector<1x8xi1>
    %893 = arith.andi %892, %891 : vector<1x8xi1>
    %c1_i32_229 = arith.constant 1 : i32
    %894 = vector.broadcast %c1_i32_229 : i32 to vector<1x1xi32>
    %895 = arith.subi %875, %894 : vector<1x1xi32>
    %896 = vector.shape_cast %895 : vector<1x1xi32> to vector<1x1xi32>
    %897 = vector.broadcast %896 : vector<1x1xi32> to vector<1x8xi32>
    %898 = arith.select %893, %897, %788 : vector<1x8xi1>, vector<1x8xi32>
    %c1_i32_230 = arith.constant 1 : i32
    %899 = vector.broadcast %c1_i32_230 : i32 to vector<1x1xi32>
    %900 = arith.addi %791, %899 : vector<1x1xi32>
    %901 = arith.select %881, %900, %791 : vector<1x1xi1>, vector<1x1xi32>
    %c1_i32_231 = arith.constant 1 : i32
    %902 = vector.broadcast %c1_i32_231 : i32 to vector<1x1xi32>
    %903 = arith.subi %875, %902 : vector<1x1xi32>
    %904 = vector.broadcast %903 : vector<1x1xi32> to vector<8x1xi32>
    %905 = arith.cmpi eq, %256, %904 : vector<8x1xi32>
    %cst_232 = arith.constant 0.000000e+00 : f32
    %906 = vector.shape_cast %905 : vector<8x1xi1> to vector<8x1xi1>
    %907 = vector.broadcast %906 : vector<8x1xi1> to vector<8x96xi1>
    %908 = vector.broadcast %cst_232 : f32 to vector<8x96xf32>
    %909 = arith.select %907, %31, %908 : vector<8x96xi1>, vector<8x96xf32>
    %cst_233 = arith.constant dense<0.000000e+00> : vector<96xf32>
    %910 = vector.multi_reduction <add>, %909, %cst_233 [0] : vector<8x96xf32> to vector<96xf32>
    %911 = vector.shape_cast %910 : vector<96xf32> to vector<1x96xf32>
    %912 = vector.shape_cast %881 : vector<1x1xi1> to vector<1x1xi1>
    %913 = vector.broadcast %912 : vector<1x1xi1> to vector<1x96xi1>
    %914 = arith.select %913, %911, %804 : vector<1x96xi1>, vector<1x96xf32>
    %915 = vector.shape_cast %877 : vector<1x1xi1> to vector<1x1xi1>
    %916 = vector.broadcast %915 : vector<1x1xi1> to vector<1x96xi1>
    %917 = arith.select %916, %839, %807 : vector<1x96xi1>, vector<1x96xf32>
    %918 = vector.shape_cast %877 : vector<1x1xi1> to vector<1x1xi1>
    %919 = vector.broadcast %918 : vector<1x1xi1> to vector<1x32xi1>
    %920 = arith.select %919, %835, %810 : vector<1x32xi1>, vector<1x32xf32>
    %921 = arith.andi %877, %879 : vector<1x1xi1>
    %c1_i32_234 = arith.constant 1 : i32
    %922 = vector.broadcast %c1_i32_234 : i32 to vector<1x1xi32>
    %923 = arith.select %921, %922, %813 : vector<1x1xi1>, vector<1x1xi32>
    %924 = vector.extract_strided_slice %914 {offsets = [0, 0], sizes = [1, 64], strides = [1, 1]} : vector<1x96xf32> to vector<1x64xf32>
    %925 = vector.extract_strided_slice %917 {offsets = [0, 0], sizes = [1, 64], strides = [1, 1]} : vector<1x96xf32> to vector<1x64xf32>
    %926 = arith.addf %924, %925 : vector<1x64xf32>
    %cst_235 = arith.constant 5.000000e-01 : f32
    %927 = vector.broadcast %cst_235 : f32 to vector<1x64xf32>
    %928 = arith.mulf %927, %926 : vector<1x64xf32>
    %929 = math.tanh %928 : vector<1x64xf32>
    %cst_236 = arith.constant 1.000000e+00 : f32
    %930 = vector.broadcast %cst_236 : f32 to vector<1x64xf32>
    %931 = arith.addf %929, %930 : vector<1x64xf32>
    %cst_237 = arith.constant 5.000000e-01 : f32
    %932 = vector.broadcast %cst_237 : f32 to vector<1x64xf32>
    %933 = arith.mulf %932, %931 : vector<1x64xf32>
    %934 = vector.extract_strided_slice %933 {offsets = [0, 0], sizes = [1, 32], strides = [1, 1]} : vector<1x64xf32> to vector<1x32xf32>
    %935 = vector.extract_strided_slice %933 {offsets = [0, 32], sizes = [1, 32], strides = [1, 1]} : vector<1x64xf32> to vector<1x32xf32>
    %936 = vector.extract_strided_slice %914 {offsets = [0, 64], sizes = [1, 32], strides = [1, 1]} : vector<1x96xf32> to vector<1x32xf32>
    %937 = vector.extract_strided_slice %917 {offsets = [0, 64], sizes = [1, 32], strides = [1, 1]} : vector<1x96xf32> to vector<1x32xf32>
    %938 = arith.mulf %934, %937 : vector<1x32xf32>
    %939 = arith.addf %936, %938 : vector<1x32xf32>
    %940 = math.tanh %939 : vector<1x32xf32>
    %cst_238 = arith.constant 1.000000e+00 : f32
    %941 = vector.broadcast %cst_238 : f32 to vector<1x32xf32>
    %942 = arith.subf %941, %935 : vector<1x32xf32>
    %943 = arith.mulf %942, %940 : vector<1x32xf32>
    %944 = arith.mulf %935, %920 : vector<1x32xf32>
    %945 = arith.addf %943, %944 : vector<1x32xf32>
    %cst_239 = arith.constant dense<0.000000e+00> : vector<1x128xf32>
    %946 = tpu.matmul %945, %252, %cst_239 {dimension_numbers = #tpu.dot_dimension_numbers<[1], [0], [0], [1], [0, 0, 1, 1], [], []>} : vector<1x32xf32>, vector<32x128xf32>, vector<1x128xf32> -> vector<1x128xf32>
    %947 = arith.addf %946, %253 : vector<1x128xf32>
    %948 = vector.extract_strided_slice %947 {offsets = [0, 0], sizes = [1, 32], strides = [1, 1]} : vector<1x128xf32> to vector<1x32xf32>
    %949 = vector.extract_strided_slice %947 {offsets = [0, 32], sizes = [1, 96], strides = [1, 1]} : vector<1x128xf32> to vector<1x96xf32>
    %950 = vector.broadcast %948 : vector<1x32xf32> to vector<9x32xf32>
    %951 = arith.addf %250, %950 : vector<9x32xf32>
    %952 = math.tanh %951 : vector<9x32xf32>
    %953 = vector.broadcast %254 : vector<1x32xf32> to vector<9x32xf32>
    %954 = arith.mulf %952, %953 : vector<9x32xf32>
    %cst_240 = arith.constant dense<0.000000e+00> : vector<9xf32>
    %955 = vector.multi_reduction <add>, %954, %cst_240 [1] : vector<9x32xf32> to vector<9xf32>
    %956 = vector.shape_cast %955 : vector<9xf32> to vector<9x1xf32>
    %cst_241 = arith.constant 0.000000e+00 : f32
    %957 = vector.broadcast %cst_241 : f32 to vector<9x1xf32>
    %958 = arith.cmpf ogt, %889, %957 : vector<9x1xf32>
    %cst_242 = arith.constant -1.000000e+30 : f32
    %959 = vector.broadcast %cst_242 : f32 to vector<9x1xf32>
    %960 = arith.select %958, %959, %956 : vector<9x1xi1>, vector<9x1xf32>
    %961 = vector.shape_cast %960 : vector<9x1xf32> to vector<1x9x1xf32>
    %cst_243 = arith.constant dense<0xFF800000> : vector<1xf32>
    %962 = vector.multi_reduction <maximumf>, %961, %cst_243 [1, 2] : vector<1x9x1xf32> to vector<1xf32>
    %963 = vector.shape_cast %962 : vector<1xf32> to vector<1x1x1xf32>
    %964 = vector.extract %963[0, 0, 0] : f32 from vector<1x1x1xf32>
    %965 = vector.broadcast %964 : f32 to vector<1x1xf32>
    %966 = vector.broadcast %965 : vector<1x1xf32> to vector<9x1xf32>
    %967 = arith.subf %960, %966 : vector<9x1xf32>
    %968 = math.exp %967 : vector<9x1xf32>
    %969 = vector.shape_cast %968 : vector<9x1xf32> to vector<1x9x1xf32>
    %cst_244 = arith.constant dense<0.000000e+00> : vector<1xf32>
    %970 = vector.multi_reduction <add>, %969, %cst_244 [1, 2] : vector<1x9x1xf32> to vector<1xf32>
    %971 = vector.shape_cast %970 : vector<1xf32> to vector<1x1x1xf32>
    %972 = vector.extract %971[0, 0, 0] : f32 from vector<1x1x1xf32>
    %973 = vector.broadcast %972 : f32 to vector<1x1xf32>
    %974 = math.log %973 : vector<1x1xf32>
    %cst_245 = arith.constant 0.000000e+00 : f32
    %975 = vector.broadcast %cst_245 : f32 to vector<1x1xf32>
    %976 = arith.subf %975, %974 : vector<1x1xf32>
    %977 = vector.broadcast %965 : vector<1x1xf32> to vector<9x1xf32>
    %978 = arith.cmpf oeq, %960, %977 : vector<9x1xf32>
    %c9_i32_246 = arith.constant 9 : i32
    %979 = vector.broadcast %c9_i32_246 : i32 to vector<9x1xi32>
    %980 = arith.select %978, %255, %979 : vector<9x1xi1>, vector<9x1xi32>
    %981 = vector.shape_cast %980 : vector<9x1xi32> to vector<1x9x1xi32>
    %cst_247 = arith.constant dense<2147483647> : vector<1xi32>
    %982 = vector.multi_reduction <minsi>, %981, %cst_247 [1, 2] : vector<1x9x1xi32> to vector<1xi32>
    %983 = vector.shape_cast %982 : vector<1xi32> to vector<1x1x1xi32>
    %984 = vector.extract %983[0, 0, 0] : i32 from vector<1x1x1xi32>
    %985 = vector.broadcast %984 : i32 to vector<1x1xi32>
    %c0_i32_248 = arith.constant 0 : i32
    %986 = vector.broadcast %c0_i32_248 : i32 to vector<1x1xi32>
    %987 = arith.cmpi eq, %923, %986 : vector<1x1xi32>
    %c0_i32_249 = arith.constant 0 : i32
    %988 = vector.broadcast %c0_i32_249 : i32 to vector<1x1xi32>
    %989 = arith.cmpi eq, %985, %988 : vector<1x1xi32>
    %cst_250 = arith.constant dense<true> : vector<1x1xi1>
    %990 = arith.xori %989, %cst_250 : vector<1x1xi1>
    %991 = arith.andi %987, %990 : vector<1x1xi1>
    %992 = arith.addf %883, %976 : vector<1x1xf32>
    %993 = arith.select %987, %992, %883 : vector<1x1xi1>, vector<1x1xf32>
    %994 = vector.broadcast %985 : vector<1x1xi32> to vector<9x1xi32>
    %995 = arith.cmpi eq, %255, %994 : vector<9x1xi32>
    %996 = vector.broadcast %991 : vector<1x1xi1> to vector<9x1xi1>
    %997 = arith.andi %996, %995 : vector<9x1xi1>
    %cst_251 = arith.constant 1.000000e+00 : f32
    %998 = vector.broadcast %cst_251 : f32 to vector<9x1xf32>
    %999 = arith.select %997, %998, %889 : vector<9x1xi1>, vector<9x1xf32>
    %1000 = vector.broadcast %901 : vector<1x1xi32> to vector<1x8xi32>
    %1001 = arith.cmpi eq, %257, %1000 : vector<1x8xi32>
    %1002 = vector.broadcast %991 : vector<1x1xi1> to vector<1x8xi1>
    %1003 = arith.andi %1002, %1001 : vector<1x8xi1>
    %c1_i32_252 = arith.constant 1 : i32
    %1004 = vector.broadcast %c1_i32_252 : i32 to vector<1x1xi32>
    %1005 = arith.subi %985, %1004 : vector<1x1xi32>
    %1006 = vector.shape_cast %1005 : vector<1x1xi32> to vector<1x1xi32>
    %1007 = vector.broadcast %1006 : vector<1x1xi32> to vector<1x8xi32>
    %1008 = arith.select %1003, %1007, %898 : vector<1x8xi1>, vector<1x8xi32>
    %c1_i32_253 = arith.constant 1 : i32
    %1009 = vector.broadcast %c1_i32_253 : i32 to vector<1x1xi32>
    %1010 = arith.addi %901, %1009 : vector<1x1xi32>
    %1011 = arith.select %991, %1010, %901 : vector<1x1xi1>, vector<1x1xi32>
    %c1_i32_254 = arith.constant 1 : i32
    %1012 = vector.broadcast %c1_i32_254 : i32 to vector<1x1xi32>
    %1013 = arith.subi %985, %1012 : vector<1x1xi32>
    %1014 = vector.broadcast %1013 : vector<1x1xi32> to vector<8x1xi32>
    %1015 = arith.cmpi eq, %256, %1014 : vector<8x1xi32>
    %cst_255 = arith.constant 0.000000e+00 : f32
    %1016 = vector.shape_cast %1015 : vector<8x1xi1> to vector<8x1xi1>
    %1017 = vector.broadcast %1016 : vector<8x1xi1> to vector<8x96xi1>
    %1018 = vector.broadcast %cst_255 : f32 to vector<8x96xf32>
    %1019 = arith.select %1017, %31, %1018 : vector<8x96xi1>, vector<8x96xf32>
    %cst_256 = arith.constant dense<0.000000e+00> : vector<96xf32>
    %1020 = vector.multi_reduction <add>, %1019, %cst_256 [0] : vector<8x96xf32> to vector<96xf32>
    %1021 = vector.shape_cast %1020 : vector<96xf32> to vector<1x96xf32>
    %1022 = vector.shape_cast %991 : vector<1x1xi1> to vector<1x1xi1>
    %1023 = vector.broadcast %1022 : vector<1x1xi1> to vector<1x96xi1>
    %1024 = arith.select %1023, %1021, %914 : vector<1x96xi1>, vector<1x96xf32>
    %1025 = vector.shape_cast %987 : vector<1x1xi1> to vector<1x1xi1>
    %1026 = vector.broadcast %1025 : vector<1x1xi1> to vector<1x96xi1>
    %1027 = arith.select %1026, %949, %917 : vector<1x96xi1>, vector<1x96xf32>
    %1028 = vector.shape_cast %987 : vector<1x1xi1> to vector<1x1xi1>
    %1029 = vector.broadcast %1028 : vector<1x1xi1> to vector<1x32xi1>
    %1030 = arith.select %1029, %945, %920 : vector<1x32xi1>, vector<1x32xf32>
    %1031 = arith.andi %987, %989 : vector<1x1xi1>
    %c1_i32_257 = arith.constant 1 : i32
    %1032 = vector.broadcast %c1_i32_257 : i32 to vector<1x1xi32>
    %1033 = arith.select %1031, %1032, %923 : vector<1x1xi1>, vector<1x1xi32>
    %1034 = vector.extract_strided_slice %1024 {offsets = [0, 0], sizes = [1, 64], strides = [1, 1]} : vector<1x96xf32> to vector<1x64xf32>
    %1035 = vector.extract_strided_slice %1027 {offsets = [0, 0], sizes = [1, 64], strides = [1, 1]} : vector<1x96xf32> to vector<1x64xf32>
    %1036 = arith.addf %1034, %1035 : vector<1x64xf32>
    %cst_258 = arith.constant 5.000000e-01 : f32
    %1037 = vector.broadcast %cst_258 : f32 to vector<1x64xf32>
    %1038 = arith.mulf %1037, %1036 : vector<1x64xf32>
    %1039 = math.tanh %1038 : vector<1x64xf32>
    %cst_259 = arith.constant 1.000000e+00 : f32
    %1040 = vector.broadcast %cst_259 : f32 to vector<1x64xf32>
    %1041 = arith.addf %1039, %1040 : vector<1x64xf32>
    %cst_260 = arith.constant 5.000000e-01 : f32
    %1042 = vector.broadcast %cst_260 : f32 to vector<1x64xf32>
    %1043 = arith.mulf %1042, %1041 : vector<1x64xf32>
    %1044 = vector.extract_strided_slice %1043 {offsets = [0, 0], sizes = [1, 32], strides = [1, 1]} : vector<1x64xf32> to vector<1x32xf32>
    %1045 = vector.extract_strided_slice %1043 {offsets = [0, 32], sizes = [1, 32], strides = [1, 1]} : vector<1x64xf32> to vector<1x32xf32>
    %1046 = vector.extract_strided_slice %1024 {offsets = [0, 64], sizes = [1, 32], strides = [1, 1]} : vector<1x96xf32> to vector<1x32xf32>
    %1047 = vector.extract_strided_slice %1027 {offsets = [0, 64], sizes = [1, 32], strides = [1, 1]} : vector<1x96xf32> to vector<1x32xf32>
    %1048 = arith.mulf %1044, %1047 : vector<1x32xf32>
    %1049 = arith.addf %1046, %1048 : vector<1x32xf32>
    %1050 = math.tanh %1049 : vector<1x32xf32>
    %cst_261 = arith.constant 1.000000e+00 : f32
    %1051 = vector.broadcast %cst_261 : f32 to vector<1x32xf32>
    %1052 = arith.subf %1051, %1045 : vector<1x32xf32>
    %1053 = arith.mulf %1052, %1050 : vector<1x32xf32>
    %1054 = arith.mulf %1045, %1030 : vector<1x32xf32>
    %1055 = arith.addf %1053, %1054 : vector<1x32xf32>
    %cst_262 = arith.constant dense<0.000000e+00> : vector<1x128xf32>
    %1056 = tpu.matmul %1055, %252, %cst_262 {dimension_numbers = #tpu.dot_dimension_numbers<[1], [0], [0], [1], [0, 0, 1, 1], [], []>} : vector<1x32xf32>, vector<32x128xf32>, vector<1x128xf32> -> vector<1x128xf32>
    %1057 = arith.addf %1056, %253 : vector<1x128xf32>
    %1058 = vector.extract_strided_slice %1057 {offsets = [0, 0], sizes = [1, 32], strides = [1, 1]} : vector<1x128xf32> to vector<1x32xf32>
    %1059 = vector.extract_strided_slice %1057 {offsets = [0, 32], sizes = [1, 96], strides = [1, 1]} : vector<1x128xf32> to vector<1x96xf32>
    %1060 = vector.broadcast %1058 : vector<1x32xf32> to vector<9x32xf32>
    %1061 = arith.addf %250, %1060 : vector<9x32xf32>
    %1062 = math.tanh %1061 : vector<9x32xf32>
    %1063 = vector.broadcast %254 : vector<1x32xf32> to vector<9x32xf32>
    %1064 = arith.mulf %1062, %1063 : vector<9x32xf32>
    %cst_263 = arith.constant dense<0.000000e+00> : vector<9xf32>
    %1065 = vector.multi_reduction <add>, %1064, %cst_263 [1] : vector<9x32xf32> to vector<9xf32>
    %1066 = vector.shape_cast %1065 : vector<9xf32> to vector<9x1xf32>
    %cst_264 = arith.constant 0.000000e+00 : f32
    %1067 = vector.broadcast %cst_264 : f32 to vector<9x1xf32>
    %1068 = arith.cmpf ogt, %999, %1067 : vector<9x1xf32>
    %cst_265 = arith.constant -1.000000e+30 : f32
    %1069 = vector.broadcast %cst_265 : f32 to vector<9x1xf32>
    %1070 = arith.select %1068, %1069, %1066 : vector<9x1xi1>, vector<9x1xf32>
    %1071 = vector.shape_cast %1070 : vector<9x1xf32> to vector<1x9x1xf32>
    %cst_266 = arith.constant dense<0xFF800000> : vector<1xf32>
    %1072 = vector.multi_reduction <maximumf>, %1071, %cst_266 [1, 2] : vector<1x9x1xf32> to vector<1xf32>
    %1073 = vector.shape_cast %1072 : vector<1xf32> to vector<1x1x1xf32>
    %1074 = vector.extract %1073[0, 0, 0] : f32 from vector<1x1x1xf32>
    %1075 = vector.broadcast %1074 : f32 to vector<1x1xf32>
    %1076 = vector.broadcast %1075 : vector<1x1xf32> to vector<9x1xf32>
    %1077 = arith.subf %1070, %1076 : vector<9x1xf32>
    %1078 = math.exp %1077 : vector<9x1xf32>
    %1079 = vector.shape_cast %1078 : vector<9x1xf32> to vector<1x9x1xf32>
    %cst_267 = arith.constant dense<0.000000e+00> : vector<1xf32>
    %1080 = vector.multi_reduction <add>, %1079, %cst_267 [1, 2] : vector<1x9x1xf32> to vector<1xf32>
    %1081 = vector.shape_cast %1080 : vector<1xf32> to vector<1x1x1xf32>
    %1082 = vector.extract %1081[0, 0, 0] : f32 from vector<1x1x1xf32>
    %1083 = vector.broadcast %1082 : f32 to vector<1x1xf32>
    %1084 = math.log %1083 : vector<1x1xf32>
    %cst_268 = arith.constant 0.000000e+00 : f32
    %1085 = vector.broadcast %cst_268 : f32 to vector<1x1xf32>
    %1086 = arith.subf %1085, %1084 : vector<1x1xf32>
    %1087 = vector.broadcast %1075 : vector<1x1xf32> to vector<9x1xf32>
    %1088 = arith.cmpf oeq, %1070, %1087 : vector<9x1xf32>
    %c9_i32_269 = arith.constant 9 : i32
    %1089 = vector.broadcast %c9_i32_269 : i32 to vector<9x1xi32>
    %1090 = arith.select %1088, %255, %1089 : vector<9x1xi1>, vector<9x1xi32>
    %1091 = vector.shape_cast %1090 : vector<9x1xi32> to vector<1x9x1xi32>
    %cst_270 = arith.constant dense<2147483647> : vector<1xi32>
    %1092 = vector.multi_reduction <minsi>, %1091, %cst_270 [1, 2] : vector<1x9x1xi32> to vector<1xi32>
    %1093 = vector.shape_cast %1092 : vector<1xi32> to vector<1x1x1xi32>
    %1094 = vector.extract %1093[0, 0, 0] : i32 from vector<1x1x1xi32>
    %1095 = vector.broadcast %1094 : i32 to vector<1x1xi32>
    %c0_i32_271 = arith.constant 0 : i32
    %1096 = vector.broadcast %c0_i32_271 : i32 to vector<1x1xi32>
    %1097 = arith.cmpi eq, %1033, %1096 : vector<1x1xi32>
    %c0_i32_272 = arith.constant 0 : i32
    %1098 = vector.broadcast %c0_i32_272 : i32 to vector<1x1xi32>
    %1099 = arith.cmpi eq, %1095, %1098 : vector<1x1xi32>
    %cst_273 = arith.constant dense<true> : vector<1x1xi1>
    %1100 = arith.xori %1099, %cst_273 : vector<1x1xi1>
    %1101 = arith.andi %1097, %1100 : vector<1x1xi1>
    %1102 = arith.addf %993, %1086 : vector<1x1xf32>
    %1103 = arith.select %1097, %1102, %993 : vector<1x1xi1>, vector<1x1xf32>
    %1104 = vector.broadcast %1095 : vector<1x1xi32> to vector<9x1xi32>
    %1105 = arith.cmpi eq, %255, %1104 : vector<9x1xi32>
    %1106 = vector.broadcast %1101 : vector<1x1xi1> to vector<9x1xi1>
    %1107 = arith.andi %1106, %1105 : vector<9x1xi1>
    %cst_274 = arith.constant 1.000000e+00 : f32
    %1108 = vector.broadcast %cst_274 : f32 to vector<9x1xf32>
    %1109 = arith.select %1107, %1108, %999 : vector<9x1xi1>, vector<9x1xf32>
    %1110 = vector.broadcast %1011 : vector<1x1xi32> to vector<1x8xi32>
    %1111 = arith.cmpi eq, %257, %1110 : vector<1x8xi32>
    %1112 = vector.broadcast %1101 : vector<1x1xi1> to vector<1x8xi1>
    %1113 = arith.andi %1112, %1111 : vector<1x8xi1>
    %c1_i32_275 = arith.constant 1 : i32
    %1114 = vector.broadcast %c1_i32_275 : i32 to vector<1x1xi32>
    %1115 = arith.subi %1095, %1114 : vector<1x1xi32>
    %1116 = vector.shape_cast %1115 : vector<1x1xi32> to vector<1x1xi32>
    %1117 = vector.broadcast %1116 : vector<1x1xi32> to vector<1x8xi32>
    %1118 = arith.select %1113, %1117, %1008 : vector<1x8xi1>, vector<1x8xi32>
    %c1_i32_276 = arith.constant 1 : i32
    %1119 = vector.broadcast %c1_i32_276 : i32 to vector<1x1xi32>
    %1120 = arith.addi %1011, %1119 : vector<1x1xi32>
    %1121 = arith.select %1101, %1120, %1011 : vector<1x1xi1>, vector<1x1xi32>
    %c1_i32_277 = arith.constant 1 : i32
    %1122 = vector.broadcast %c1_i32_277 : i32 to vector<1x1xi32>
    %1123 = arith.subi %1095, %1122 : vector<1x1xi32>
    %1124 = vector.broadcast %1123 : vector<1x1xi32> to vector<8x1xi32>
    %1125 = arith.cmpi eq, %256, %1124 : vector<8x1xi32>
    %cst_278 = arith.constant 0.000000e+00 : f32
    %1126 = vector.shape_cast %1125 : vector<8x1xi1> to vector<8x1xi1>
    %1127 = vector.broadcast %1126 : vector<8x1xi1> to vector<8x96xi1>
    %1128 = vector.broadcast %cst_278 : f32 to vector<8x96xf32>
    %1129 = arith.select %1127, %31, %1128 : vector<8x96xi1>, vector<8x96xf32>
    %cst_279 = arith.constant dense<0.000000e+00> : vector<96xf32>
    %1130 = vector.multi_reduction <add>, %1129, %cst_279 [0] : vector<8x96xf32> to vector<96xf32>
    %1131 = vector.shape_cast %1130 : vector<96xf32> to vector<1x96xf32>
    %1132 = vector.shape_cast %1101 : vector<1x1xi1> to vector<1x1xi1>
    %1133 = vector.broadcast %1132 : vector<1x1xi1> to vector<1x96xi1>
    %1134 = arith.select %1133, %1131, %1024 : vector<1x96xi1>, vector<1x96xf32>
    %1135 = vector.shape_cast %1097 : vector<1x1xi1> to vector<1x1xi1>
    %1136 = vector.broadcast %1135 : vector<1x1xi1> to vector<1x96xi1>
    %1137 = arith.select %1136, %1059, %1027 : vector<1x96xi1>, vector<1x96xf32>
    %1138 = vector.shape_cast %1097 : vector<1x1xi1> to vector<1x1xi1>
    %1139 = vector.broadcast %1138 : vector<1x1xi1> to vector<1x32xi1>
    %1140 = arith.select %1139, %1055, %1030 : vector<1x32xi1>, vector<1x32xf32>
    %1141 = arith.andi %1097, %1099 : vector<1x1xi1>
    %c1_i32_280 = arith.constant 1 : i32
    %1142 = vector.broadcast %c1_i32_280 : i32 to vector<1x1xi32>
    %1143 = arith.select %1141, %1142, %1033 : vector<1x1xi1>, vector<1x1xi32>
    %1144 = vector.extract_strided_slice %1134 {offsets = [0, 0], sizes = [1, 64], strides = [1, 1]} : vector<1x96xf32> to vector<1x64xf32>
    %1145 = vector.extract_strided_slice %1137 {offsets = [0, 0], sizes = [1, 64], strides = [1, 1]} : vector<1x96xf32> to vector<1x64xf32>
    %1146 = arith.addf %1144, %1145 : vector<1x64xf32>
    %cst_281 = arith.constant 5.000000e-01 : f32
    %1147 = vector.broadcast %cst_281 : f32 to vector<1x64xf32>
    %1148 = arith.mulf %1147, %1146 : vector<1x64xf32>
    %1149 = math.tanh %1148 : vector<1x64xf32>
    %cst_282 = arith.constant 1.000000e+00 : f32
    %1150 = vector.broadcast %cst_282 : f32 to vector<1x64xf32>
    %1151 = arith.addf %1149, %1150 : vector<1x64xf32>
    %cst_283 = arith.constant 5.000000e-01 : f32
    %1152 = vector.broadcast %cst_283 : f32 to vector<1x64xf32>
    %1153 = arith.mulf %1152, %1151 : vector<1x64xf32>
    %1154 = vector.extract_strided_slice %1153 {offsets = [0, 0], sizes = [1, 32], strides = [1, 1]} : vector<1x64xf32> to vector<1x32xf32>
    %1155 = vector.extract_strided_slice %1153 {offsets = [0, 32], sizes = [1, 32], strides = [1, 1]} : vector<1x64xf32> to vector<1x32xf32>
    %1156 = vector.extract_strided_slice %1134 {offsets = [0, 64], sizes = [1, 32], strides = [1, 1]} : vector<1x96xf32> to vector<1x32xf32>
    %1157 = vector.extract_strided_slice %1137 {offsets = [0, 64], sizes = [1, 32], strides = [1, 1]} : vector<1x96xf32> to vector<1x32xf32>
    %1158 = arith.mulf %1154, %1157 : vector<1x32xf32>
    %1159 = arith.addf %1156, %1158 : vector<1x32xf32>
    %1160 = math.tanh %1159 : vector<1x32xf32>
    %cst_284 = arith.constant 1.000000e+00 : f32
    %1161 = vector.broadcast %cst_284 : f32 to vector<1x32xf32>
    %1162 = arith.subf %1161, %1155 : vector<1x32xf32>
    %1163 = arith.mulf %1162, %1160 : vector<1x32xf32>
    %1164 = arith.mulf %1155, %1140 : vector<1x32xf32>
    %1165 = arith.addf %1163, %1164 : vector<1x32xf32>
    %cst_285 = arith.constant dense<0.000000e+00> : vector<1x128xf32>
    %1166 = tpu.matmul %1165, %252, %cst_285 {dimension_numbers = #tpu.dot_dimension_numbers<[1], [0], [0], [1], [0, 0, 1, 1], [], []>} : vector<1x32xf32>, vector<32x128xf32>, vector<1x128xf32> -> vector<1x128xf32>
    %1167 = arith.addf %1166, %253 : vector<1x128xf32>
    %1168 = vector.extract_strided_slice %1167 {offsets = [0, 0], sizes = [1, 32], strides = [1, 1]} : vector<1x128xf32> to vector<1x32xf32>
    %1169 = vector.broadcast %1168 : vector<1x32xf32> to vector<9x32xf32>
    %1170 = arith.addf %250, %1169 : vector<9x32xf32>
    %1171 = math.tanh %1170 : vector<9x32xf32>
    %1172 = vector.broadcast %254 : vector<1x32xf32> to vector<9x32xf32>
    %1173 = arith.mulf %1171, %1172 : vector<9x32xf32>
    %cst_286 = arith.constant dense<0.000000e+00> : vector<9xf32>
    %1174 = vector.multi_reduction <add>, %1173, %cst_286 [1] : vector<9x32xf32> to vector<9xf32>
    %1175 = vector.shape_cast %1174 : vector<9xf32> to vector<9x1xf32>
    %cst_287 = arith.constant 0.000000e+00 : f32
    %1176 = vector.broadcast %cst_287 : f32 to vector<9x1xf32>
    %1177 = arith.cmpf ogt, %1109, %1176 : vector<9x1xf32>
    %cst_288 = arith.constant -1.000000e+30 : f32
    %1178 = vector.broadcast %cst_288 : f32 to vector<9x1xf32>
    %1179 = arith.select %1177, %1178, %1175 : vector<9x1xi1>, vector<9x1xf32>
    %1180 = vector.shape_cast %1179 : vector<9x1xf32> to vector<1x9x1xf32>
    %cst_289 = arith.constant dense<0xFF800000> : vector<1xf32>
    %1181 = vector.multi_reduction <maximumf>, %1180, %cst_289 [1, 2] : vector<1x9x1xf32> to vector<1xf32>
    %1182 = vector.shape_cast %1181 : vector<1xf32> to vector<1x1x1xf32>
    %1183 = vector.extract %1182[0, 0, 0] : f32 from vector<1x1x1xf32>
    %1184 = vector.broadcast %1183 : f32 to vector<1x1xf32>
    %1185 = vector.broadcast %1184 : vector<1x1xf32> to vector<9x1xf32>
    %1186 = arith.subf %1179, %1185 : vector<9x1xf32>
    %1187 = math.exp %1186 : vector<9x1xf32>
    %1188 = vector.shape_cast %1187 : vector<9x1xf32> to vector<1x9x1xf32>
    %cst_290 = arith.constant dense<0.000000e+00> : vector<1xf32>
    %1189 = vector.multi_reduction <add>, %1188, %cst_290 [1, 2] : vector<1x9x1xf32> to vector<1xf32>
    %1190 = vector.shape_cast %1189 : vector<1xf32> to vector<1x1x1xf32>
    %1191 = vector.extract %1190[0, 0, 0] : f32 from vector<1x1x1xf32>
    %1192 = vector.broadcast %1191 : f32 to vector<1x1xf32>
    %1193 = math.log %1192 : vector<1x1xf32>
    %cst_291 = arith.constant 0.000000e+00 : f32
    %1194 = vector.broadcast %cst_291 : f32 to vector<1x1xf32>
    %1195 = arith.subf %1194, %1193 : vector<1x1xf32>
    %1196 = vector.broadcast %1184 : vector<1x1xf32> to vector<9x1xf32>
    %1197 = arith.cmpf oeq, %1179, %1196 : vector<9x1xf32>
    %c9_i32_292 = arith.constant 9 : i32
    %1198 = vector.broadcast %c9_i32_292 : i32 to vector<9x1xi32>
    %1199 = arith.select %1197, %255, %1198 : vector<9x1xi1>, vector<9x1xi32>
    %1200 = vector.shape_cast %1199 : vector<9x1xi32> to vector<1x9x1xi32>
    %cst_293 = arith.constant dense<2147483647> : vector<1xi32>
    %1201 = vector.multi_reduction <minsi>, %1200, %cst_293 [1, 2] : vector<1x9x1xi32> to vector<1xi32>
    %1202 = vector.shape_cast %1201 : vector<1xi32> to vector<1x1x1xi32>
    %1203 = vector.extract %1202[0, 0, 0] : i32 from vector<1x1x1xi32>
    %1204 = vector.broadcast %1203 : i32 to vector<1x1xi32>
    %c0_i32_294 = arith.constant 0 : i32
    %1205 = vector.broadcast %c0_i32_294 : i32 to vector<1x1xi32>
    %1206 = arith.cmpi eq, %1143, %1205 : vector<1x1xi32>
    %c0_i32_295 = arith.constant 0 : i32
    %1207 = vector.broadcast %c0_i32_295 : i32 to vector<1x1xi32>
    %1208 = arith.cmpi eq, %1204, %1207 : vector<1x1xi32>
    %cst_296 = arith.constant dense<true> : vector<1x1xi1>
    %1209 = arith.xori %1208, %cst_296 : vector<1x1xi1>
    %1210 = arith.andi %1206, %1209 : vector<1x1xi1>
    %1211 = arith.addf %1103, %1195 : vector<1x1xf32>
    %1212 = arith.select %1206, %1211, %1103 : vector<1x1xi1>, vector<1x1xf32>
    %1213 = vector.broadcast %1121 : vector<1x1xi32> to vector<1x8xi32>
    %1214 = arith.cmpi eq, %257, %1213 : vector<1x8xi32>
    %1215 = vector.broadcast %1210 : vector<1x1xi1> to vector<1x8xi1>
    %1216 = arith.andi %1215, %1214 : vector<1x8xi1>
    %c1_i32_297 = arith.constant 1 : i32
    %1217 = vector.broadcast %c1_i32_297 : i32 to vector<1x1xi32>
    %1218 = arith.subi %1204, %1217 : vector<1x1xi32>
    %1219 = vector.shape_cast %1218 : vector<1x1xi32> to vector<1x1xi32>
    %1220 = vector.broadcast %1219 : vector<1x1xi32> to vector<1x8xi32>
    %1221 = arith.select %1216, %1220, %1118 : vector<1x8xi1>, vector<1x8xi32>
    %c1_i32_298 = arith.constant 1 : i32
    %1222 = vector.broadcast %c1_i32_298 : i32 to vector<1x1xi32>
    %1223 = arith.addi %1121, %1222 : vector<1x1xi32>
    %1224 = arith.select %1210, %1223, %1121 : vector<1x1xi1>, vector<1x1xi32>
    %c0_299 = arith.constant 0 : index
    %c0_300 = arith.constant 0 : index
    %1225 = vector.load %arg20[%c0_299, %c0_300] : memref<1x1xf32, #tpu.memory_space<vmem>>, vector<1x1xf32>
    tpu.vector_store %arg20[%c0_299, %c0_300], %1212 {strides = array<i32>} : memref<1x1xf32, #tpu.memory_space<vmem>>, vector<1x1xf32>,
    %c0_301 = arith.constant 0 : index
    %c0_302 = arith.constant 0 : index
    %1226 = vector.load %arg21[%c0_301, %c0_302] : memref<1x8xi32, #tpu.memory_space<vmem>>, vector<1x8xi32>
    tpu.vector_store %arg21[%c0_301, %c0_302], %1221 {strides = array<i32>} : memref<1x8xi32, #tpu.memory_space<vmem>>, vector<1x8xi32>,
    %c0_303 = arith.constant 0 : index
    %c0_304 = arith.constant 0 : index
    %1227 = vector.load %arg22[%c0_303, %c0_304] : memref<1x1xi32, #tpu.memory_space<vmem>>, vector<1x1xi32>
    tpu.vector_store %arg22[%c0_303, %c0_304], %1224 {strides = array<i32>} : memref<1x1xi32, #tpu.memory_space<vmem>>, vector<1x1xi32>,
    return
  }
}

</mosaic_0001>

<bundles_post_ra>
// kernel: tpu_custom_call.1
= control target key start
LH: loop header
LB: loop body
LE: loop exit
PB: predicated region body
PF: predicated region fallthrough
CT: control target
= control target key end

     0   :  { %s4502_s0 = inlined_call_operand.vmem [shape: f32[8,16], index: 0, kind: input, shape index: {}]   ;;  %s4503_s1 = inlined_call_operand.vmem [shape: f32[8,1], index: 1, kind: input, shape index: {}]   ;;  %s4504_s2 = inlined_call_operand.hbm [shape: f32[1,2], index: 2, kind: input, shape index: {}]   ;;  %s4505_s3 = inlined_call_operand.hbm [shape: f32[2,8], index: 3, kind: input, shape index: {}]   ;;  %s4506_s4 = inlined_call_operand.hbm [shape: f32[1,8], index: 4, kind: input, shape index: {}]   ;;  %s4507_s5 = inlined_call_operand.hbm [shape: f32[16,32], index: 5, kind: input, shape index: {}]   ;;  %s4508_s6 = inlined_call_operand.hbm [shape: f32[1,32], index: 6, kind: input, shape index: {}]   ;;  %s4509_s7 = inlined_call_operand.hbm [shape: f32[1,32], index: 7, kind: input, shape index: {}]   ;;  %s4510_s8 = inlined_call_operand.vmem [shape: f32[8,32], index: 8, kind: input, shape index: {}]   ;;  %s4511_s9 = inlined_call_operand.hbm [shape: f32[32,192], index: 9, kind: input, shape index: {}]   ;;  %s4512_s10 = inlined_call_operand.vmem [shape: f32[1,192], index: 10, kind: input, shape index: {}]   ;;  %s4513_s11 = inlined_call_operand.hbm [shape: f32[32,128], index: 11, kind: input, shape index: {}]   ;;  %s4514_s12 = inlined_call_operand.vmem [shape: f32[1,128], index: 12, kind: input, shape index: {}]   ;;  %s4515_s13 = inlined_call_operand.hbm [shape: f32[32,128], index: 13, kind: input, shape index: {}]   ;;  %s4516_s14 = inlined_call_operand.vmem [shape: f32[1,128], index: 14, kind: input, shape index: {}]   ;;  %s4517_s15 = inlined_call_operand.hbm [shape: f32[32,128], index: 15, kind: input, shape index: {}]   ;;  %s4518_s16 = inlined_call_operand.vmem [shape: f32[1,128], index: 16, kind: input, shape index: {}]   ;;  %s4519_s17 = inlined_call_operand.vmem [shape: f32[1,32], index: 17, kind: input, shape index: {}]   ;;  %s4520_s18 = inlined_call_operand.vmem [shape: f32[1,32], index: 18, kind: input, shape index: {}]   ;;  %s4521_s19 = inlined_call_operand.vmem [shape: f32[1,96], index: 19, kind: input, shape index: {}]   ;;  %s4522_s20 = inlined_call_operand.hbm [shape: f32[1,1], index: 20, kind: output, shape index: {0}]   ;;  %s4523_s21 = inlined_call_operand.hbm [shape: s32[1,8], index: 21, kind: output, shape index: {1}]   ;;  %s4524_s22 = inlined_call_operand.hbm [shape: s32[1,1], index: 22, kind: output, shape index: {2}]  }
   0x1   :  { %4526 = sst [smem:[#allocation32_spill]] %s4502_s0 }
   0x2   :  { %4527 = sst [smem:[#allocation33_spill]] %s4503_s1 }
   0x3   :  { %4528 = sst [smem:[#allocation34_spill]] %s4504_s2 }
   0x4   :  { %4529 = sst [smem:[#allocation35_spill]] %s4505_s3 }
   0x5   :  { %4530 = sst [smem:[#allocation36_spill]] %s4506_s4 }
   0x6   :  { %4531 = sst [smem:[#allocation37_spill]] %s4507_s5 }
   0x7   :  { %4532 = sst [smem:[#allocation38_spill]] %s4508_s6 }
   0x8   :  { %4533 = sst [smem:[#allocation39_spill]] %s4522_s20 }
   0x9   :  { %4534 = sst [smem:[#allocation40_spill]] %s4524_s22 }
   0xa   :  { %28 = vsyncpa [#allocation4], 0 }
   0xb   :  { %29 = vsyncpa [#allocation7], 0 }
   0xc   :  { %30 = vsyncpa [#allocation10], 0 }
   0xd   :  { %31 = vsyncpa [#allocation13], 0 }
   0xe   :  { %32 = vsyncpa [#allocation16], 0 }
   0xf   :  { %33 = vsyncpa [#allocation19], 0 }
  0x10   :  { %34 = vsyncpa [#allocation5], 0  ;;  %s4535_s29 = sld [smem:[#allocation35_spill]] }
  0x16   :  { %s56_s30 = sshll.u32 %s4535_s29, 4  ;;  %s57_s30 = int_to_ptr.hbm [resolvable:$true] %s56_s30 }
  0x17   :  { %35 = vsyncpa [#allocation22], 0  ;;  %s3057_s4 = smov [#allocation6]   ;;  %s4536_s5 = sld [smem:[#allocation37_spill]] }
  0x18   :  { %s58_s0 = sshll.u32 %s3057_s4, 4  ;;  %s3058_s6 = smov [#allocation9]   ;;  %s59_s0 = int_to_ptr.vmem [resolvable:$true] %s58_s0 }
  0x19   :  { %61 = dma.hbm_to_vmem [thread:$0]  %s57_s30, 32, %s59_s0, [#allocation7]  }
  0x1a   :  { %s79_s25 = sshll.u32 %s3058_s6, 4  ;;  %s3059_s26 = smov 128   ;;  %s80_s25 = int_to_ptr.vmem [resolvable:$true] %s79_s25 }
  0x1b   :  { %s3060_s2 = smov 8   ;;  %s102_s28 = sshll.u32 %s4509_s7, 4  ;;  %s103_s28 = int_to_ptr.hbm [resolvable:$true] %s102_s28 }
  0x1c   :  { %s3061_s29 = smov [#allocation12]   ;;  %s129_s0 = sshll.u32 %s4513_s11, 4  ;;  %s130_s0 = int_to_ptr.hbm [resolvable:$true] %s129_s0 }
  0x1d   :  { %s77_s24 = sshll.u32 %s4536_s5, 4  ;;  %s104_s4 = sshll.u32 %s3061_s29, 4  ;;  %s78_s24 = int_to_ptr.hbm [resolvable:$true] %s77_s24  ;;  %s105_s4 = int_to_ptr.vmem [resolvable:$true] %s104_s4 }
  0x1e   :  { %85 = dma.hbm_to_vmem [thread:$0]  %s78_s24, 256, %s80_s25, [#allocation10], %s3059_s26, %s3059_s26, %s3060_s2  }
  0x1f   :  { %107 = dma.hbm_to_vmem [thread:$0]  %s103_s28, 16, %s105_s4, [#allocation13]  }
  0x20   :  { %s3062_s1 = smov [#allocation15]   ;;  %s4537_s22 = sld [smem:[#allocation34_spill]] }
  0x21   :  { %s131_s5 = sshll.u32 %s3062_s1, 4  ;;  %s4538_s27 = sld [smem:[#allocation36_spill]]  ;;  %s132_s5 = int_to_ptr.vmem [resolvable:$true] %s131_s5 }
  0x22   :  { %137 = dma.hbm_to_vmem [thread:$0]  %s130_s0, 512, %s132_s5, [#allocation16], %s3059_s26, %s3059_s26, %s3060_s2  }
  0x23   :  { %s3063_s29 = smov [#allocation3]   ;;  %s3064_s28 = smov [#allocation8]  }
  0x24   :  { %s47_s11 = sshll.u32 %s3063_s29, 4  ;;  %s69_s4 = sshll.u32 %s3064_s28, 4  ;;  %s48_s11 = int_to_ptr.vmem [resolvable:$true] %s47_s11  ;;  %s70_s4 = int_to_ptr.vmem [resolvable:$true] %s69_s4 }
  0x25   :  { %s114_s5 = sshll.u32 %s4511_s9, 4  ;;  %s3065_s6 = smov [#allocation11]   ;;  %s115_s5 = int_to_ptr.hbm [resolvable:$true] %s114_s5 }
  0x26   :  { %s45_s24 = sshll.u32 %s4537_s22, 4  ;;  %s4539_s22 = sld [smem:[#allocation38_spill]]  ;;  %s46_s24 = int_to_ptr.hbm [resolvable:$true] %s45_s24 }
  0x27   :  { %s67_s3 = sshll.u32 %s4538_s27, 4  ;;  %s93_s7 = sshll.u32 %s3065_s6, 4  ;;  %s68_s3 = int_to_ptr.hbm [resolvable:$true] %s67_s3  ;;  %s94_s7 = int_to_ptr.vmem [resolvable:$true] %s93_s7 }
  0x28   :  { %50 = dma.hbm_to_vmem [thread:$0]  %s46_s24, 16, %s48_s11, [#allocation4]  }
  0x29   :  { %72 = dma.hbm_to_vmem [thread:$0]  %s68_s3, 16, %s70_s4, [#allocation7]  }
  0x2a   :  { %s3066_s25 = smov [#allocation14]   ;;  %s3067_s27 = smov 256  }
  0x2b   :  { %s116_s24 = sshll.u32 %s3066_s25, 4  ;;  %s3068_s29 = smov 16   ;;  %s117_s24 = int_to_ptr.vmem [resolvable:$true] %s116_s24 }
  0x2c   :  { %s91_s30 = sshll.u32 %s4539_s22, 4  ;;  %s144_s23 = sshll.u32 %s4515_s13, 4  ;;  %s92_s30 = int_to_ptr.hbm [resolvable:$true] %s91_s30  ;;  %s145_s23 = int_to_ptr.hbm [resolvable:$true] %s144_s23 }
  0x2d   :  { %96 = dma.hbm_to_vmem [thread:$0]  %s92_s30, 16, %s94_s7, [#allocation10]  }
  0x2e   :  { %122 = dma.hbm_to_vmem [thread:$0]  %s115_s5, 1024, %s117_s24, [#allocation13], %s3067_s27, %s3067_s27, %s3068_s29  }
  0x2f   :  { %s3069_s3 = smov [#allocation17]   ;;  %s159_s22 = sshll.u32 %s4517_s15, 4  ;;  %s160_s22 = int_to_ptr.hbm [resolvable:$true] %s159_s22 }
  0x30   :  { %s146_s4 = sshll.u32 %s3069_s3, 4  ;;  %s3070_s30 = smov [#allocation18]   ;;  %s147_s4 = int_to_ptr.vmem [resolvable:$true] %s146_s4 }
  0x31   :  { %152 = dma.hbm_to_vmem [thread:$0]  %s145_s23, 512, %s147_s4, [#allocation16], %s3059_s26, %s3059_s26, %s3060_s2  }
  0x32   :  { %s161_s1 = sshll.u32 %s3070_s30, 4  ;;  %s162_s1 = int_to_ptr.vmem [resolvable:$true] %s161_s1 }
  0x33   :  { %167 = dma.hbm_to_vmem [thread:$0]  %s160_s22, 512, %s162_s1, [#allocation19], %s3059_s26, %s3059_s26, %s3060_s2  }
  0x34   :  { %3041 = dma.done.wait [#allocation4], 16  }
  0x35   :  { %3042 = vsyncadd [#allocation4], 4294967280 }
  0x36   :  { %3043 = dma.done.wait [#allocation7], 48  }
  0x37   :  { %3044 = vsyncadd [#allocation7], 4294967248 }
  0x38   :  { %3045 = dma.done.wait [#allocation10], 272  }
  0x39   :  { %3046 = vsyncadd [#allocation10], 4294967024 }
  0x3a   :  { %3047 = dma.done.wait [#allocation13], 1040  }
  0x3b   :  { %3048 = vsyncadd [#allocation13], 4294966256 }
  0x3c   :  { %3049 = dma.done.wait [#allocation16], 1024  }
  0x3d   :  { %3050 = vsyncadd [#allocation16], 4294966272 }
  0x3e   :  { %3051 = dma.done.wait [#allocation19], 512  }
  0x3f   :  { %3052 = vsyncadd [#allocation19], 4294966784  ;;  %vm225_vm0 = vcmask 1041408   ;;  %vm221_vm1 = vcmask 15360   ;;  %v219_v0 = vld [vmem:[#allocation6] sm:$0x3] }
  0x40   :  { %v218_v1 = vld [vmem:[#allocation3] sm:$0x1]  ;;  %2429 = vmatpush.msk.msra.mxu0 %vm225_vm0, %v219_v0  ;;  %v287_v2 = vld [vmem:[%s4510_s8] sm:$0xff]  ;;  %s4540_s0 = sld [smem:[#allocation32_spill]]  ;;  %vm263_vm2 = vcmask 130048   ;;  %v3071_v7 = vmov 0  }
  0x41   :  { %2430 = vmatmul.msk.f32.vlgmr.msra.gmra.mxu0 %vm221_vm1, %v218_v1  ;;  %307 = vmatpush.msra.mxu2 %v287_v2  ;;  %v251_v3 = vld [vmem:[#allocation9 + $0x8] sm:$0xff]  ;;  %v250_v4 = vld [vmem:[#allocation9] sm:$0xff]  ;;  %s4541_s7 = sld [smem:[#allocation33_spill]]  ;;  %vm384_vm3 = vcmask 253952   ;;  %v3259_v13 = vld [vmem:[#allocation15] sm:$0xff]  ;;  %vm288_vm4 = vcmask 64512  }
  0x42   :  { %281 = vmatpush.msra.mxu1 %v251_v3  ;;  %2541 = vset.pattern.permute.xlu0 %v3071_v7  ;;  %v3247_v9 = vld [vmem:[#allocation15 + $0x18] sm:$0xff]  ;;  %v3249_v10 = vld [vmem:[#allocation15 + $0x10] sm:$0xff]  ;;  %v383_v11 = vld [vmem:[%s4520_s18] sm:$0x1]  ;;  %vm334_vm5 = vcmask 261120   ;;  %s3072_s18 = smov 32  }
  0x43   :  { %401 = vmatpush.msrb.mxu2 %v3247_v9  ;;  %v3255_v12 = vld [vmem:[#allocation15 + $0x8] sm:$0xff]  ;;  %385 = vst.msk [vmem:[#allocation2] sm:$0x1] %vm384_vm3, %v383_v11  ;;  %v326_v18 = vld [vmem:[#allocation14 + $0x30] sm:$0xff]  ;;  %v327_v19 = vld [vmem:[#allocation14 + $0x38] sm:$0xff]  ;;  %v431_v26 = vperm.slane %v383_v11, 0 }
  0x44   :  { %282 = vmatpush.msra.mxu1 %v250_v4  ;;  %v220_v14 = vld [vmem:[#allocation8] sm:$0x1]  ;;  %350 = vmatpush.msra.mxu3 %v326_v18  ;;  %v324_v20 = vld [vmem:[#allocation14 + $0x20] sm:$0xff]  ;;  %v322_v22 = vld [vmem:[#allocation14 + $0x10] sm:$0xff]  ;;  %s3073_s29 = smov 64   ;;  %vm496_vm6 = vcmask 254977  }
  0x45   :  { %402 = vmatpush.msrb.mxu2 %v3249_v10  ;;  %370 = vmatpush.msrb.mxu0 %v327_v19  ;;  %v325_v21 = vld [vmem:[#allocation14 + $0x28] sm:$0xff]  ;;  %v323_v23 = vld [vmem:[#allocation14 + $0x18] sm:$0xff]  ;;  %v320_v24 = vld [vmem:[#allocation14] sm:$0xff]  ;;  %vm673_vm7 = vcmask 258052   ;;  %vm555_vm8 = vcmask 256002   ;;  %vm732_vm9 = vcmask 259077  }
  0x46   :  { %v216_v5 = vld [vmem:[%s4540_s0] sm:$0xff]  ;;  %456 = vmatpush.msrb.mxu1 %v3247_v9  ;;  %351 = vmatpush.msra.mxu3 %v324_v20  ;;  %v2542_v27 = vld [vmem:[#allocation12] ss:$0 sm:$0xff]  ;;  %v2543_v34 = vld [vmem:[#allocation11] ss:$0 sm:$0xff]  ;;  %vm614_vm10 = vcmask 257027  }
  0x47   :  { %v217_v6 = vmul.f32 100000.0, %v216_v5  ;;  %v252_v8 = vld [vmem:[%s4541_s7] sm:$0xff]  ;;  %403 = vmatpush.msrb.mxu2 %v3255_v12  ;;  %371 = vmatpush.msrb.mxu0 %v325_v21  ;;  %vm791_vm11 = vcmask 260102   ;;  %vm850_vm12 = vcmask 261127   ;;  %vm979_vm13 = vcmask 1040384  }
  0x48   :  { %256 = vperm.xlu0 %2541, %v252_v8   ;;  %457 = vmatpush.msrb.mxu1 %v3249_v10  ;;  %v321_v25 = vld [vmem:[#allocation14 + $0x8] sm:$0xff]  ;;  %vm4525_vm14 = vcmask 7168   ;;  %vm998_vm15 = vcmask 0  }
  0x49   :  { %2431 = vmatmul.msk.f32.vlgmr.msra.gmra.mxu1 %vm263_vm2, %v217_v6  ;;  %404 = vmatpush.msrb.mxu2 %v3259_v13  ;;  %v3288_v37 = vld [vmem:[%s4514_s12] sm:$0x1]  ;;  %s4609_s12 = sld [smem:[#allocation40_spill]] }
  0x4a   :  { %458 = vmatpush.msrb.mxu1 %v3255_v12  ;;  %352 = vmatpush.msra.mxu3 %v322_v22  ;;  %v3305_v41 = vld [vmem:[%s4512_s10] sm:$0x3]  ;;  %s3074_s10 = smov 96  }
  0x4b   :  { %372 = vmatpush.msrb.mxu0 %v323_v23  ;;  %432 = vrot.lane.b32.xlu2 %v431_v26, %s3072_s18  ;;  %v330_v42 = vperm.slane %v3305_v41, 0 }
  0x4c   :  { %459 = vmatpush.msrb.mxu1 %v3259_v13  ;;  %353 = vmatpush.msra.mxu3 %v320_v24 }
  0x4d   :  { %373 = vmatpush.msrb.mxu0 %v321_v25 }
  0x4e   :  { %692 = vmatpush.msra.mxu1 %v3247_v9  ;;  %515 = vmatpush.msrb.mxu3 %v3247_v9 }
  0x4f   :  { %574 = vmatpush.msra.mxu0 %v3247_v9  ;;  %s2405_s11 = sshll.u32 %s4609_s12, 4  ;;  %s2406_s11 = int_to_ptr.hbm [resolvable:$true] %s2405_s11 }
  0x50   :  { %693 = vmatpush.msra.mxu1 %v3249_v10  ;;  %516 = vmatpush.msrb.mxu3 %v3249_v10 }
  0x51   :  { %575 = vmatpush.msra.mxu0 %v3249_v10 }
  0x52   :  { %694 = vmatpush.msra.mxu1 %v3255_v12  ;;  %517 = vmatpush.msrb.mxu3 %v3255_v12 }
  0x53   :  { %576 = vmatpush.msra.mxu0 %v3255_v12 }
  0x54   :  { %695 = vmatpush.msra.mxu1 %v3259_v13  ;;  %518 = vmatpush.msrb.mxu3 %v3259_v13 }
  0x55   :  { %577 = vmatpush.msra.mxu0 %v3259_v13 }
  0xa5   :  { %v433_v55 = vpop.permute.xlu2 %432 }
  0xba   :  { %v257_v28 = vpop.permute.xlu0 %256 }
  0xbb   :  { %v262_v29 = vmul.f32 %v2542_v27, %v257_v28 }
  0xbe   :  { %v246_v15 = vpop.f32.mrf.mxu0 }
  0xbf   :  { %v247_v16 = vadd.f32 %v246_v15, %v220_v14 }
  0xc1   :  { %2547 = vtanh.f32 %v247_v16 }
  0xc6   :  { %v284_v30 = vpop.f32.mrf.mxu1 }
  0xc7   :  { %v2548_v17 = vpop.eup %2547  ;;  %v285_v31 = vadd.f32 %v284_v30, %v262_v29 }
  0xc8   :  { %2432 = vmatmul.msk.f32.vlgmr.msra.gmra.mxu2 %vm288_vm4, %v2548_v17 }
  0xc9   :  { %633 = vmatpush.msra.mxu2 %v3247_v9 }
  0xcb   :  { %634 = vmatpush.msra.mxu2 %v3249_v10 }
  0xcd   :  { %635 = vmatpush.msra.mxu2 %v3255_v12 }
  0xcf   :  { %636 = vmatpush.msra.mxu2 %v3259_v13 }
  0xd0   :  { %2435 = vmatmul.msk.f32.vlgmr.msrb.gmra.mxu2 %vm334_vm5, %v383_v11 }
 0x14b   :  { %v309_v32 = vpop.f32.mrf.mxu2 }
 0x14c   :  { %v312_v33 = vperm.slane %v309_v32, 0 }
 0x14e   :  { %v313_v35 = vadd.f32 %v312_v33, %v285_v31 }
 0x150   :  { %v318_v36 = vadd.f32 %v2543_v34, %v313_v35 }
 0x152   :  { %2549 = vtanh.f32 %v318_v36 }
 0x153   :  { %v406_v38 = vpop.f32.mrf.mxu2 }
 0x154   :  { %v407_v39 = vadd.f32 %v406_v38, %v3288_v37 }
 0x156   :  { %415 = vrot.lane.b32.xlu0 %v407_v39, %s3073_s29 }
 0x158   :  { %v2550_v40 = vpop.eup %2549 }
 0x159   :  { %2433 = vmatmul.msk.f32.vlgmr.msra.gmra.mxu3 %vm334_vm5, %v2550_v40  ;;  %2434 = vmatmul.msk.f32.vlgmr.msrb.gmra.mxu0 %vm334_vm5, %v2550_v40 }
 0x15a   :  { %751 = vmatpush.msra.mxu3 %v3247_v9  ;;  %810 = vmatpush.msrb.mxu0 %v3247_v9 }
 0x15c   :  { %752 = vmatpush.msra.mxu3 %v3249_v10  ;;  %811 = vmatpush.msrb.mxu0 %v3249_v10 }
 0x15e   :  { %753 = vmatpush.msra.mxu3 %v3255_v12  ;;  %812 = vmatpush.msrb.mxu0 %v3255_v12 }
 0x160   :  { %754 = vmatpush.msra.mxu3 %v3259_v13  ;;  %813 = vmatpush.msrb.mxu0 %v3259_v13 }
 0x1c8   :  { %v416_v49 = vpop.permute.xlu0 %415 }
 0x1dc   :  { %v355_v43 = vpop.f32.mrf.mxu3 }
 0x1dd   :  { %v3308_v44 = vadd.f32 %v355_v43, %v330_v42  ;;  %v3340_v43 = vpop.f32.mrf.mxu0 }
 0x1df   :  { %v409_v45 = vadd.f32 %v407_v39, %v3308_v44 }
 0x1e1   :  { %v410_v46 = vmul.f32 0.5, %v409_v45 }
 0x1e3   :  { %2551 = vtanh.f32 %v410_v46 }
 0x1e9   :  { %v2552_v47 = vpop.eup %2551 }
 0x1ea   :  { %v412_v48 = vadd.f32 1.0, %v2552_v47 }
 0x1ec   :  { %v413_v50 = vmul.f32 0.5, %v412_v48 }
 0x1ee   :  { %v418_v51 = vmul.f32 %v416_v49, %v413_v50  ;;  %v425_v56 = vsub.f32 1.0, %v413_v50  ;;  %v435_v58 = vmul.f32 %v433_v55, %v413_v50 }
 0x1f0   :  { %420 = vrot.lane.b32.xlu1 %v418_v51, %s3073_s29 }
 0x262   :  { %v421_v52 = vpop.permute.xlu1 %420 }
 0x263   :  { %v423_v53 = vadd.f32 %v421_v52, %v3308_v44 }
 0x265   :  { %2553 = vtanh.f32 %v423_v53 }
 0x26b   :  { %v2554_v54 = vpop.eup %2553 }
 0x26c   :  { %427 = vrot.lane.b32.xlu1 %v2554_v54, %s3074_s10 }
 0x2de   :  { %v428_v57 = vpop.permute.xlu1 %427 }
 0x2df   :  { %v430_v59 = vmul.f32 %v428_v57, %v425_v56 }
 0x2e1   :  { %v436_v60 = vadd.f32 %v435_v58, %v430_v59 }
 0x2e3   :  { %438 = vrot.lane.b32.xlu2 %v436_v60, %s3074_s10  ;;  %v488_v12 = vrot.slane %v436_v60, 7 }
 0x33d   :  { %v439_v61 = vpop.permute.xlu2 %438 }
 0x33e   :  { %441 = vst.msk [vmem:[#allocation2 + $0x1] sm:$0x1] %vm384_vm3, %v439_v61  ;;  %2436 = vmatmul.msk.f32.vlgmr.msrb.gmra.mxu1 %vm334_vm5, %v439_v61 }
 0x3bb   :  { %v461_v62 = vpop.f32.mrf.mxu1 }
 0x3bc   :  { %v462_v63 = vadd.f32 %v461_v62, %v3288_v37 }
 0x3be   :  { %v465_v0 = vrot.slane %v462_v63, 7 }
 0x3c0   :  { %472 = vrot.lane.b32.xlu0 %v465_v0, %s3073_s29  ;;  %v467_v1 = vadd.f32 %v465_v0, %v3308_v44 }
 0x3c2   :  { %v468_v2 = vmul.f32 0.5, %v467_v1 }
 0x3c4   :  { %2555 = vtanh.f32 %v468_v2 }
 0x3ca   :  { %v2556_v3 = vpop.eup %2555 }
 0x3cb   :  { %v470_v4 = vadd.f32 1.0, %v2556_v3 }
 0x3cd   :  { %v471_v5 = vmul.f32 0.5, %v470_v4 }
 0x3cf   :  { %v482_v13 = vsub.f32 1.0, %v471_v5  ;;  %v490_v16 = vmul.f32 %v488_v12, %v471_v5 }
 0x432   :  { %v473_v6 = vpop.permute.xlu0 %472 }
 0x433   :  { %v475_v8 = vmul.f32 %v473_v6, %v471_v5 }
 0x435   :  { %477 = vrot.lane.b32.xlu1 %v475_v8, %s3073_s29 }
 0x4a7   :  { %v478_v9 = vpop.permute.xlu1 %477 }
 0x4a8   :  { %v480_v10 = vadd.f32 %v478_v9, %v3308_v44 }
 0x4aa   :  { %2557 = vtanh.f32 %v480_v10 }
 0x4b0   :  { %v2558_v11 = vpop.eup %2557 }
 0x4b1   :  { %484 = vrot.lane.b32.xlu2 %v2558_v11, %s3074_s10 }
 0x50b   :  { %v485_v14 = vpop.permute.xlu2 %484 }
 0x50c   :  { %v487_v15 = vmul.f32 %v485_v14, %v482_v13 }
 0x50e   :  { %v3323_v17 = vadd.f32 %v490_v16, %v487_v15 }
 0x510   :  { %v498_v18 = vrot.slane %v3323_v17, 1  ;;  %v547_v34 = vrot.slane %v3323_v17, 7 }
 0x512   :  { %499 = vrot.lane.b32.xlu0 %v498_v18, %s3074_s10 }
 0x584   :  { %v500_v19 = vpop.permute.xlu0 %499 }
 0x585   :  { %2437 = vmatmul.msk.f32.vlgmr.msrb.gmra.mxu3 %vm334_vm5, %v500_v19 }
 0x608   :  { %v520_v20 = vpop.f32.mrf.mxu3 }
 0x609   :  { %v521_v21 = vadd.f32 %v520_v20, %v3288_v37 }
 0x60b   :  { %v524_v22 = vrot.slane %v521_v21, 6 }
 0x60d   :  { %531 = vrot.lane.b32.xlu1 %v524_v22, %s3073_s29  ;;  %v526_v23 = vadd.f32 %v524_v22, %v3308_v44 }
 0x60f   :  { %v527_v24 = vmul.f32 0.5, %v526_v23 }
 0x611   :  { %2559 = vtanh.f32 %v527_v24 }
 0x617   :  { %v2560_v25 = vpop.eup %2559 }
 0x618   :  { %v529_v26 = vadd.f32 1.0, %v2560_v25 }
 0x61a   :  { %v530_v27 = vmul.f32 0.5, %v529_v26 }
 0x61c   :  { %v541_v33 = vsub.f32 1.0, %v530_v27  ;;  %v549_v36 = vmul.f32 %v547_v34, %v530_v27 }
 0x67f   :  { %v532_v28 = vpop.permute.xlu1 %531 }
 0x680   :  { %v534_v29 = vmul.f32 %v532_v28, %v530_v27 }
 0x682   :  { %536 = vrot.lane.b32.xlu2 %v534_v29, %s3073_s29 }
 0x6dc   :  { %v537_v30 = vpop.permute.xlu2 %536 }
 0x6dd   :  { %v539_v31 = vadd.f32 %v537_v30, %v3308_v44 }
 0x6df   :  { %2561 = vtanh.f32 %v539_v31 }
 0x6e5   :  { %v2562_v32 = vpop.eup %2561 }
 0x6e6   :  { %543 = vrot.lane.b32.xlu0 %v2562_v32, %s3074_s10 }
 0x758   :  { %v544_v35 = vpop.permute.xlu0 %543 }
 0x759   :  { %v546_v38 = vmul.f32 %v544_v35, %v541_v33 }
 0x75b   :  { %v3335_v39 = vadd.f32 %v549_v36, %v546_v38 }
 0x75d   :  { %v557_v40 = vrot.slane %v3335_v39, 2  ;;  %v606_v59 = vrot.slane %v3335_v39, 7 }
 0x75f   :  { %558 = vrot.lane.b32.xlu1 %v557_v40, %s3074_s10 }
 0x7d1   :  { %v559_v42 = vpop.permute.xlu1 %558 }
 0x7d2   :  { %2438 = vmatmul.msk.f32.vlgmr.msra.gmra.mxu0 %vm334_vm5, %v559_v42 }
 0x84f   :  { %v579_v45 = vpop.f32.mrf.mxu0 }
 0x850   :  { %v580_v46 = vadd.f32 %v579_v45, %v3288_v37 }
 0x852   :  { %v583_v47 = vrot.slane %v580_v46, 5 }
 0x854   :  { %590 = vrot.lane.b32.xlu2 %v583_v47, %s3073_s29  ;;  %v585_v48 = vadd.f32 %v583_v47, %v3308_v44 }
 0x856   :  { %v586_v49 = vmul.f32 0.5, %v585_v48 }
 0x858   :  { %2563 = vtanh.f32 %v586_v49 }
 0x85e   :  { %v2564_v50 = vpop.eup %2563 }
 0x85f   :  { %v588_v51 = vadd.f32 1.0, %v2564_v50 }
 0x861   :  { %v589_v52 = vmul.f32 0.5, %v588_v51 }
 0x863   :  { %v600_v58 = vsub.f32 1.0, %v589_v52  ;;  %v608_v61 = vmul.f32 %v606_v59, %v589_v52 }
 0x8ae   :  { %v591_v53 = vpop.permute.xlu2 %590 }
 0x8af   :  { %v593_v54 = vmul.f32 %v591_v53, %v589_v52 }
 0x8b1   :  { %595 = vrot.lane.b32.xlu0 %v593_v54, %s3073_s29 }
 0x923   :  { %v596_v55 = vpop.permute.xlu0 %595 }
 0x924   :  { %v598_v56 = vadd.f32 %v596_v55, %v3308_v44 }
 0x926   :  { %2565 = vtanh.f32 %v598_v56 }
 0x92c   :  { %v2566_v57 = vpop.eup %2565 }
 0x92d   :  { %602 = vrot.lane.b32.xlu1 %v2566_v57, %s3074_s10 }
 0x99f   :  { %v603_v60 = vpop.permute.xlu1 %602 }
 0x9a0   :  { %v605_v62 = vmul.f32 %v603_v60, %v600_v58 }
 0x9a2   :  { %v3349_v63 = vadd.f32 %v608_v61, %v605_v62 }
 0x9a4   :  { %v616_v0 = vrot.slane %v3349_v63, 3  ;;  %v665_v18 = vrot.slane %v3349_v63, 7 }
 0x9a6   :  { %617 = vrot.lane.b32.xlu2 %v616_v0, %s3074_s10 }
 0xa00   :  { %v618_v1 = vpop.permute.xlu2 %617 }
 0xa01   :  { %2439 = vmatmul.msk.f32.vlgmr.msra.gmra.mxu2 %vm334_vm5, %v618_v1 }
 0xa84   :  { %v638_v2 = vpop.f32.mrf.mxu2 }
 0xa85   :  { %v639_v3 = vadd.f32 %v638_v2, %v3288_v37 }
 0xa87   :  { %v642_v4 = vrot.slane %v639_v3, 4 }
 0xa89   :  { %649 = vrot.lane.b32.xlu0 %v642_v4, %s3073_s29  ;;  %v644_v5 = vadd.f32 %v642_v4, %v3308_v44 }
 0xa8b   :  { %v645_v6 = vmul.f32 0.5, %v644_v5 }
 0xa8d   :  { %2567 = vtanh.f32 %v645_v6 }
 0xa93   :  { %v2568_v8 = vpop.eup %2567 }
 0xa94   :  { %v647_v9 = vadd.f32 1.0, %v2568_v8 }
 0xa96   :  { %v648_v10 = vmul.f32 0.5, %v647_v9 }
 0xa98   :  { %v659_v16 = vsub.f32 1.0, %v648_v10  ;;  %v667_v20 = vmul.f32 %v665_v18, %v648_v10 }
 0xafb   :  { %v650_v11 = vpop.permute.xlu0 %649 }
 0xafc   :  { %v652_v12 = vmul.f32 %v650_v11, %v648_v10 }
 0xafe   :  { %654 = vrot.lane.b32.xlu1 %v652_v12, %s3073_s29 }
 0xb70   :  { %v655_v13 = vpop.permute.xlu1 %654 }
 0xb71   :  { %v657_v14 = vadd.f32 %v655_v13, %v3308_v44 }
 0xb73   :  { %2569 = vtanh.f32 %v657_v14 }
 0xb79   :  { %v2570_v15 = vpop.eup %2569 }
 0xb7a   :  { %661 = vrot.lane.b32.xlu2 %v2570_v15, %s3074_s10 }
 0xbd4   :  { %v662_v19 = vpop.permute.xlu2 %661 }
 0xbd5   :  { %v664_v21 = vmul.f32 %v662_v19, %v659_v16 }
 0xbd7   :  { %v3361_v22 = vadd.f32 %v667_v20, %v664_v21 }
 0xbd9   :  { %v675_v23 = vrot.slane %v3361_v22, 4  ;;  %v724_v42 = vrot.slane %v3361_v22, 7 }
 0xbdb   :  { %676 = vrot.lane.b32.xlu0 %v675_v23, %s3074_s10 }
 0xc4d   :  { %v677_v24 = vpop.permute.xlu0 %676 }
 0xc4e   :  { %2440 = vmatmul.msk.f32.vlgmr.msra.gmra.mxu1 %vm334_vm5, %v677_v24 }
 0xccb   :  { %v697_v25 = vpop.f32.mrf.mxu1 }
 0xccc   :  { %v698_v26 = vadd.f32 %v697_v25, %v3288_v37 }
 0xcce   :  { %v701_v27 = vrot.slane %v698_v26, 3  ;;  %v856_v26 = vld [vmem:[#allocation17 + $0x10] sm:$0xff] }
 0xcd0   :  { %708 = vrot.lane.b32.xlu1 %v701_v27, %s3073_s29  ;;  %v703_v28 = vadd.f32 %v701_v27, %v3308_v44  ;;  %v855_v27 = vld [vmem:[#allocation17 + $0x8] sm:$0xff] }
 0xcd2   :  { %v704_v29 = vmul.f32 0.5, %v703_v28  ;;  %v854_v28 = vld [vmem:[#allocation17] sm:$0xff] }
 0xcd4   :  { %2571 = vtanh.f32 %v704_v29 }
 0xcda   :  { %v2572_v30 = vpop.eup %2571 }
 0xcdb   :  { %v706_v31 = vadd.f32 1.0, %v2572_v30 }
 0xcdd   :  { %v707_v32 = vmul.f32 0.5, %v706_v31 }
 0xcdf   :  { %v718_v40 = vsub.f32 1.0, %v707_v32  ;;  %v726_v46 = vmul.f32 %v724_v42, %v707_v32 }
 0xd42   :  { %v709_v33 = vpop.permute.xlu1 %708 }
 0xd43   :  { %v711_v34 = vmul.f32 %v709_v33, %v707_v32 }
 0xd45   :  { %713 = vrot.lane.b32.xlu2 %v711_v34, %s3073_s29 }
 0xd9f   :  { %v714_v35 = vpop.permute.xlu2 %713 }
 0xda0   :  { %v716_v36 = vadd.f32 %v714_v35, %v3308_v44 }
 0xda2   :  { %2573 = vtanh.f32 %v716_v36 }
 0xda8   :  { %v2574_v38 = vpop.eup %2573 }
 0xda9   :  { %720 = vrot.lane.b32.xlu0 %v2574_v38, %s3074_s10 }
 0xe1b   :  { %v721_v45 = vpop.permute.xlu0 %720 }
 0xe1c   :  { %v723_v47 = vmul.f32 %v721_v45, %v718_v40  ;;  %v3407_v45 = vld [vmem:[%s4516_s14] ss:$0 sm:$0xff] }
 0xe1e   :  { %v727_v48 = vadd.f32 %v726_v46, %v723_v47 }
 0xe20   :  { %v734_v49 = vrot.slane %v727_v48, 5  ;;  %v783_v2 = vrot.slane %v727_v48, 7 }
 0xe22   :  { %735 = vrot.lane.b32.xlu1 %v734_v49, %s3074_s10 }
 0xe94   :  { %v736_v50 = vpop.permute.xlu1 %735 }
 0xe95   :  { %2441 = vmatmul.msk.f32.vlgmr.msra.gmra.mxu3 %vm334_vm5, %v736_v50 }
 0xf18   :  { %v756_v51 = vpop.f32.mrf.mxu3 }
 0xf19   :  { %v757_v52 = vadd.f32 %v756_v51, %v3288_v37 }
 0xf1b   :  { %v760_v53 = vrot.slane %v757_v52, 2 }
 0xf1d   :  { %767 = vrot.lane.b32.xlu2 %v760_v53, %s3073_s29  ;;  %v762_v54 = vadd.f32 %v760_v53, %v3308_v44 }
 0xf1f   :  { %v763_v55 = vmul.f32 0.5, %v762_v54 }
 0xf21   :  { %2575 = vtanh.f32 %v763_v55 }
 0xf27   :  { %v2576_v56 = vpop.eup %2575 }
 0xf28   :  { %v765_v57 = vadd.f32 1.0, %v2576_v56 }
 0xf2a   :  { %v766_v58 = vmul.f32 0.5, %v765_v57 }
 0xf2c   :  { %v777_v1 = vsub.f32 1.0, %v766_v58  ;;  %v785_v4 = vmul.f32 %v783_v2, %v766_v58 }
 0xf77   :  { %v768_v59 = vpop.permute.xlu2 %767 }
 0xf78   :  { %v770_v60 = vmul.f32 %v768_v59, %v766_v58 }
 0xf7a   :  { %772 = vrot.lane.b32.xlu0 %v770_v60, %s3073_s29  ;;  %v3421_v60 = vld [vmem:[#allocation18 + $0x18] sm:$0xff] }
 0xf7b   :  { %952 = vmatpush.msrb.mxu1 %v3421_v60  ;;  %1121 = vmatpush.msrb.mxu3 %v3421_v60 }
 0xf7c   :  { %1287 = vmatpush.msra.mxu0 %v3421_v60 }
 0xfec   :  { %v773_v61 = vpop.permute.xlu0 %772 }
 0xfed   :  { %v775_v62 = vadd.f32 %v773_v61, %v3308_v44  ;;  %v3423_v61 = vld [vmem:[#allocation18 + $0x10] sm:$0xff] }
 0xfee   :  { %953 = vmatpush.msrb.mxu1 %v3423_v61  ;;  %1122 = vmatpush.msrb.mxu3 %v3423_v61 }
 0xfef   :  { %2577 = vtanh.f32 %v775_v62  ;;  %v3427_v62 = vld [vmem:[#allocation18 + $0x8] sm:$0xff]  ;;  %1288 = vmatpush.msra.mxu0 %v3423_v61 }
 0xff0   :  { %954 = vmatpush.msrb.mxu1 %v3427_v62  ;;  %1123 = vmatpush.msrb.mxu3 %v3427_v62 }
 0xff1   :  { %1289 = vmatpush.msra.mxu0 %v3427_v62 }
 0xff5   :  { %v2578_v0 = vpop.eup %2577 }
 0xff6   :  { %779 = vrot.lane.b32.xlu1 %v2578_v0, %s3074_s10  ;;  %v3433_v0 = vld [vmem:[#allocation18] sm:$0xff] }
 0xff7   :  { %955 = vmatpush.msrb.mxu1 %v3433_v0  ;;  %1124 = vmatpush.msrb.mxu3 %v3433_v0 }
 0xff8   :  { %1290 = vmatpush.msra.mxu0 %v3433_v0 }
 0xff9   :  { %1453 = vmatpush.msra.mxu1 %v3421_v60  ;;  %1619 = vmatpush.msra.mxu3 %v3421_v60 }
 0xffb   :  { %1454 = vmatpush.msra.mxu1 %v3423_v61  ;;  %1620 = vmatpush.msra.mxu3 %v3423_v61 }
 0xffd   :  { %1455 = vmatpush.msra.mxu1 %v3427_v62  ;;  %1621 = vmatpush.msra.mxu3 %v3427_v62 }
 0xfff   :  { %1456 = vmatpush.msra.mxu1 %v3433_v0  ;;  %1622 = vmatpush.msra.mxu3 %v3433_v0 }
0x1068   :  { %v780_v3 = vpop.permute.xlu1 %779 }
0x1069   :  { %v782_v5 = vmul.f32 %v780_v3, %v777_v1 }
0x106b   :  { %v786_v6 = vadd.f32 %v785_v4, %v782_v5 }
0x106d   :  { %v793_v8 = vrot.slane %v786_v6, 6  ;;  %v842_v30 = vrot.slane %v786_v6, 7 }
0x106f   :  { %794 = vrot.lane.b32.xlu2 %v793_v8, %s3074_s10 }
0x10c9   :  { %v795_v9 = vpop.permute.xlu2 %794 }
0x10ca   :  { %2442 = vmatmul.msk.f32.vlgmr.msrb.gmra.mxu0 %vm334_vm5, %v795_v9 }
0x10cb   :  { %1785 = vmatpush.msrb.mxu0 %v3421_v60 }
0x10cd   :  { %1786 = vmatpush.msrb.mxu0 %v3423_v61 }
0x10cf   :  { %1787 = vmatpush.msrb.mxu0 %v3427_v62 }
0x10d1   :  { %1788 = vmatpush.msrb.mxu0 %v3433_v0 }
0x1147   :  { %v815_v10 = vpop.f32.mrf.mxu0 }
0x1148   :  { %v816_v11 = vadd.f32 %v815_v10, %v3288_v37  ;;  %v3469_v10 = vld [vmem:[%s4518_s16] sm:$0x1] }
0x114a   :  { %v819_v12 = vrot.slane %v816_v11, 1 }
0x114c   :  { %826 = vrot.lane.b32.xlu0 %v819_v12, %s3073_s29  ;;  %v821_v13 = vadd.f32 %v819_v12, %v3308_v44 }
0x114e   :  { %v822_v14 = vmul.f32 0.5, %v821_v13 }
0x1150   :  { %2579 = vtanh.f32 %v822_v14 }
0x1154   :  { %493 = vrot.lane.b32.xlu0 %v3323_v17, %s3074_s10 }
0x1156   :  { %v2580_v15 = vpop.eup %2579 }
0x1157   :  { %v824_v16 = vadd.f32 1.0, %v2580_v15 }
0x1159   :  { %v825_v18 = vmul.f32 0.5, %v824_v16 }
0x115b   :  { %v836_v29 = vsub.f32 1.0, %v825_v18  ;;  %v844_v32 = vmul.f32 %v842_v30, %v825_v18 }
0x115c   :  { %670 = vrot.lane.b32.xlu0 %v3361_v22, %s3074_s10 }
0x11be   :  { %v827_v19 = vpop.permute.xlu0 %826 }
0x11bf   :  { %v829_v20 = vmul.f32 %v827_v19, %v825_v18  ;;  %v3484_v18 = vld [vmem:[%s4519_s17] ss:$0 sm:$0xff] }
0x11c1   :  { %831 = vrot.lane.b32.xlu1 %v829_v20, %s3073_s29 }
0x11c6   :  { %v494_v37 = vpop.permute.xlu0 %493 }
0x11c7   :  { %497 = vst.msk [vmem:[#allocation2 + $0x1] sm:$0x2] %vm496_vm6, %v494_v37 }
0x11c9   :  { %552 = vrot.lane.b32.xlu1 %v3335_v39, %s3074_s10  ;;  %v857_v39 = vld [vmem:[#allocation17 + $0x18] sm:$0xff] }
0x11ca   :  { %880 = vmatpush.msrb.mxu2 %v857_v39 }
0x11cc   :  { %881 = vmatpush.msrb.mxu2 %v856_v26 }
0x11ce   :  { %v671_v17 = vpop.permute.xlu0 %670  ;;  %882 = vmatpush.msrb.mxu2 %v855_v27 }
0x11cf   :  { %674 = vst.msk [vmem:[#allocation2 + $0x1] sm:$0x10] %vm673_vm7, %v671_v17 }
0x11d0   :  { %883 = vmatpush.msrb.mxu2 %v854_v28 }
0x11d1   :  { %729 = vrot.lane.b32.xlu1 %v727_v48, %s3074_s10  ;;  %v902_v48 = vld [vmem:[%s4521_s19] sm:$0x1] }
0x11d2   :  { %1951 = vmatpush.msra.mxu2 %v3421_v60 }
0x11d4   :  { %1952 = vmatpush.msra.mxu2 %v3423_v61 }
0x11d6   :  { %1953 = vmatpush.msra.mxu2 %v3427_v62 }
0x11d8   :  { %1954 = vmatpush.msra.mxu2 %v3433_v0 }
0x1233   :  { %v832_v21 = vpop.permute.xlu1 %831 }
0x1234   :  { %v834_v22 = vadd.f32 %v832_v21, %v3308_v44 }
0x1236   :  { %2581 = vtanh.f32 %v834_v22 }
0x123b   :  { %v553_v23 = vpop.permute.xlu1 %552 }
0x123c   :  { %v2582_v24 = vpop.eup %2581  ;;  %556 = vst.msk [vmem:[#allocation2 + $0x1] sm:$0x4] %vm555_vm8, %v553_v23 }
0x123d   :  { %838 = vrot.lane.b32.xlu2 %v2582_v24, %s3074_s10 }
0x1243   :  { %v730_v25 = vpop.permute.xlu1 %729 }
0x1244   :  { %733 = vst.msk [vmem:[#allocation2 + $0x1] sm:$0x20] %vm732_vm9, %v730_v25 }
0x1245   :  { %611 = vrot.lane.b32.xlu2 %v3349_v63, %s3074_s10 }
0x124d   :  { %788 = vrot.lane.b32.xlu2 %v786_v6, %s3074_s10 }
0x1297   :  { %v839_v31 = vpop.permute.xlu2 %838 }
0x1298   :  { %v841_v33 = vmul.f32 %v839_v31, %v836_v29 }
0x129a   :  { %v845_v34 = vadd.f32 %v844_v32, %v841_v33 }
0x129c   :  { %928 = vst [vmem:[#allocation1] sm:$0xff] %v845_v34  ;;  %847 = vrot.lane.b32.xlu0 %v845_v34, %s3074_s10 }
0x129f   :  { %v612_v63 = vpop.permute.xlu2 %611 }
0x12a0   :  { %615 = vst.msk [vmem:[#allocation2 + $0x1] sm:$0x8] %vm614_vm10, %v612_v63  ;;  %vm3075_vm10 = vmmov 1  }
0x12a3   :  { %v930_v2 = vld [vmem:[#allocation1 + $0x7] ss:$9 sm:$0xff] }
0x12a7   :  { %v789_v35 = vpop.permute.xlu2 %788 }
0x12a8   :  { %792 = vst.msk [vmem:[#allocation2 + $0x1] sm:$0x40] %vm791_vm11, %v789_v35 }
0x12af   :  { %v852_v36 = vld [vmem:[#allocation2] sm:$0xff] }
0x12b0   :  { %2443 = vmatmul.msk.f32.vlgmr.msrb.gmra.mxu2 %vm334_vm5, %v852_v36 }
0x130e   :  { %v848_v38 = vpop.permute.xlu0 %847 }
0x130f   :  { %851 = vst.msk [vmem:[#allocation2 + $0x1] sm:$0x80] %vm850_vm12, %v848_v38  ;;  %vm1052_vm12 = vcmask 1048320  }
0x1316   :  { %v853_v40 = vld [vmem:[#allocation2 + $0x8] sm:$0x1] }
0x1317   :  { %2444 = vmatmul.msk.f32.gmra.mxu2 %vm334_vm5, %v853_v40 }
0x1333   :  { %v3402_v42 = vpop.f32.mrf.mxu2 }
0x1334   :  { %v3476_v13 = vadd.f32 %v3407_v45, %v3402_v42 }
0x139a   :  { %v888_v46 = vpop.f32.mrf.mxu2 }
0x139b   :  { %v3410_v47 = vadd.f32 %v3407_v45, %v888_v46  ;;  %v2546_v46 = vld [vmem:[%s4521_s19] ss:$0 sm:$0xff] }
0x139d   :  { %912 = vrot.lane.b32.xlu2 %v3410_v47, %s3072_s18  ;;  %904 = vrot.lane.b32.xlu1 %v3410_v47, %s3074_s10 }
0x13f7   :  { %v913_v55 = vpop.permute.xlu2 %912 }
0x140f   :  { %v905_v49 = vpop.permute.xlu1 %904 }
0x1410   :  { %v907_v50 = vadd.f32 %v905_v49, %v902_v48 }
0x1412   :  { %v908_v51 = vmul.f32 0.5, %v907_v50 }
0x1414   :  { %2583 = vtanh.f32 %v908_v51 }
0x141a   :  { %v2584_v52 = vpop.eup %2583 }
0x141b   :  { %v910_v53 = vadd.f32 1.0, %v2584_v52 }
0x141d   :  { %v911_v54 = vmul.f32 0.5, %v910_v53 }
0x141f   :  { %v915_v56 = vmul.f32 %v913_v55, %v911_v54  ;;  %v922_v1 = vsub.f32 1.0, %v911_v54  ;;  %v932_v4 = vmul.f32 %v930_v2, %v911_v54 }
0x1421   :  { %917 = vrot.lane.b32.xlu0 %v915_v56, %s3073_s29 }
0x1493   :  { %v918_v57 = vpop.permute.xlu0 %917 }
0x1494   :  { %v920_v58 = vadd.f32 %v918_v57, %v902_v48  ;;  %v897_v48 = vlaneseq }
0x1496   :  { %2585 = vtanh.f32 %v920_v58  ;;  %v3499_v49 = vshrl.u32 %v897_v48, 7 }
0x1498   :  { %v3502_v50 = vadd.s32 8, %v3499_v49 }
0x149c   :  { %v2586_v59 = vpop.eup %2585 }
0x149d   :  { %924 = vrot.lane.b32.xlu1 %v2586_v59, %s3074_s10 }
0x150f   :  { %v925_v3 = vpop.permute.xlu1 %924 }
0x1510   :  { %v927_v5 = vmul.f32 %v925_v3, %v922_v1 }
0x1512   :  { %v933_v6 = vadd.f32 %v932_v4, %v927_v5 }
0x1514   :  { %v935_v8 = vperm.slane %v933_v6, 0 }
0x1516   :  { %936 = vrot.lane.b32.xlu2 %v935_v8, %s3074_s10 }
0x1570   :  { %v3458_v9 = vpop.permute.xlu2 %936 }
0x1571   :  { %2445 = vmatmul.msk.f32.vlgmr.msrb.gmra.mxu1 %vm334_vm5, %v3458_v9 }
0x1572   :  { %2117 = vmatpush.msrb.mxu1 %v3421_v60 }
0x1574   :  { %2118 = vmatpush.msrb.mxu1 %v3423_v61 }
0x1576   :  { %2119 = vmatpush.msrb.mxu1 %v3427_v62 }
0x1578   :  { %2120 = vmatpush.msrb.mxu1 %v3433_v0 }
0x15ee   :  { %v957_v11 = vpop.f32.mrf.mxu1 }
0x15ef   :  { %v3472_v12 = vadd.f32 %v957_v11, %v3469_v10 }
0x15f1   :  { %v960_v14 = vperm.slane %v3472_v12, 0 }
0x15f3   :  { %v962_v15 = vadd.f32 %v960_v14, %v3410_v47  ;;  %v961_v16 = vadd.f32 %v960_v14, %v3476_v13  ;;  %v3507_v14 = vand.u32 127, %v897_v48 }
0x15f5   :  { %2587 = vtanh.f32 %v962_v15  ;;  %v331_v15 = vperm.slane %v3305_v41, 1  ;;  %vm1043_vm8 = vcmp.eq.s32.totalorder %v3507_v14, 0 }
0x15f6   :  { %2589 = vtanh.f32 %v961_v16 }
0x15fb   :  { %v2588_v19 = vpop.eup %2587 }
0x15fc   :  { %v2590_v20 = vpop.eup %2589  ;;  %v969_v37 = vmul.f32 %v2588_v19, %v3484_v18 }
0x15fd   :  { %v968_v17 = vmul.f32 %v2590_v20, %v3484_v18  ;;  %v3520_v20 = vadd.f32 %v3340_v43, %v331_v15 }
0x15fe   :  { %v973_v21 = vsel %vm384_vm3, %v969_v37, 0.0 }
0x15ff   :  { %974 = vadd.xlane.f32.xlu0 %v973_v21  ;;  %v970_v22 = vsel %vm334_vm5, %v968_v17, 0.0 }
0x1600   :  { %971 = vadd.xlane.f32.xlu1 %v970_v22 }
0x1613   :  { %1077 = vrot.lane.b32.xlu0 %v3472_v12, %s3073_s29 }
0x1672   :  { %v975_v23 = vpop.xlane.xlu0 %974 }
0x1673   :  { %v980_v24 = vsel %vm979_vm13, %v975_v23, -inf  ;;  %v972_v25 = vpop.xlane.xlu1 %971 }
0x1674   :  { %v981_v39 = vmax.f32 %v972_v25, %v980_v24 }
0x1676   :  { %v982_v26 = vrot.slane %v981_v39, 4 }
0x1678   :  { %v983_v27 = vmax.f32 %v981_v39, %v982_v26 }
0x167a   :  { %v984_v28 = vrot.slane %v983_v27, 2 }
0x167c   :  { %v985_v29 = vmax.f32 %v983_v27, %v984_v28 }
0x167e   :  { %v986_v30 = vrot.slane %v985_v29, 1 }
0x1680   :  { %v987_v31 = vmax.f32 %v985_v29, %v986_v30 }
0x1682   :  { %2464 = vpush %v987_v31 }
0x16b3   :  { %s2465_s30 = spop %2464 }
0x16b4   :  { %v989_v32 = vstv %s2465_s30 }
0x16b5   :  { %v990_v33 = vsub.f32 %v972_v25, %v989_v32  ;;  %v991_v34 = vsub.f32 %v975_v23, %v989_v32  ;;  %vm1015_vm0 = vcmp.eq.f32.partialorder %v975_v23, %v989_v32  ;;  %vm1014_vm1 = vcmp.eq.f32.partialorder %v972_v25, %v989_v32 }
0x16b6   :  { %v1017_v51 = vsel %vm1015_vm0, %v3502_v50, 9  ;;  %v1016_v52 = vsel %vm1014_vm1, %v3499_v49, 9  ;;  %vm1060_vm0 = vcmask 523264  }
0x16b7   :  { %v992_v63 = vmul.f32 1.442695, %v990_v33  ;;  %v994_v35 = vmul.f32 1.442695, %v991_v34  ;;  %v1018_v53 = vsel %vm979_vm13, %v1017_v51, 2147483647 }
0x16b8   :  { %vm1019_vm2 = vcmp.lt.s32.totalorder %v1016_v52, %v1018_v53 }
0x16b9   :  { %2591 = vpow2.f32 %v992_v63  ;;  %v1020_v54 = vsel %vm1019_vm2, %v1016_v52, %v1018_v53 }
0x16ba   :  { %2593 = vpow2.f32 %v994_v35  ;;  %v1021_v55 = vrot.slane %v1020_v54, 4 }
0x16bc   :  { %vm1022_vm4 = vcmp.lt.s32.totalorder %v1020_v54, %v1021_v55 }
0x16bd   :  { %v1023_v56 = vsel %vm1022_vm4, %v1020_v54, %v1021_v55 }
0x16be   :  { %v1024_v57 = vrot.slane %v1023_v56, 2 }
0x16bf   :  { %v2592_v36 = vpop.eup %2591 }
0x16c0   :  { %v2594_v38 = vpop.eup %2593  ;;  %v997_v40 = vsel %vm4525_vm14, %v2592_v36, 0.0  ;;  %vm1025_vm6 = vcmp.lt.s32.totalorder %v1023_v56, %v1024_v57 }
0x16c1   :  { %v999_v42 = vsel %vm998_vm15, %v2594_v38, 0.0  ;;  %v1026_v2 = vsel %vm1025_vm6, %v1023_v56, %v1024_v57  ;;  %v1078_v38 = vpop.permute.xlu0 %1077 }
0x16c2   :  { %v1000_v45 = vadd.f32 %v999_v42, %v997_v40  ;;  %v1027_v4 = vrot.slane %v1026_v2, 1 }
0x16c4   :  { %1001 = vadd.xlane.f32.xlu2 %v1000_v45  ;;  %vm1028_vm7 = vcmp.lt.s32.totalorder %v1026_v2, %v1027_v4 }
0x16c5   :  { %v1029_v11 = vsel %vm1028_vm7, %v1026_v2, %v1027_v4 }
0x16dc   :  { %1070 = vrot.lane.b32.xlu2 %v2546_v46, %s3074_s10 }
0x1737   :  { %v1002_v58 = vpop.xlane.xlu2 %1001 }
0x1738   :  { %v1003_v59 = vrot.slane %v1002_v58, 4 }
0x173a   :  { %v1004_v1 = vadd.f32 %v1003_v59, %v1002_v58 }
0x173c   :  { %v1005_v3 = vrot.slane %v1004_v1, 2 }
0x173e   :  { %v1006_v5 = vadd.f32 %v1005_v3, %v1004_v1 }
0x173f   :  { %v1071_v63 = vpop.permute.xlu2 %1070 }
0x1740   :  { %v1007_v6 = vrot.slane %v1006_v5, 1 }
0x1742   :  { %v1008_v8 = vadd.f32 %v1007_v6, %v1006_v5 }
0x1744   :  { %2466 = vpush %v1008_v8 }
0x1745   :  { %2468 = vpush %v1029_v11 }
0x1775   :  { %s3510_s19 = spop %2466 }
0x1776   :  { %s2469_s15 = spop %2468 }
0x1777   :  { %v3512_v16 = vstv %s2469_s15 }
0x1778   :  { %vm1032_vm9 = vcmp.eq.s32.totalorder %v3512_v16, 0  ;;  %v3517_v19 = vadd.s32 4294967295, %v3512_v16  ;;  %vm1036_vm1 = vcmp.eq.s32.totalorder %v3502_v50, %v3512_v16  ;;  %vm1035_vm6 = vcmp.eq.s32.totalorder %v3499_v49, %v3512_v16 }
0x1779   :  { %vm3525_vm11 = vmxor %vm1032_vm9, %vm3075_vm10 }
0x177a   :  { %vm3533_vm2 = vmand %vm3525_vm11, %vm1043_vm8  ;;  %vm1047_vm4 = vcmp.eq.s32.totalorder %v3499_v49, %v3517_v19 }
0x177b   :  { %v1046_v43 = vsel %vm3533_vm2, %v3517_v19, 4294967295  ;;  %v1050_v17 = vsel %vm1047_vm4, %v3308_v44, 0.0  ;;  %v1051_v21 = vsel %vm1047_vm4, %v3520_v20, 0.0  ;;  %vm3550_vm7 = vmand %vm3525_vm11, %vm1036_vm1 }
0x177c   :  { %v1053_v22 = vsel %vm1052_vm12, %v1050_v17, 0.0  ;;  %v1061_v23 = vsel %vm1060_vm0, %v1051_v21, 0.0  ;;  %vm3556_vm8 = vmand %vm3525_vm11, %vm1035_vm6 }
0x177d   :  { %v1054_v25 = vrot.slane %v1053_v22, 4  ;;  %v1062_v39 = vrot.slane %v1061_v23, 4  ;;  %vm3592_vm1 = vmneg %vm1032_vm9 }
0x177f   :  { %v1055_v27 = vadd.f32 %v1054_v25, %v1053_v22  ;;  %v1063_v28 = vadd.f32 %v1062_v39, %v1061_v23 }
0x1781   :  { %v1056_v29 = vrot.slane %v1055_v27, 2  ;;  %v1064_v30 = vrot.slane %v1063_v28, 2 }
0x1783   :  { %v1057_v31 = vadd.f32 %v1056_v29, %v1055_v27  ;;  %v1065_v32 = vadd.f32 %v1064_v30, %v1063_v28  ;;  %v3076_v28 = vmov 0.0  }
0x1784   :  { %v3605_v29 = vsel %vm3556_vm8, 1.0, %v3076_v28  ;;  %v3609_v30 = vsel %vm3550_vm7, 1.0, %v3076_v28 }
0x1785   :  { %v1058_v33 = vrot.slane %v1057_v31, 1  ;;  %v1066_v34 = vrot.slane %v1065_v32, 1  ;;  %vm1142_vm4 = vcmp.gt.f32.partialorder %v3605_v29, 0.0  ;;  %vm1143_vm6 = vcmp.gt.f32.partialorder %v3609_v30, 0.0 }
0x1787   :  { %v1059_v35 = vadd.f32 %v1058_v33, %v1057_v31  ;;  %v1067_v36 = vadd.f32 %v1066_v34, %v1065_v32 }
0x1789   :  { %v3562_v40 = vsel %vm3525_vm11, %v1059_v35, %v1071_v63  ;;  %v3566_v42 = vsel %vm3525_vm11, %v1067_v36, %v1071_v63 }
0x178a   :  { %v1080_v45 = vadd.f32 %v1078_v38, %v3562_v40  ;;  %v1081_v57 = vadd.f32 %v1078_v38, %v3566_v42 }
0x178c   :  { %v1082_v46 = vmul.f32 0.5, %v1080_v45  ;;  %v1083_v58 = vmul.f32 0.5, %v1081_v57 }
0x178e   :  { %2595 = vtanh.f32 %v1082_v46 }
0x1794   :  { %v2596_v48 = vpop.eup %2595 }
0x1795   :  { %v1086_v51 = vadd.f32 1.0, %v2596_v48 }
0x1797   :  { %v1088_v52 = vmul.f32 0.5, %v1086_v51 }
0x1799   :  { %v1090_v53 = vmul.f32 %v1088_v52, %v3472_v12 }
0x179b   :  { %1092 = vrot.lane.b32.xlu1 %v1090_v53, %s3073_s29 }
0x180d   :  { %v1093_v54 = vpop.permute.xlu1 %1092 }
0x180e   :  { %v1095_v55 = vadd.f32 %v1093_v54, %v3566_v42 }
0x1810   :  { %2597 = vtanh.f32 %v1095_v55 }
0x1811   :  { %2599 = vtanh.f32 %v1083_v58 }
0x1816   :  { %v2598_v56 = vpop.eup %2597 }
0x1817   :  { %1099 = vrot.lane.b32.xlu0 %v2598_v56, %s3074_s10  ;;  %v2600_v59 = vpop.eup %2599 }
0x1818   :  { %v1087_v1 = vadd.f32 1.0, %v2600_v59 }
0x181a   :  { %v1089_v2 = vmul.f32 0.5, %v1087_v1 }
0x181c   :  { %v1097_v3 = vsub.f32 1.0, %v1089_v2  ;;  %v1104_v5 = vmul.f32 %v1089_v2, %v3458_v9 }
0x1889   :  { %v1100_v4 = vpop.permute.xlu0 %1099 }
0x188a   :  { %v1102_v6 = vmul.f32 %v1100_v4, %v1097_v3 }
0x188c   :  { %v3575_v8 = vadd.f32 %v1104_v5, %v1102_v6 }
0x188e   :  { %2447 = vmatmul.msk.f32.vlgmr.msrb.gmra.mxu3 %vm334_vm5, %v3575_v8 }
0x188f   :  { %2283 = vmatpush.msrb.mxu3 %v3421_v60 }
0x1891   :  { %2284 = vmatpush.msrb.mxu3 %v3423_v61 }
0x1893   :  { %2285 = vmatpush.msrb.mxu3 %v3427_v62 }
0x1895   :  { %2286 = vmatpush.msrb.mxu3 %v3433_v0 }
0x1911   :  { %v1126_v11 = vpop.f32.mrf.mxu3 }
0x1912   :  { %v1127_v15 = vadd.f32 %v1126_v11, %v3469_v10 }
0x1914   :  { %v1129_v17 = vperm.slane %v1127_v15, 0  ;;  %v3599_v27 = vsel %vm3592_vm1, %v1127_v15, %v3472_v12 }
0x1916   :  { %v1130_v21 = vadd.f32 %v1129_v17, %v3476_v13  ;;  %v1131_v22 = vadd.f32 %v1129_v17, %v3410_v47 }
0x1918   :  { %2601 = vtanh.f32 %v1130_v21 }
0x1919   :  { %2603 = vtanh.f32 %v1131_v22 }
0x191e   :  { %v2602_v23 = vpop.eup %2601 }
0x191f   :  { %v2604_v25 = vpop.eup %2603  ;;  %v1134_v60 = vmul.f32 %v2602_v23, %v3484_v18 }
0x1920   :  { %v1135_v61 = vmul.f32 %v2604_v25, %v3484_v18 }
0x1921   :  { %v1136_v62 = vsel %vm334_vm5, %v1134_v60, 0.0 }
0x1922   :  { %v1139_v0 = vsel %vm384_vm3, %v1135_v61, 0.0  ;;  %1137 = vadd.xlane.f32.xlu1 %v1136_v62 }
0x1923   :  { %1140 = vadd.xlane.f32.xlu2 %v1139_v0  ;;  %v1010_v0 = vstv %s3510_s19 }
0x193b   :  { %1244 = vrot.lane.b32.xlu2 %v3599_v27, %s3073_s29 }
0x1995   :  { %v1138_v31 = vpop.xlane.xlu1 %1137 }
0x1996   :  { %v1141_v32 = vpop.xlane.xlu2 %1140  ;;  %v1144_v12 = vsel %vm1142_vm4, -1e+30, %v1138_v31  ;;  %v1037_v31 = vsel %vm3525_vm11, 1, %v3071_v7 }
0x1997   :  { %v1145_v33 = vsel %vm1143_vm6, -1e+30, %v1141_v32  ;;  %vm1210_vm11 = vcmp.eq.s32.totalorder %v3507_v14, %v1037_v31 }
0x1998   :  { %v1146_v34 = vsel %vm979_vm13, %v1145_v33, -inf }
0x1999   :  { %v1147_v63 = vmax.f32 %v1144_v12, %v1146_v34  ;;  %v1214_v34 = vadd.s32 1, %v1037_v31 }
0x199b   :  { %v1148_v35 = vrot.slane %v1147_v63, 4 }
0x199d   :  { %v1149_v36 = vmax.f32 %v1147_v63, %v1148_v35  ;;  %v1075_v63 = vsel %vm1032_vm9, 1, %v3071_v7 }
0x199f   :  { %v1150_v26 = vrot.slane %v1149_v36, 2 }
0x19a1   :  { %v1151_v38 = vmax.f32 %v1149_v36, %v1150_v26 }
0x19a3   :  { %v1152_v45 = vrot.slane %v1151_v38, 1 }
0x19a5   :  { %v1153_v46 = vmax.f32 %v1151_v38, %v1152_v45 }
0x19a7   :  { %2470 = vpush %v1153_v46 }
0x19d8   :  { %s2471_s26 = spop %2470 }
0x19d9   :  { %v1155_v24 = vstv %s2471_s26 }
0x19da   :  { %v1156_v48 = vsub.f32 %v1144_v12, %v1155_v24  ;;  %v1157_v51 = vsub.f32 %v1145_v33, %v1155_v24  ;;  %vm1179_vm7 = vcmp.eq.f32.partialorder %v1145_v33, %v1155_v24  ;;  %vm1178_vm8 = vcmp.eq.f32.partialorder %v1144_v12, %v1155_v24 }
0x19db   :  { %v1181_v59 = vsel %vm1179_vm7, %v3502_v50, 9  ;;  %v1180_v1 = vsel %vm1178_vm8, %v3499_v49, 9 }
0x19dc   :  { %v1158_v52 = vmul.f32 1.442695, %v1156_v48  ;;  %v1160_v53 = vmul.f32 1.442695, %v1157_v51  ;;  %v1182_v2 = vsel %vm979_vm13, %v1181_v59, 2147483647 }
0x19dd   :  { %vm1183_vm4 = vcmp.lt.s32.totalorder %v1180_v1, %v1182_v2 }
0x19de   :  { %2605 = vpow2.f32 %v1158_v52  ;;  %v1184_v3 = vsel %vm1183_vm4, %v1180_v1, %v1182_v2 }
0x19df   :  { %2607 = vpow2.f32 %v1160_v53  ;;  %v1185_v4 = vrot.slane %v1184_v3, 4 }
0x19e0   :  { %2609 = vlog2.f32 %v1010_v0 }
0x19e1   :  { %vm1186_vm6 = vcmp.lt.s32.totalorder %v1184_v3, %v1185_v4 }
0x19e2   :  { %v1187_v5 = vsel %vm1186_vm6, %v1184_v3, %v1185_v4 }
0x19e3   :  { %v1188_v6 = vrot.slane %v1187_v5, 2 }
0x19e4   :  { %v2606_v54 = vpop.eup %2605 }
0x19e5   :  { %v2608_v55 = vpop.eup %2607  ;;  %v1162_v56 = vsel %vm4525_vm14, %v2606_v54, 0.0  ;;  %vm1189_vm14 = vcmp.lt.s32.totalorder %v1187_v5, %v1188_v6 }
0x19e6   :  { %v1163_v57 = vsel %vm998_vm15, %v2608_v55, 0.0  ;;  %v1190_v21 = vsel %vm1189_vm14, %v1187_v5, %v1188_v6  ;;  %v2610_v12 = vpop.eup %2609 }
0x19e7   :  { %v1164_v58 = vadd.f32 %v1163_v57, %v1162_v56  ;;  %v1191_v23 = vrot.slane %v1190_v21, 1  ;;  %v1012_v41 = vmul.f32 0.6931472, %v2610_v12 }
0x19e9   :  { %1165 = vadd.xlane.f32.xlu0 %v1164_v58  ;;  %vm1192_vm7 = vcmp.lt.s32.totalorder %v1190_v21, %v1191_v23  ;;  %v1013_v54 = vsub.f32 0.0, %v1012_v41 }
0x19ea   :  { %v1193_v62 = vsel %vm1192_vm7, %v1190_v21, %v1191_v23 }
0x1a5c   :  { %v1166_v11 = vpop.xlane.xlu0 %1165 }
0x1a5d   :  { %v1167_v15 = vrot.slane %v1166_v11, 4 }
0x1a5f   :  { %v1168_v17 = vadd.f32 %v1167_v15, %v1166_v11  ;;  %v1245_v11 = vpop.permute.xlu2 %1244 }
0x1a61   :  { %v1169_v22 = vrot.slane %v1168_v17, 2 }
0x1a63   :  { %v1170_v25 = vadd.f32 %v1169_v22, %v1168_v17 }
0x1a65   :  { %v1171_v60 = vrot.slane %v1170_v25, 1 }
0x1a67   :  { %v1172_v61 = vadd.f32 %v1171_v60, %v1170_v25 }
0x1a69   :  { %2472 = vpush %v1172_v61 }
0x1a6a   :  { %2474 = vpush %v1193_v62 }
0x1a9a   :  { %s2473_s2 = spop %2472 }
0x1a9b   :  { %v1174_v28 = vstv %s2473_s2  ;;  %s2475_s0 = spop %2474 }
0x1a9c   :  { %2611 = vlog2.f32 %v1174_v28  ;;  %v1195_v32 = vstv %s2475_s0  ;;  %s3077_s0 = smov [#allocation21]  }
0x1a9d   :  { %vm1197_vm14 = vcmp.eq.s32.totalorder %v1195_v32, 0  ;;  %v2449_v33 = vadd.s32 4294967295, %v1195_v32 }
0x1a9e   :  { %vm1198_vm8 = vmxor %vm1197_vm14, %vm3075_vm10 }
0x1a9f   :  { %vm3630_vm4 = vmand %vm3592_vm1, %vm1198_vm8  ;;  %vm1216_vm6 = vcmp.eq.s32.totalorder %v3499_v49, %v2449_v33  ;;  %vm1203_vm8 = vcmp.eq.s32.totalorder %v3502_v50, %v1195_v32 }
0x1aa0   :  { %vm1211_vm7 = vmand %vm3630_vm4, %vm1210_vm11  ;;  %v1219_v36 = vsel %vm1216_vm6, %v3308_v44, 0.0  ;;  %v1220_v26 = vsel %vm1216_vm6, %v3520_v20, 0.0  ;;  %v3642_v7 = vsel %vm3630_vm4, %v1214_v34, %v1037_v31  ;;  %vm1202_vm11 = vcmp.eq.s32.totalorder %v3499_v49, %v1195_v32 }
0x1aa1   :  { %v3648_v16 = vsel %vm1211_vm7, %v2449_v33, %v1046_v43  ;;  %v1221_v38 = vsel %vm1052_vm12, %v1219_v36, 0.0  ;;  %v1228_v45 = vsel %vm1060_vm0, %v1220_v26, 0.0  ;;  %vm1241_vm9 = vmand %vm3592_vm1, %vm1197_vm14  ;;  %v3695_v34 = vsel %vm3592_vm1, %v3575_v8, %v3458_v9 }
0x1aa2   :  { %v2612_v46 = vpop.eup %2611  ;;  %v1222_v24 = vrot.slane %v1221_v38, 4  ;;  %v1229_v48 = vrot.slane %v1228_v45, 4  ;;  %v3656_v51 = vsel %vm1241_vm9, 1, %v1075_v63  ;;  %vm3660_vm2 = vmand %vm3630_vm4, %vm1203_vm8  ;;  %vm4558_vm7 = vcmask 7168  }
0x1aa3   :  { %v1176_v37 = vmul.f32 0.6931472, %v2612_v46  ;;  %vm3667_vm6 = vmand %vm3630_vm4, %vm1202_vm11 }
0x1aa4   :  { %v1223_v52 = vadd.f32 %v1222_v24, %v1221_v38  ;;  %v1230_v53 = vadd.f32 %v1229_v48, %v1228_v45 }
0x1aa5   :  { %v1177_v55 = vsub.f32 0.0, %v1176_v37 }
0x1aa6   :  { %v1224_v56 = vrot.slane %v1223_v52, 2  ;;  %v1231_v57 = vrot.slane %v1230_v53, 2 }
0x1aa7   :  { %v1200_v58 = vadd.f32 %v1177_v55, %v1013_v54  ;;  %v3725_v55 = vsel %vm3660_vm2, 1.0, %v3609_v30 }
0x1aa8   :  { %v1225_v59 = vadd.f32 %v1224_v56, %v1223_v52  ;;  %v1232_v1 = vadd.f32 %v1231_v57, %v1230_v53 }
0x1aa9   :  { %v3673_v2 = vsel %vm3592_vm1, %v1200_v58, %v1013_v54  ;;  %vm1362_vm1 = vcmp.eq.s32.totalorder %v3656_v51, 0  ;;  %v3720_v54 = vsel %vm3667_vm6, 1.0, %v3605_v29 }
0x1aaa   :  { %v1226_v3 = vrot.slane %v1225_v59, 1  ;;  %v1233_v4 = vrot.slane %v1232_v1, 1  ;;  %vm1308_vm14 = vcmp.gt.f32.partialorder %v3720_v54, 0.0 }
0x1aac   :  { %v1227_v5 = vadd.f32 %v1226_v3, %v1225_v59  ;;  %v1234_v6 = vadd.f32 %v1233_v4, %v1232_v1 }
0x1aae   :  { %v3678_v15 = vsel %vm3630_vm4, %v1227_v5, %v3562_v40  ;;  %v3683_v17 = vsel %vm3630_vm4, %v1234_v6, %v3566_v42  ;;  %vm1309_vm4 = vcmp.gt.f32.partialorder %v3725_v55, 0.0 }
0x1aaf   :  { %v1247_v21 = vadd.f32 %v1245_v11, %v3678_v15  ;;  %v1248_v42 = vadd.f32 %v1245_v11, %v3683_v17 }
0x1ab1   :  { %v1249_v22 = vmul.f32 0.5, %v1247_v21  ;;  %v1250_v28 = vmul.f32 0.5, %v1248_v42 }
0x1ab3   :  { %2613 = vtanh.f32 %v1249_v22 }
0x1ab9   :  { %v2614_v23 = vpop.eup %2613 }
0x1aba   :  { %v1253_v25 = vadd.f32 1.0, %v2614_v23 }
0x1abc   :  { %v1255_v60 = vmul.f32 0.5, %v1253_v25 }
0x1abe   :  { %v1257_v61 = vmul.f32 %v1255_v60, %v3599_v27 }
0x1ac0   :  { %1259 = vrot.lane.b32.xlu1 %v1257_v61, %s3073_s29 }
0x1b32   :  { %v1260_v62 = vpop.permute.xlu1 %1259 }
0x1b33   :  { %v1262_v40 = vadd.f32 %v1260_v62, %v3683_v17 }
0x1b35   :  { %2615 = vtanh.f32 %v1262_v40 }
0x1b36   :  { %2617 = vtanh.f32 %v1250_v28 }
0x1b3b   :  { %v2616_v0 = vpop.eup %2615 }
0x1b3c   :  { %1266 = vrot.lane.b32.xlu0 %v2616_v0, %s3074_s10  ;;  %v2618_v31 = vpop.eup %2617 }
0x1b3d   :  { %v1254_v32 = vadd.f32 1.0, %v2618_v31 }
0x1b3f   :  { %v1256_v12 = vmul.f32 0.5, %v1254_v32 }
0x1b41   :  { %v1264_v33 = vsub.f32 1.0, %v1256_v12  ;;  %v1270_v35 = vmul.f32 %v1256_v12, %v3695_v34 }
0x1bae   :  { %v1267_v63 = vpop.permute.xlu0 %1266 }
0x1baf   :  { %v1269_v41 = vmul.f32 %v1267_v63, %v1264_v33 }
0x1bb1   :  { %v3698_v36 = vadd.f32 %v1270_v35, %v1269_v41 }
0x1bb3   :  { %2450 = vmatmul.msk.f32.vlgmr.msra.gmra.mxu0 %vm334_vm5, %v3698_v36 }
0x1c30   :  { %v1292_v26 = vpop.f32.mrf.mxu0 }
0x1c31   :  { %v1293_v38 = vadd.f32 %v1292_v26, %v3469_v10 }
0x1c33   :  { %v1295_v45 = vperm.slane %v1293_v38, 0  ;;  %v3713_v53 = vsel %vm1362_vm1, %v1293_v38, %v3599_v27 }
0x1c35   :  { %v1296_v46 = vadd.f32 %v1295_v45, %v3476_v13  ;;  %v1297_v24 = vadd.f32 %v1295_v45, %v3410_v47 }
0x1c37   :  { %2619 = vtanh.f32 %v1296_v46 }
0x1c38   :  { %2621 = vtanh.f32 %v1297_v24 }
0x1c3d   :  { %v2620_v9 = vpop.eup %2619 }
0x1c3e   :  { %v2622_v8 = vpop.eup %2621  ;;  %v1300_v39 = vmul.f32 %v2620_v9, %v3484_v18 }
0x1c3f   :  { %v1301_v48 = vmul.f32 %v2622_v8, %v3484_v18 }
0x1c40   :  { %v1302_v37 = vsel %vm334_vm5, %v1300_v39, 0.0 }
0x1c41   :  { %v1305_v52 = vsel %vm384_vm3, %v1301_v48, 0.0  ;;  %1303 = vadd.xlane.f32.xlu0 %v1302_v37  ;;  %v1380_v37 = vadd.s32 1, %v3642_v7 }
0x1c42   :  { %1306 = vadd.xlane.f32.xlu2 %v1305_v52 }
0x1c5a   :  { %1410 = vrot.lane.b32.xlu2 %v3713_v53, %s3073_s29 }
0x1cb4   :  { %v1304_v56 = vpop.xlane.xlu0 %1303 }
0x1cb5   :  { %v1307_v57 = vpop.xlane.xlu2 %1306  ;;  %v1310_v27 = vsel %vm1308_vm14, -1e+30, %v1304_v56 }
0x1cb6   :  { %v1311_v58 = vsel %vm1309_vm4, -1e+30, %v1307_v57 }
0x1cb7   :  { %v1312_v59 = vsel %vm979_vm13, %v1311_v58, -inf }
0x1cb8   :  { %v1313_v1 = vmax.f32 %v1310_v27, %v1312_v59 }
0x1cba   :  { %v1314_v3 = vrot.slane %v1313_v1, 4 }
0x1cbc   :  { %v1315_v43 = vmax.f32 %v1313_v1, %v1314_v3 }
0x1cbe   :  { %v1316_v29 = vrot.slane %v1315_v43, 2 }
0x1cc0   :  { %v1317_v4 = vmax.f32 %v1315_v43, %v1316_v29 }
0x1cc2   :  { %v1318_v5 = vrot.slane %v1317_v4, 1 }
0x1cc4   :  { %v1319_v6 = vmax.f32 %v1317_v4, %v1318_v5 }
0x1cc6   :  { %2476 = vpush %v1319_v6 }
0x1cf7   :  { %s2477_s5 = spop %2476 }
0x1cf8   :  { %v1321_v30 = vstv %s2477_s5  ;;  %s2392_s5 = sshll.u32 %s3077_s0, 4  ;;  %s2393_s5 = int_to_ptr.vmem [resolvable:$true] %s2392_s5 }
0x1cf9   :  { %v1322_v19 = vsub.f32 %v1310_v27, %v1321_v30  ;;  %v1323_v11 = vsub.f32 %v1311_v58, %v1321_v30  ;;  %vm1345_vm9 = vcmp.eq.f32.partialorder %v1311_v58, %v1321_v30  ;;  %vm1344_vm8 = vcmp.eq.f32.partialorder %v1310_v27, %v1321_v30 }
0x1cfa   :  { %v1347_v40 = vsel %vm1345_vm9, %v3502_v50, 9  ;;  %v1346_v0 = vsel %vm1344_vm8, %v3499_v49, 9  ;;  %vm1376_vm8 = vcmp.eq.s32.totalorder %v3507_v14, %v3642_v7 }
0x1cfb   :  { %v1324_v21 = vmul.f32 1.442695, %v1322_v19  ;;  %v1326_v22 = vmul.f32 1.442695, %v1323_v11  ;;  %v1348_v42 = vsel %vm979_vm13, %v1347_v40, 2147483647 }
0x1cfc   :  { %vm1349_vm2 = vcmp.lt.s32.totalorder %v1346_v0, %v1348_v42 }
0x1cfd   :  { %2623 = vpow2.f32 %v1324_v21  ;;  %v1350_v28 = vsel %vm1349_vm2, %v1346_v0, %v1348_v42 }
0x1cfe   :  { %2625 = vpow2.f32 %v1326_v22  ;;  %v1351_v31 = vrot.slane %v1350_v28, 4 }
0x1d00   :  { %vm1352_vm11 = vcmp.lt.s32.totalorder %v1350_v28, %v1351_v31 }
0x1d01   :  { %v1353_v32 = vsel %vm1352_vm11, %v1350_v28, %v1351_v31  ;;  %v1411_v28 = vpop.permute.xlu2 %1410 }
0x1d02   :  { %v1354_v12 = vrot.slane %v1353_v32, 2 }
0x1d03   :  { %v2624_v23 = vpop.eup %2623 }
0x1d04   :  { %v2626_v25 = vpop.eup %2625  ;;  %v1328_v60 = vsel %vm4558_vm7, %v2624_v23, 0.0  ;;  %vm1355_vm6 = vcmp.lt.s32.totalorder %v1353_v32, %v1354_v12 }
0x1d05   :  { %v1329_v61 = vsel %vm998_vm15, %v2626_v25, 0.0  ;;  %v1356_v41 = vsel %vm1355_vm6, %v1353_v32, %v1354_v12 }
0x1d06   :  { %v1330_v62 = vadd.f32 %v1329_v61, %v1328_v60  ;;  %v1357_v38 = vrot.slane %v1356_v41, 1 }
0x1d08   :  { %1331 = vadd.xlane.f32.xlu1 %v1330_v62  ;;  %vm1358_vm14 = vcmp.lt.s32.totalorder %v1356_v41, %v1357_v38 }
0x1d09   :  { %v1359_v9 = vsel %vm1358_vm14, %v1356_v41, %v1357_v38 }
0x1d7b   :  { %v1332_v33 = vpop.xlane.xlu1 %1331 }
0x1d7c   :  { %v1333_v63 = vrot.slane %v1332_v33, 4 }
0x1d7e   :  { %v1334_v35 = vadd.f32 %v1333_v63, %v1332_v33 }
0x1d80   :  { %v1335_v26 = vrot.slane %v1334_v35, 2 }
0x1d82   :  { %v1336_v45 = vadd.f32 %v1335_v26, %v1334_v35 }
0x1d84   :  { %v1337_v46 = vrot.slane %v1336_v45, 1 }
0x1d86   :  { %v1338_v24 = vadd.f32 %v1337_v46, %v1336_v45 }
0x1d88   :  { %2478 = vpush %v1338_v24 }
0x1d89   :  { %2480 = vpush %v1359_v9 }
0x1db9   :  { %s2479_s6 = spop %2478 }
0x1dba   :  { %v1340_v8 = vstv %s2479_s6  ;;  %s2481_s7 = spop %2480 }
0x1dbb   :  { %2627 = vlog2.f32 %v1340_v8  ;;  %v3735_v39 = vstv %s2481_s7 }
0x1dbc   :  { %vm1363_vm4 = vcmp.eq.s32.totalorder %v3735_v39, 0  ;;  %v3739_v48 = vadd.s32 4294967295, %v3735_v39  ;;  %vm1369_vm6 = vcmp.eq.s32.totalorder %v3502_v50, %v3735_v39 }
0x1dbd   :  { %vm1364_vm7 = vmxor %vm1363_vm4, %vm3075_vm10 }
0x1dbe   :  { %vm3747_vm9 = vmand %vm1362_vm1, %vm1364_vm7  ;;  %vm1382_vm2 = vcmp.eq.s32.totalorder %v3499_v49, %v3739_v48  ;;  %vm1368_vm7 = vcmp.eq.s32.totalorder %v3499_v49, %v3735_v39 }
0x1dbf   :  { %vm3757_vm11 = vmand %vm3747_vm9, %vm1376_vm8  ;;  %v1385_v57 = vsel %vm1382_vm2, %v3308_v44, 0.0  ;;  %v1386_v27 = vsel %vm1382_vm2, %v3520_v20, 0.0  ;;  %v3766_v58 = vsel %vm3747_vm9, %v1380_v37, %v3642_v7  ;;  %v3816_v37 = vsel %vm1362_vm1, %v3698_v36, %v3695_v34 }
0x1dc0   :  { %v1379_v59 = vsel %vm3757_vm11, %v3739_v48, %v3648_v16  ;;  %v1387_v1 = vsel %vm1052_vm12, %v1385_v57, 0.0  ;;  %v1394_v3 = vsel %vm1060_vm0, %v1386_v27, 0.0  ;;  %vm3778_vm14 = vmand %vm3747_vm9, %vm1369_vm6  ;;  %vm4567_vm6 = vcmask 7168  }
0x1dc1   :  { %v2628_v43 = vpop.eup %2627  ;;  %v1388_v29 = vrot.slane %v1387_v1, 4  ;;  %v1395_v4 = vrot.slane %v1394_v3, 4  ;;  %vm3786_vm8 = vmand %vm3747_vm9, %vm1368_vm7 }
0x1dc2   :  { %v1342_v5 = vmul.f32 0.6931472, %v2628_v43  ;;  %v3848_v39 = vsel %vm3786_vm8, 1.0, %v3720_v54 }
0x1dc3   :  { %v1389_v30 = vadd.f32 %v1388_v29, %v1387_v1  ;;  %v1396_v19 = vadd.f32 %v1395_v4, %v1394_v3 }
0x1dc4   :  { %v1343_v11 = vsub.f32 0.0, %v1342_v5 }
0x1dc5   :  { %v1390_v21 = vrot.slane %v1389_v30, 2  ;;  %v1397_v22 = vrot.slane %v1396_v19, 2 }
0x1dc6   :  { %v1366_v23 = vadd.f32 %v1343_v11, %v3673_v2 }
0x1dc7   :  { %v1391_v25 = vadd.f32 %v1390_v21, %v1389_v30  ;;  %v1398_v60 = vadd.f32 %v1397_v22, %v1396_v19 }
0x1dc8   :  { %v3794_v61 = vsel %vm1362_vm1, %v1366_v23, %v3673_v2 }
0x1dc9   :  { %v1392_v62 = vrot.slane %v1391_v25, 1  ;;  %v1399_v40 = vrot.slane %v1398_v60, 1 }
0x1dcb   :  { %v1393_v0 = vadd.f32 %v1392_v62, %v1391_v25  ;;  %v1400_v42 = vadd.f32 %v1399_v40, %v1398_v60 }
0x1dcd   :  { %v3799_v31 = vsel %vm3747_vm9, %v1393_v0, %v3678_v15  ;;  %v3804_v32 = vsel %vm3747_vm9, %v1400_v42, %v3683_v17  ;;  %vm1407_vm9 = vmand %vm1362_vm1, %vm1363_vm4  ;;  %vm1474_vm1 = vcmp.gt.f32.partialorder %v3848_v39, 0.0 }
0x1dce   :  { %v1413_v12 = vadd.f32 %v1411_v28, %v3799_v31  ;;  %v1414_v17 = vadd.f32 %v1411_v28, %v3804_v32 }
0x1dd0   :  { %v1415_v33 = vmul.f32 0.5, %v1413_v12  ;;  %v1416_v45 = vmul.f32 0.5, %v1414_v17 }
0x1dd2   :  { %2629 = vtanh.f32 %v1415_v33 }
0x1dd8   :  { %v2630_v2 = vpop.eup %2629 }
0x1dd9   :  { %v1419_v63 = vadd.f32 1.0, %v2630_v2 }
0x1ddb   :  { %v1421_v35 = vmul.f32 0.5, %v1419_v63 }
0x1ddd   :  { %v1423_v41 = vmul.f32 %v1421_v35, %v3713_v53 }
0x1ddf   :  { %1425 = vrot.lane.b32.xlu0 %v1423_v41, %s3073_s29 }
0x1e51   :  { %v1426_v26 = vpop.permute.xlu0 %1425 }
0x1e52   :  { %v1428_v15 = vadd.f32 %v1426_v26, %v3804_v32 }
0x1e54   :  { %2631 = vtanh.f32 %v1428_v15 }
0x1e55   :  { %2633 = vtanh.f32 %v1416_v45 }
0x1e5a   :  { %v2632_v38 = vpop.eup %2631 }
0x1e5b   :  { %1432 = vrot.lane.b32.xlu1 %v2632_v38, %s3074_s10  ;;  %v2634_v46 = vpop.eup %2633 }
0x1e5c   :  { %v1420_v24 = vadd.f32 1.0, %v2634_v46 }
0x1e5e   :  { %v1422_v9 = vmul.f32 0.5, %v1420_v24 }
0x1e60   :  { %v1430_v8 = vsub.f32 1.0, %v1422_v9  ;;  %v1436_v57 = vmul.f32 %v1422_v9, %v3816_v37 }
0x1ecd   :  { %v1433_v52 = vpop.permute.xlu1 %1432 }
0x1ece   :  { %v1435_v27 = vmul.f32 %v1433_v52, %v1430_v8 }
0x1ed0   :  { %v3819_v1 = vadd.f32 %v1436_v57, %v1435_v27 }
0x1ed2   :  { %2452 = vmatmul.msk.f32.vlgmr.msra.gmra.mxu1 %vm334_vm5, %v3819_v1 }
0x1f4f   :  { %v1458_v3 = vpop.f32.mrf.mxu1 }
0x1f50   :  { %v1459_v43 = vadd.f32 %v1458_v3, %v3469_v10  ;;  %v3835_v10 = vsel %vm1407_vm9, 1, %v3656_v51  ;;  %v3853_v51 = vsel %vm3778_vm14, 1.0, %v3725_v55 }
0x1f51   :  { %vm1528_vm2 = vcmp.eq.s32.totalorder %v3835_v10, 0  ;;  %vm1475_vm4 = vcmp.gt.f32.partialorder %v3853_v51, 0.0 }
0x1f52   :  { %v1461_v29 = vperm.slane %v1459_v43, 0 }
0x1f54   :  { %v1462_v4 = vadd.f32 %v1461_v29, %v3476_v13  ;;  %v1463_v5 = vadd.f32 %v1461_v29, %v3410_v47 }
0x1f56   :  { %2635 = vtanh.f32 %v1462_v4 }
0x1f57   :  { %2637 = vtanh.f32 %v1463_v5 }
0x1f5c   :  { %v2636_v34 = vpop.eup %2635 }
0x1f5d   :  { %v2638_v36 = vpop.eup %2637  ;;  %v1466_v30 = vmul.f32 %v2636_v34, %v3484_v18 }
0x1f5e   :  { %v1467_v19 = vmul.f32 %v2638_v36, %v3484_v18  ;;  %v3841_v18 = vsel %vm1528_vm2, %v1459_v43, %v3713_v53 }
0x1f5f   :  { %v1468_v11 = vsel %vm334_vm5, %v1466_v30, 0.0 }
0x1f60   :  { %v1471_v21 = vsel %vm384_vm3, %v1467_v19, 0.0  ;;  %1469 = vadd.xlane.f32.xlu2 %v1468_v11 }
0x1f61   :  { %1472 = vadd.xlane.f32.xlu0 %v1471_v21  ;;  %v1546_v21 = vadd.s32 1, %v3766_v58 }
0x1f75   :  { %1576 = vrot.lane.b32.xlu0 %v3841_v18, %s3073_s29 }
0x1fd3   :  { %v1470_v22 = vpop.xlane.xlu2 %1469 }
0x1fd4   :  { %v1473_v23 = vpop.xlane.xlu0 %1472  ;;  %v1476_v53 = vsel %vm1474_vm1, -1e+30, %v1470_v22  ;;  %v3950_v22 = vld [vmem:[%s4518_s16] sm:$0x1] }
0x1fd5   :  { %v1477_v25 = vsel %vm1475_vm4, -1e+30, %v1473_v23 }
0x1fd6   :  { %v1478_v60 = vsel %vm979_vm13, %v1477_v25, -inf }
0x1fd7   :  { %v1479_v62 = vmax.f32 %v1476_v53, %v1478_v60 }
0x1fd9   :  { %v1480_v40 = vrot.slane %v1479_v62, 4 }
0x1fdb   :  { %v1481_v6 = vmax.f32 %v1479_v62, %v1480_v40 }
0x1fdd   :  { %v1482_v54 = vrot.slane %v1481_v6, 2 }
0x1fdf   :  { %v1483_v0 = vmax.f32 %v1481_v6, %v1482_v54 }
0x1fe1   :  { %v1484_v42 = vrot.slane %v1483_v0, 1 }
0x1fe3   :  { %v1485_v28 = vmax.f32 %v1483_v0, %v1484_v42 }
0x1fe5   :  { %2482 = vpush %v1485_v28 }
0x2016   :  { %s2483_s8 = spop %2482 }
0x2017   :  { %v1487_v55 = vstv %s2483_s8  ;;  %s2394_s8 = sshll.u32 %s4523_s21, 4  ;;  %s3079_s21 = smov [#allocation20]   ;;  %s2395_s8 = int_to_ptr.hbm [resolvable:$true] %s2394_s8 }
0x2018   :  { %v1488_v7 = vsub.f32 %v1476_v53, %v1487_v55  ;;  %v1489_v12 = vsub.f32 %v1477_v25, %v1487_v55  ;;  %vm1511_vm14 = vcmp.eq.f32.partialorder %v1477_v25, %v1487_v55  ;;  %vm1510_vm7 = vcmp.eq.f32.partialorder %v1476_v53, %v1487_v55 }
0x2019   :  { %v1513_v38 = vsel %vm1511_vm14, %v3502_v50, 9  ;;  %v1512_v17 = vsel %vm1510_vm7, %v3499_v49, 9 }
0x201a   :  { %v1490_v33 = vmul.f32 1.442695, %v1488_v7  ;;  %v1492_v2 = vmul.f32 1.442695, %v1489_v12  ;;  %v1514_v45 = vsel %vm979_vm13, %v1513_v38, 2147483647 }
0x201b   :  { %vm1515_vm8 = vcmp.lt.s32.totalorder %v1512_v17, %v1514_v45 }
0x201c   :  { %2639 = vpow2.f32 %v1490_v33  ;;  %v1516_v46 = vsel %vm1515_vm8, %v1512_v17, %v1514_v45  ;;  %vm1542_vm8 = vcmp.eq.s32.totalorder %v3507_v14, %v3766_v58 }
0x201d   :  { %2641 = vpow2.f32 %v1492_v2  ;;  %v1517_v24 = vrot.slane %v1516_v46, 4 }
0x201f   :  { %vm1518_vm9 = vcmp.lt.s32.totalorder %v1516_v46, %v1517_v24 }
0x2020   :  { %v1519_v9 = vsel %vm1518_vm9, %v1516_v46, %v1517_v24 }
0x2021   :  { %v1520_v8 = vrot.slane %v1519_v9, 2 }
0x2022   :  { %v2640_v63 = vpop.eup %2639 }
0x2023   :  { %v2642_v35 = vpop.eup %2641  ;;  %v1494_v41 = vsel %vm4567_vm6, %v2640_v63, 0.0  ;;  %vm1521_vm1 = vcmp.lt.s32.totalorder %v1519_v9, %v1520_v8 }
0x2024   :  { %v1495_v26 = vsel %vm998_vm15, %v2642_v35, 0.0  ;;  %v1522_v3 = vsel %vm1521_vm1, %v1519_v9, %v1520_v8 }
0x2025   :  { %v1496_v15 = vadd.f32 %v1495_v26, %v1494_v41  ;;  %v1523_v29 = vrot.slane %v1522_v3, 1 }
0x2027   :  { %1497 = vadd.xlane.f32.xlu1 %v1496_v15  ;;  %vm1524_vm4 = vcmp.lt.s32.totalorder %v1522_v3, %v1523_v29  ;;  %v1577_v15 = vpop.permute.xlu0 %1576 }
0x2028   :  { %v1525_v36 = vsel %vm1524_vm4, %v1522_v3, %v1523_v29 }
0x209a   :  { %v1498_v52 = vpop.xlane.xlu1 %1497 }
0x209b   :  { %v1499_v57 = vrot.slane %v1498_v52, 4 }
0x209d   :  { %v1500_v27 = vadd.f32 %v1499_v57, %v1498_v52 }
0x209f   :  { %v1501_v43 = vrot.slane %v1500_v27, 2 }
0x20a1   :  { %v1502_v4 = vadd.f32 %v1501_v43, %v1500_v27 }
0x20a3   :  { %v1503_v5 = vrot.slane %v1502_v4, 1 }
0x20a5   :  { %v1504_v34 = vadd.f32 %v1503_v5, %v1502_v4  ;;  %v3940_v5 = vsel %vm1528_vm2, %v3819_v1, %v3816_v37 }
0x20a7   :  { %2484 = vpush %v1504_v34 }
0x20a8   :  { %2486 = vpush %v1525_v36 }
0x20d8   :  { %s2485_s25 = spop %2484 }
0x20d9   :  { %v1506_v30 = vstv %s2485_s25  ;;  %s2487_s18 = spop %2486  ;;  %s3078_s25 = smov [#allocation23]  }
0x20da   :  { %2643 = vlog2.f32 %v1506_v30  ;;  %v3863_v19 = vstv %s2487_s18  ;;  %s2403_s18 = sshll.u32 %s3078_s25, 4  ;;  %s2404_s18 = int_to_ptr.vmem [resolvable:$true] %s2403_s18 }
0x20db   :  { %vm1529_vm6 = vcmp.eq.s32.totalorder %v3863_v19, 0  ;;  %v2453_v11 = vadd.s32 4294967295, %v3863_v19  ;;  %vm1535_vm4 = vcmp.eq.s32.totalorder %v3502_v50, %v3863_v19  ;;  %vm1534_vm11 = vcmp.eq.s32.totalorder %v3499_v49, %v3863_v19 }
0x20dc   :  { %vm1530_vm14 = vmxor %vm1529_vm6, %vm3075_vm10 }
0x20dd   :  { %vm3873_vm7 = vmand %vm1528_vm2, %vm1530_vm14  ;;  %vm1548_vm9 = vcmp.eq.s32.totalorder %v3499_v49, %v2453_v11 }
0x20de   :  { %vm1543_vm1 = vmand %vm3873_vm7, %vm1542_vm8  ;;  %v1551_v23 = vsel %vm1548_vm9, %v3308_v44, 0.0  ;;  %v1552_v53 = vsel %vm1548_vm9, %v3520_v20, 0.0  ;;  %v3887_v25 = vsel %vm3873_vm7, %v1546_v21, %v3766_v58 }
0x20df   :  { %v3894_v60 = vsel %vm1543_vm1, %v2453_v11, %v1379_v59  ;;  %v1553_v62 = vsel %vm1052_vm12, %v1551_v23, 0.0  ;;  %v1560_v40 = vsel %vm1060_vm0, %v1552_v53, 0.0  ;;  %vm3902_vm14 = vmand %vm3873_vm7, %vm1535_vm4  ;;  %vm4574_vm1 = vcmask 7168  }
0x20e0   :  { %v2644_v6 = vpop.eup %2643  ;;  %v1554_v54 = vrot.slane %v1553_v62, 4  ;;  %v1561_v0 = vrot.slane %v1560_v40, 4  ;;  %vm3910_vm8 = vmand %vm3873_vm7, %vm1534_vm11 }
0x20e1   :  { %v1508_v16 = vmul.f32 0.6931472, %v2644_v6  ;;  %v3958_v6 = vld [vmem:[%s4519_s17] ss:$0 sm:$0xff]  ;;  %v3982_v19 = vsel %vm3910_vm8, 1.0, %v3848_v39 }
0x20e2   :  { %v1555_v56 = vadd.f32 %v1554_v54, %v1553_v62  ;;  %v1562_v59 = vadd.f32 %v1561_v0, %v1560_v40 }
0x20e3   :  { %v1509_v42 = vsub.f32 0.0, %v1508_v16 }
0x20e4   :  { %v1556_v28 = vrot.slane %v1555_v56, 2  ;;  %v1563_v55 = vrot.slane %v1562_v59, 2 }
0x20e5   :  { %v1532_v7 = vadd.f32 %v1509_v42, %v3794_v61 }
0x20e6   :  { %v1557_v12 = vadd.f32 %v1556_v28, %v1555_v56  ;;  %v1564_v33 = vadd.f32 %v1563_v55, %v1562_v59 }
0x20e7   :  { %v3918_v2 = vsel %vm1528_vm2, %v1532_v7, %v3794_v61 }
0x20e8   :  { %v1558_v63 = vrot.slane %v1557_v12, 1  ;;  %v1565_v35 = vrot.slane %v1564_v33, 1 }
0x20ea   :  { %v1559_v41 = vadd.f32 %v1558_v63, %v1557_v12  ;;  %v1566_v26 = vadd.f32 %v1565_v35, %v1564_v33 }
0x20ec   :  { %v3923_v38 = vsel %vm3873_vm7, %v1559_v41, %v3799_v31  ;;  %v3928_v17 = vsel %vm3873_vm7, %v1566_v26, %v3804_v32  ;;  %vm1573_vm7 = vmand %vm1528_vm2, %vm1529_vm6  ;;  %vm1640_vm2 = vcmp.gt.f32.partialorder %v3982_v19, 0.0 }
0x20ed   :  { %v1579_v45 = vadd.f32 %v1577_v15, %v3923_v38  ;;  %v1580_v32 = vadd.f32 %v1577_v15, %v3928_v17  ;;  %v3969_v59 = vsel %vm1573_vm7, 1, %v3835_v10  ;;  %v3987_v10 = vsel %vm3902_vm14, 1.0, %v3853_v51 }
0x20ee   :  { %vm1694_vm9 = vcmp.eq.s32.totalorder %v3969_v59, 0  ;;  %vm1641_vm6 = vcmp.gt.f32.partialorder %v3987_v10, 0.0 }
0x20ef   :  { %v1581_v46 = vmul.f32 0.5, %v1579_v45  ;;  %v1582_v27 = vmul.f32 0.5, %v1580_v32 }
0x20f1   :  { %2645 = vtanh.f32 %v1581_v46 }
0x20f7   :  { %v2646_v61 = vpop.eup %2645 }
0x20f8   :  { %v1585_v24 = vadd.f32 1.0, %v2646_v61 }
0x20fa   :  { %v1587_v9 = vmul.f32 0.5, %v1585_v24 }
0x20fc   :  { %v1589_v8 = vmul.f32 %v1587_v9, %v3841_v18 }
0x20fe   :  { %1591 = vrot.lane.b32.xlu2 %v1589_v8, %s3073_s29 }
0x2158   :  { %v1592_v52 = vpop.permute.xlu2 %1591 }
0x2159   :  { %v1594_v31 = vadd.f32 %v1592_v52, %v3928_v17 }
0x215b   :  { %2647 = vtanh.f32 %v1594_v31 }
0x215c   :  { %2649 = vtanh.f32 %v1582_v27 }
0x2161   :  { %v2648_v57 = vpop.eup %2647 }
0x2162   :  { %1598 = vrot.lane.b32.xlu1 %v2648_v57, %s3074_s10  ;;  %v2650_v3 = vpop.eup %2649 }
0x2163   :  { %v1586_v43 = vadd.f32 1.0, %v2650_v3 }
0x2165   :  { %v1588_v29 = vmul.f32 0.5, %v1586_v43 }
0x2167   :  { %v1596_v4 = vsub.f32 1.0, %v1588_v29  ;;  %v1602_v36 = vmul.f32 %v1588_v29, %v3940_v5 }
0x21d4   :  { %v1599_v34 = vpop.permute.xlu1 %1598 }
0x21d5   :  { %v1601_v30 = vmul.f32 %v1599_v34, %v1596_v4 }
0x21d7   :  { %v3943_v11 = vadd.f32 %v1602_v36, %v1601_v30 }
0x21d9   :  { %2454 = vmatmul.msk.f32.vlgmr.msra.gmra.mxu3 %vm334_vm5, %v3943_v11 }
0x225c   :  { %v1624_v21 = vpop.f32.mrf.mxu3 }
0x225d   :  { %v1625_v23 = vadd.f32 %v3950_v22, %v1624_v21 }
0x225f   :  { %v1627_v53 = vperm.slane %v1625_v23, 0  ;;  %v3975_v42 = vsel %vm1694_vm9, %v1625_v23, %v3841_v18 }
0x2261   :  { %v1628_v37 = vadd.f32 %v1627_v53, %v3476_v13  ;;  %v1629_v1 = vadd.f32 %v1627_v53, %v3410_v47 }
0x2263   :  { %2651 = vtanh.f32 %v1628_v37 }
0x2264   :  { %2653 = vtanh.f32 %v1629_v1 }
0x2269   :  { %v2652_v62 = vpop.eup %2651 }
0x226a   :  { %v2654_v40 = vpop.eup %2653  ;;  %v1632_v54 = vmul.f32 %v3958_v6, %v2652_v62 }
0x226b   :  { %v1633_v0 = vmul.f32 %v3958_v6, %v2654_v40 }
0x226c   :  { %v1634_v16 = vsel %vm334_vm5, %v1632_v54, 0.0 }
0x226d   :  { %v1637_v56 = vsel %vm384_vm3, %v1633_v0, 0.0  ;;  %1635 = vadd.xlane.f32.xlu2 %v1634_v16  ;;  %v1712_v16 = vadd.s32 1, %v3887_v25 }
0x226e   :  { %1638 = vadd.xlane.f32.xlu0 %v1637_v56 }
0x2282   :  { %1742 = vrot.lane.b32.xlu0 %v3975_v42, %s3073_s29 }
0x22e0   :  { %v1636_v28 = vpop.xlane.xlu2 %1635 }
0x22e1   :  { %v1639_v55 = vpop.xlane.xlu0 %1638  ;;  %v1642_v18 = vsel %vm1640_vm2, -1e+30, %v1636_v28 }
0x22e2   :  { %v1643_v7 = vsel %vm1641_vm6, -1e+30, %v1639_v55 }
0x22e3   :  { %v1644_v12 = vsel %vm979_vm13, %v1643_v7, -inf }
0x22e4   :  { %v1645_v33 = vmax.f32 %v1642_v18, %v1644_v12 }
0x22e6   :  { %v1646_v63 = vrot.slane %v1645_v33, 4 }
0x22e8   :  { %v1647_v48 = vmax.f32 %v1645_v33, %v1646_v63 }
0x22ea   :  { %v1648_v39 = vrot.slane %v1647_v48, 2 }
0x22ec   :  { %v1649_v35 = vmax.f32 %v1647_v48, %v1648_v39 }
0x22ee   :  { %v1650_v41 = vrot.slane %v1649_v35, 1 }
0x22f0   :  { %v1651_v26 = vmax.f32 %v1649_v35, %v1650_v41 }
0x22f2   :  { %2488 = vpush %v1651_v26 }
0x2323   :  { %s2489_s28 = spop %2488 }
0x2324   :  { %v1653_v51 = vstv %s2489_s28  ;;  %s2381_s28 = sshll.u32 %s3079_s21, 4  ;;  %s2382_s28 = int_to_ptr.vmem [resolvable:$true] %s2381_s28 }
0x2325   :  { %v1654_v58 = vsub.f32 %v1642_v18, %v1653_v51  ;;  %v1655_v15 = vsub.f32 %v1643_v7, %v1653_v51  ;;  %vm1677_vm4 = vcmp.eq.f32.partialorder %v1643_v7, %v1653_v51  ;;  %vm1676_vm14 = vcmp.eq.f32.partialorder %v1642_v18, %v1653_v51 }
0x2326   :  { %v1679_v31 = vsel %vm1677_vm4, %v3502_v50, 9  ;;  %v1678_v57 = vsel %vm1676_vm14, %v3499_v49, 9  ;;  %vm1708_vm14 = vcmp.eq.s32.totalorder %v3507_v14, %v3887_v25 }
0x2327   :  { %v1656_v45 = vmul.f32 1.442695, %v1654_v58  ;;  %v1658_v46 = vmul.f32 1.442695, %v1655_v15  ;;  %v1680_v32 = vsel %vm979_vm13, %v1679_v31, 2147483647 }
0x2328   :  { %vm1681_vm11 = vcmp.lt.s32.totalorder %v1678_v57, %v1680_v32 }
0x2329   :  { %2655 = vpow2.f32 %v1656_v45  ;;  %v1682_v27 = vsel %vm1681_vm11, %v1678_v57, %v1680_v32 }
0x232a   :  { %2657 = vpow2.f32 %v1658_v46  ;;  %v1683_v3 = vrot.slane %v1682_v27, 4 }
0x232c   :  { %vm1684_vm8 = vcmp.lt.s32.totalorder %v1682_v27, %v1683_v3 }
0x232d   :  { %v1685_v43 = vsel %vm1684_vm8, %v1682_v27, %v1683_v3  ;;  %v1743_v27 = vpop.permute.xlu0 %1742 }
0x232e   :  { %v1686_v29 = vrot.slane %v1685_v43, 2 }
0x232f   :  { %v2656_v61 = vpop.eup %2655 }
0x2330   :  { %v2658_v24 = vpop.eup %2657  ;;  %v1660_v9 = vsel %vm4574_vm1, %v2656_v61, 0.0  ;;  %vm1687_vm7 = vcmp.lt.s32.totalorder %v1685_v43, %v1686_v29 }
0x2331   :  { %v1661_v8 = vsel %vm998_vm15, %v2658_v24, 0.0  ;;  %v1688_v30 = vsel %vm1687_vm7, %v1685_v43, %v1686_v29 }
0x2332   :  { %v1662_v52 = vadd.f32 %v1661_v8, %v1660_v9  ;;  %v1689_v23 = vrot.slane %v1688_v30, 1 }
0x2334   :  { %1663 = vadd.xlane.f32.xlu1 %v1662_v52  ;;  %vm1690_vm2 = vcmp.lt.s32.totalorder %v1688_v30, %v1689_v23 }
0x2335   :  { %v1691_v62 = vsel %vm1690_vm2, %v1688_v30, %v1689_v23 }
0x23a7   :  { %v1664_v4 = vpop.xlane.xlu1 %1663 }
0x23a8   :  { %v1665_v34 = vrot.slane %v1664_v4, 4 }
0x23aa   :  { %v1666_v36 = vadd.f32 %v1665_v34, %v1664_v4 }
0x23ac   :  { %v1667_v21 = vrot.slane %v1666_v36, 2 }
0x23ae   :  { %v1668_v53 = vadd.f32 %v1667_v21, %v1666_v36 }
0x23b0   :  { %v1669_v37 = vrot.slane %v1668_v53, 1 }
0x23b2   :  { %v1670_v1 = vadd.f32 %v1669_v37, %v1668_v53 }
0x23b4   :  { %2490 = vpush %v1670_v1 }
0x23b5   :  { %2492 = vpush %v1691_v62 }
0x23e5   :  { %s2491_s23 = spop %2490 }
0x23e6   :  { %v1672_v40 = vstv %s2491_s23  ;;  %s2493_s3 = spop %2492 }
0x23e7   :  { %2659 = vlog2.f32 %v1672_v40  ;;  %v3997_v54 = vstv %s2493_s3 }
0x23e8   :  { %vm1695_vm6 = vcmp.eq.s32.totalorder %v3997_v54, 0  ;;  %v4001_v0 = vadd.s32 4294967295, %v3997_v54  ;;  %vm1701_vm7 = vcmp.eq.s32.totalorder %v3502_v50, %v3997_v54 }
0x23e9   :  { %vm1696_vm1 = vmxor %vm1695_vm6, %vm3075_vm10 }
0x23ea   :  { %vm4009_vm4 = vmand %vm1694_vm9, %vm1696_vm1  ;;  %vm1714_vm11 = vcmp.eq.s32.totalorder %v3499_v49, %v4001_v0  ;;  %vm1700_vm1 = vcmp.eq.s32.totalorder %v3499_v49, %v3997_v54 }
0x23eb   :  { %vm4019_vm8 = vmand %vm4009_vm4, %vm1708_vm14  ;;  %v1717_v55 = vsel %vm1714_vm11, %v3308_v44, 0.0  ;;  %v1718_v18 = vsel %vm1714_vm11, %v3520_v20, 0.0  ;;  %v4028_v7 = vsel %vm4009_vm4, %v1712_v16, %v3887_v25  ;;  %v4078_v16 = vsel %vm1694_vm9, %v3943_v11, %v3940_v5 }
0x23ec   :  { %v1711_v12 = vsel %vm4019_vm8, %v4001_v0, %v3894_v60  ;;  %v1719_v33 = vsel %vm1052_vm12, %v1717_v55, 0.0  ;;  %v1726_v63 = vsel %vm1060_vm0, %v1718_v18, 0.0  ;;  %vm4040_vm2 = vmand %vm4009_vm4, %vm1701_vm7  ;;  %vm4583_vm7 = vcmask 7168  }
0x23ed   :  { %v2660_v48 = vpop.eup %2659  ;;  %v1720_v39 = vrot.slane %v1719_v33, 4  ;;  %v1727_v35 = vrot.slane %v1726_v63, 4  ;;  %vm4048_vm14 = vmand %vm4009_vm4, %vm1700_vm1 }
0x23ee   :  { %v1674_v41 = vmul.f32 0.6931472, %v2660_v48  ;;  %v4110_v54 = vsel %vm4048_vm14, 1.0, %v3982_v19 }
0x23ef   :  { %v1721_v51 = vadd.f32 %v1720_v39, %v1719_v33  ;;  %v1728_v58 = vadd.f32 %v1727_v35, %v1726_v63 }
0x23f0   :  { %v1675_v15 = vsub.f32 0.0, %v1674_v41 }
0x23f1   :  { %v1722_v45 = vrot.slane %v1721_v51, 2  ;;  %v1729_v46 = vrot.slane %v1728_v58, 2 }
0x23f2   :  { %v1698_v61 = vadd.f32 %v1675_v15, %v3918_v2 }
0x23f3   :  { %v1723_v24 = vadd.f32 %v1722_v45, %v1721_v51  ;;  %v1730_v9 = vadd.f32 %v1729_v46, %v1728_v58 }
0x23f4   :  { %v4056_v8 = vsel %vm1694_vm9, %v1698_v61, %v3918_v2 }
0x23f5   :  { %v1724_v52 = vrot.slane %v1723_v24, 1  ;;  %v1731_v31 = vrot.slane %v1730_v9, 1 }
0x23f7   :  { %v1725_v57 = vadd.f32 %v1724_v52, %v1723_v24  ;;  %v1732_v32 = vadd.f32 %v1731_v31, %v1730_v9 }
0x23f9   :  { %v4061_v3 = vsel %vm4009_vm4, %v1725_v57, %v3923_v38  ;;  %v4066_v43 = vsel %vm4009_vm4, %v1732_v32, %v3928_v17  ;;  %vm1739_vm4 = vmand %vm1694_vm9, %vm1695_vm6  ;;  %vm1806_vm9 = vcmp.gt.f32.partialorder %v4110_v54, 0.0 }
0x23fa   :  { %v1745_v29 = vadd.f32 %v1743_v27, %v4061_v3  ;;  %v1746_v17 = vadd.f32 %v1743_v27, %v4066_v43  ;;  %v4097_v46 = vsel %vm1739_vm4, 1, %v3969_v59  ;;  %v4115_v59 = vsel %vm4040_vm2, 1.0, %v3987_v10 }
0x23fb   :  { %vm1860_vm11 = vcmp.eq.s32.totalorder %v4097_v46, 0  ;;  %vm1807_vm6 = vcmp.gt.f32.partialorder %v4115_v59, 0.0 }
0x23fc   :  { %v1747_v4 = vmul.f32 0.5, %v1745_v29  ;;  %v1748_v53 = vmul.f32 0.5, %v1746_v17 }
0x23fe   :  { %2661 = vtanh.f32 %v1747_v4 }
0x2404   :  { %v2662_v2 = vpop.eup %2661 }
0x2405   :  { %v1751_v34 = vadd.f32 1.0, %v2662_v2 }
0x2407   :  { %v1753_v36 = vmul.f32 0.5, %v1751_v34 }
0x2409   :  { %v1755_v30 = vmul.f32 %v1753_v36, %v3975_v42 }
0x240b   :  { %1757 = vrot.lane.b32.xlu2 %v1755_v30, %s3073_s29 }
0x2465   :  { %v1758_v21 = vpop.permute.xlu2 %1757 }
0x2466   :  { %v1760_v38 = vadd.f32 %v1758_v21, %v4066_v43 }
0x2468   :  { %2663 = vtanh.f32 %v1760_v38 }
0x2469   :  { %2665 = vtanh.f32 %v1748_v53 }
0x246e   :  { %v2664_v23 = vpop.eup %2663 }
0x246f   :  { %1764 = vrot.lane.b32.xlu1 %v2664_v23, %s3074_s10  ;;  %v2666_v37 = vpop.eup %2665 }
0x2470   :  { %v1752_v1 = vadd.f32 1.0, %v2666_v37 }
0x2472   :  { %v1754_v62 = vmul.f32 0.5, %v1752_v1 }
0x2474   :  { %v1762_v40 = vsub.f32 1.0, %v1754_v62  ;;  %v1768_v55 = vmul.f32 %v1754_v62, %v4078_v16 }
0x24e1   :  { %v1765_v56 = vpop.permute.xlu1 %1764 }
0x24e2   :  { %v1767_v18 = vmul.f32 %v1765_v56, %v1762_v40 }
0x24e4   :  { %v4081_v33 = vadd.f32 %v1768_v55, %v1767_v18 }
0x24e6   :  { %2456 = vmatmul.msk.f32.vlgmr.msrb.gmra.mxu0 %vm334_vm5, %v4081_v33 }
0x2563   :  { %v1790_v63 = vpop.f32.mrf.mxu0 }
0x2564   :  { %v1791_v48 = vadd.f32 %v3950_v22, %v1790_v63 }
0x2566   :  { %v1793_v39 = vperm.slane %v1791_v48, 0  ;;  %v4103_v61 = vsel %vm1860_vm11, %v1791_v48, %v3975_v42 }
0x2568   :  { %v1794_v35 = vadd.f32 %v1793_v39, %v3476_v13  ;;  %v1795_v41 = vadd.f32 %v1793_v39, %v3410_v47 }
0x256a   :  { %2667 = vtanh.f32 %v1794_v35 }
0x256b   :  { %2669 = vtanh.f32 %v1795_v41 }
0x2570   :  { %v2668_v5 = vpop.eup %2667 }
0x2571   :  { %v2670_v11 = vpop.eup %2669  ;;  %v1798_v51 = vmul.f32 %v3958_v6, %v2668_v5 }
0x2572   :  { %v1799_v58 = vmul.f32 %v3958_v6, %v2670_v11 }
0x2573   :  { %v1800_v15 = vsel %vm334_vm5, %v1798_v51, 0.0 }
0x2574   :  { %v1803_v45 = vsel %vm384_vm3, %v1799_v58, 0.0  ;;  %1801 = vadd.xlane.f32.xlu2 %v1800_v15 }
0x2575   :  { %1804 = vadd.xlane.f32.xlu0 %v1803_v45 }
0x2589   :  { %1908 = vrot.lane.b32.xlu0 %v4103_v61, %s3073_s29 }
0x25e7   :  { %v1802_v24 = vpop.xlane.xlu2 %1801 }
0x25e8   :  { %v1805_v9 = vpop.xlane.xlu0 %1804  ;;  %v1808_v42 = vsel %vm1806_vm9, -1e+30, %v1802_v24 }
0x25e9   :  { %v1809_v52 = vsel %vm1807_vm6, -1e+30, %v1805_v9  ;;  %v1878_v9 = vadd.s32 1, %v4028_v7 }
0x25ea   :  { %v1810_v31 = vsel %vm979_vm13, %v1809_v52, -inf }
0x25eb   :  { %v1811_v57 = vmax.f32 %v1808_v42, %v1810_v31 }
0x25ed   :  { %v1812_v32 = vrot.slane %v1811_v57, 4 }
0x25ef   :  { %v1813_v26 = vmax.f32 %v1811_v57, %v1812_v32 }
0x25f1   :  { %v1814_v19 = vrot.slane %v1813_v26, 2 }
0x25f3   :  { %v1815_v27 = vmax.f32 %v1813_v26, %v1814_v19 }
0x25f5   :  { %v1816_v29 = vrot.slane %v1815_v27, 1 }
0x25f7   :  { %v1817_v4 = vmax.f32 %v1815_v27, %v1816_v29 }
0x25f9   :  { %2494 = vpush %v1817_v4 }
0x262a   :  { %s2495_s4 = spop %2494 }
0x262b   :  { %v1819_v10 = vstv %s2495_s4  ;;  %s4610_s4 = sld [smem:[#allocation39_spill]] }
0x262c   :  { %v1820_v25 = vsub.f32 %v1808_v42, %v1819_v10  ;;  %v1821_v2 = vsub.f32 %v1809_v52, %v1819_v10  ;;  %vm1843_vm2 = vcmp.eq.f32.partialorder %v1809_v52, %v1819_v10  ;;  %vm1842_vm1 = vcmp.eq.f32.partialorder %v1808_v42, %v1819_v10 }
0x262d   :  { %v1845_v53 = vsel %vm1843_vm2, %v3502_v50, 9  ;;  %v1844_v37 = vsel %vm1842_vm1, %v3499_v49, 9 }
0x262e   :  { %v1822_v34 = vmul.f32 1.442695, %v1820_v25  ;;  %v1824_v36 = vmul.f32 1.442695, %v1821_v2  ;;  %v1846_v1 = vsel %vm979_vm13, %v1845_v53, 2147483647 }
0x262f   :  { %vm1847_vm14 = vcmp.lt.s32.totalorder %v1844_v37, %v1846_v1 }
0x2630   :  { %2671 = vpow2.f32 %v1822_v34  ;;  %v1848_v62 = vsel %vm1847_vm14, %v1844_v37, %v1846_v1  ;;  %vm1874_vm14 = vcmp.eq.s32.totalorder %v3507_v14, %v4028_v7  ;;  %v1909_v37 = vpop.permute.xlu0 %1908 }
0x2631   :  { %2673 = vpow2.f32 %v1824_v36  ;;  %v1849_v40 = vrot.slane %v1848_v62, 4 }
0x2633   :  { %vm1850_vm4 = vcmp.lt.s32.totalorder %v1848_v62, %v1849_v40 }
0x2634   :  { %v1851_v56 = vsel %vm1850_vm4, %v1848_v62, %v1849_v40 }
0x2635   :  { %v1852_v55 = vrot.slane %v1851_v56, 2 }
0x2636   :  { %v2672_v30 = vpop.eup %2671 }
0x2637   :  { %v2674_v21 = vpop.eup %2673  ;;  %v1826_v38 = vsel %vm4583_vm7, %v2672_v30, 0.0  ;;  %vm1853_vm9 = vcmp.lt.s32.totalorder %v1851_v56, %v1852_v55 }
0x2638   :  { %v1827_v23 = vsel %vm998_vm15, %v2674_v21, 0.0  ;;  %v1854_v39 = vsel %vm1853_vm9, %v1851_v56, %v1852_v55 }
0x2639   :  { %v1828_v17 = vadd.f32 %v1827_v23, %v1826_v38  ;;  %v1855_v41 = vrot.slane %v1854_v39, 1 }
0x263b   :  { %1829 = vadd.xlane.f32.xlu1 %v1828_v17  ;;  %vm1856_vm6 = vcmp.lt.s32.totalorder %v1854_v39, %v1855_v41 }
0x263c   :  { %v1857_v58 = vsel %vm1856_vm6, %v1854_v39, %v1855_v41 }
0x26ae   :  { %v1830_v18 = vpop.xlane.xlu1 %1829 }
0x26af   :  { %v1831_v63 = vrot.slane %v1830_v18, 4 }
0x26b1   :  { %v1832_v48 = vadd.f32 %v1831_v63, %v1830_v18 }
0x26b3   :  { %v1833_v35 = vrot.slane %v1832_v48, 2 }
0x26b5   :  { %v1834_v5 = vadd.f32 %v1833_v35, %v1832_v48 }
0x26b7   :  { %v1835_v11 = vrot.slane %v1834_v5, 1 }
0x26b9   :  { %v1836_v51 = vadd.f32 %v1835_v11, %v1834_v5 }
0x26bb   :  { %2496 = vpush %v1836_v51 }
0x26bc   :  { %2498 = vpush %v1857_v58  ;;  %v4202_v58 = vsel %vm1860_vm11, %v4081_v33, %v4078_v16 }
0x26ec   :  { %s2497_s14 = spop %2496 }
0x26ed   :  { %v1838_v15 = vstv %s2497_s14  ;;  %s2499_s9 = spop %2498  ;;  %s2383_s14 = sshll.u32 %s4610_s4, 4  ;;  %s2384_s14 = int_to_ptr.hbm [resolvable:$true] %s2383_s14 }
0x26ee   :  { %2675 = vlog2.f32 %v1838_v15  ;;  %v4125_v45 = vstv %s2499_s9 }
0x26ef   :  { %vm1861_vm7 = vcmp.eq.s32.totalorder %v4125_v45, 0  ;;  %v2457_v24 = vadd.s32 4294967295, %v4125_v45  ;;  %vm1867_vm6 = vcmp.eq.s32.totalorder %v3502_v50, %v4125_v45  ;;  %vm1866_vm8 = vcmp.eq.s32.totalorder %v3499_v49, %v4125_v45 }
0x26f0   :  { %vm1862_vm2 = vmxor %vm1861_vm7, %vm3075_vm10 }
0x26f1   :  { %vm4135_vm1 = vmand %vm1860_vm11, %vm1862_vm2  ;;  %vm1880_vm4 = vcmp.eq.s32.totalorder %v3499_v49, %v2457_v24 }
0x26f2   :  { %vm1875_vm9 = vmand %vm4135_vm1, %vm1874_vm14  ;;  %v1883_v52 = vsel %vm1880_vm4, %v3308_v44, 0.0  ;;  %v1884_v31 = vsel %vm1880_vm4, %v3520_v20, 0.0  ;;  %v4149_v57 = vsel %vm4135_vm1, %v1878_v9, %v4028_v7 }
0x26f3   :  { %v4156_v32 = vsel %vm1875_vm9, %v2457_v24, %v1711_v12  ;;  %v1885_v26 = vsel %vm1052_vm12, %v1883_v52, 0.0  ;;  %v1892_v19 = vsel %vm1060_vm0, %v1884_v31, 0.0  ;;  %vm4164_vm2 = vmand %vm4135_vm1, %vm1867_vm6  ;;  %vm4590_vm9 = vcmask 7168  }
0x26f4   :  { %v2676_v27 = vpop.eup %2675  ;;  %v1886_v29 = vrot.slane %v1885_v26, 4  ;;  %v1893_v4 = vrot.slane %v1892_v19, 4  ;;  %vm4172_vm14 = vmand %vm4135_vm1, %vm1866_vm8 }
0x26f5   :  { %v1840_v60 = vmul.f32 0.6931472, %v2676_v27  ;;  %v4234_v45 = vsel %vm4172_vm14, 1.0, %v4110_v54 }
0x26f6   :  { %v1887_v28 = vadd.f32 %v1886_v29, %v1885_v26  ;;  %v1894_v12 = vadd.f32 %v1893_v4, %v1892_v19 }
0x26f7   :  { %v1841_v10 = vsub.f32 0.0, %v1840_v60 }
0x26f8   :  { %v1888_v25 = vrot.slane %v1887_v28, 2  ;;  %v1895_v2 = vrot.slane %v1894_v12, 2 }
0x26f9   :  { %v1864_v34 = vadd.f32 %v1841_v10, %v4056_v8 }
0x26fa   :  { %v1889_v36 = vadd.f32 %v1888_v25, %v1887_v28  ;;  %v1896_v30 = vadd.f32 %v1895_v2, %v1894_v12 }
0x26fb   :  { %v4180_v21 = vsel %vm1860_vm11, %v1864_v34, %v4056_v8 }
0x26fc   :  { %v1890_v38 = vrot.slane %v1889_v36, 1  ;;  %v1897_v23 = vrot.slane %v1896_v30, 1 }
0x26fe   :  { %v1891_v17 = vadd.f32 %v1890_v38, %v1889_v36  ;;  %v1898_v53 = vadd.f32 %v1897_v23, %v1896_v30 }
0x2700   :  { %v4185_v1 = vsel %vm4135_vm1, %v1891_v17, %v4061_v3  ;;  %v4190_v62 = vsel %vm4135_vm1, %v1898_v53, %v4066_v43  ;;  %vm1905_vm1 = vmand %vm1860_vm11, %vm1861_vm7  ;;  %vm1972_vm11 = vcmp.gt.f32.partialorder %v4234_v45, 0.0 }
0x2701   :  { %v1911_v40 = vadd.f32 %v1909_v37, %v4185_v1  ;;  %v1912_v43 = vadd.f32 %v1909_v37, %v4190_v62  ;;  %v4221_v12 = vsel %vm1905_vm1, 1, %v4097_v46  ;;  %v4239_v46 = vsel %vm4164_vm2, 1.0, %v4115_v59 }
0x2702   :  { %vm2026_vm4 = vcmp.eq.s32.totalorder %v4221_v12, 0  ;;  %vm1973_vm7 = vcmp.gt.f32.partialorder %v4239_v46, 0.0 }
0x2703   :  { %v1913_v56 = vmul.f32 0.5, %v1911_v40  ;;  %v1914_v35 = vmul.f32 0.5, %v1912_v43 }
0x2705   :  { %2677 = vtanh.f32 %v1913_v56 }
0x270b   :  { %v2678_v8 = vpop.eup %2677 }
0x270c   :  { %v1917_v55 = vadd.f32 1.0, %v2678_v8 }
0x270e   :  { %v1919_v18 = vmul.f32 0.5, %v1917_v55 }
0x2710   :  { %v1921_v63 = vmul.f32 %v1919_v18, %v4103_v61 }
0x2712   :  { %1923 = vrot.lane.b32.xlu2 %v1921_v63, %s3073_s29 }
0x276c   :  { %v1924_v48 = vpop.permute.xlu2 %1923 }
0x276d   :  { %v1926_v3 = vadd.f32 %v1924_v48, %v4190_v62 }
0x276f   :  { %2679 = vtanh.f32 %v1926_v3 }
0x2770   :  { %2681 = vtanh.f32 %v1914_v35 }
0x2775   :  { %v2680_v39 = vpop.eup %2679 }
0x2776   :  { %1930 = vrot.lane.b32.xlu1 %v2680_v39, %s3074_s10  ;;  %v2682_v41 = vpop.eup %2681 }
0x2777   :  { %v1918_v5 = vadd.f32 1.0, %v2682_v41 }
0x2779   :  { %v1920_v11 = vmul.f32 0.5, %v1918_v5 }
0x277b   :  { %v1928_v51 = vsub.f32 1.0, %v1920_v11  ;;  %v1934_v24 = vmul.f32 %v1920_v11, %v4202_v58 }
0x27e8   :  { %v1931_v15 = vpop.permute.xlu1 %1930 }
0x27e9   :  { %v1933_v9 = vmul.f32 %v1931_v15, %v1928_v51 }
0x27eb   :  { %v4205_v42 = vadd.f32 %v1934_v24, %v1933_v9 }
0x27ed   :  { %2458 = vmatmul.msk.f32.vlgmr.msra.gmra.mxu2 %vm334_vm5, %v4205_v42 }
0x2870   :  { %v1956_v52 = vpop.f32.mrf.mxu2 }
0x2871   :  { %v1957_v31 = vadd.f32 %v3950_v22, %v1956_v52 }
0x2873   :  { %v1959_v26 = vperm.slane %v1957_v31, 0  ;;  %v4227_v10 = vsel %vm2026_vm4, %v1957_v31, %v4103_v61 }
0x2875   :  { %v1960_v19 = vadd.f32 %v1959_v26, %v3476_v13  ;;  %v1961_v27 = vadd.f32 %v1959_v26, %v3410_v47 }
0x2877   :  { %2683 = vtanh.f32 %v1960_v19 }
0x2878   :  { %2685 = vtanh.f32 %v1961_v27 }
0x287d   :  { %v2684_v16 = vpop.eup %2683 }
0x287e   :  { %v2686_v33 = vpop.eup %2685  ;;  %v1964_v29 = vmul.f32 %v3958_v6, %v2684_v16 }
0x287f   :  { %v1965_v4 = vmul.f32 %v3958_v6, %v2686_v33 }
0x2880   :  { %v1966_v60 = vsel %vm334_vm5, %v1964_v29, 0.0 }
0x2881   :  { %v1969_v28 = vsel %vm384_vm3, %v1965_v4, 0.0  ;;  %1967 = vadd.xlane.f32.xlu2 %v1966_v60  ;;  %v2044_v60 = vadd.s32 1, %v4149_v57 }
0x2882   :  { %1970 = vadd.xlane.f32.xlu0 %v1969_v28 }
0x2896   :  { %2074 = vrot.lane.b32.xlu0 %v4227_v10, %s3073_s29 }
0x28f4   :  { %v1968_v25 = vpop.xlane.xlu2 %1967 }
0x28f5   :  { %v1971_v2 = vpop.xlane.xlu0 %1970  ;;  %v1974_v61 = vsel %vm1972_vm11, -1e+30, %v1968_v25 }
0x28f6   :  { %v1975_v34 = vsel %vm1973_vm7, -1e+30, %v1971_v2 }
0x28f7   :  { %v1976_v36 = vsel %vm979_vm13, %v1975_v34, -inf }
0x28f8   :  { %v1977_v30 = vmax.f32 %v1974_v61, %v1976_v36 }
0x28fa   :  { %v1978_v38 = vrot.slane %v1977_v30, 4 }
0x28fc   :  { %v1979_v0 = vmax.f32 %v1977_v30, %v1978_v38 }
0x28fe   :  { %v1980_v54 = vrot.slane %v1979_v0, 2 }
0x2900   :  { %v1981_v23 = vmax.f32 %v1979_v0, %v1980_v54 }
0x2902   :  { %v1982_v17 = vrot.slane %v1981_v23, 1 }
0x2904   :  { %v1983_v53 = vmax.f32 %v1981_v23, %v1982_v17 }
0x2906   :  { %2500 = vpush %v1983_v53 }
0x2937   :  { %s2501_s20 = spop %2500 }
0x2938   :  { %v1985_v59 = vstv %s2501_s20 }
0x2939   :  { %v1986_v7 = vsub.f32 %v1974_v61, %v1985_v59  ;;  %v1987_v37 = vsub.f32 %v1975_v34, %v1985_v59  ;;  %vm2009_vm6 = vcmp.eq.f32.partialorder %v1975_v34, %v1985_v59  ;;  %vm2008_vm2 = vcmp.eq.f32.partialorder %v1974_v61, %v1985_v59 }
0x293a   :  { %v2011_v3 = vsel %vm2009_vm6, %v3502_v50, 9  ;;  %v2010_v39 = vsel %vm2008_vm2, %v3499_v49, 9  ;;  %vm2040_vm2 = vcmp.eq.s32.totalorder %v3507_v14, %v4149_v57 }
0x293b   :  { %v1988_v40 = vmul.f32 1.442695, %v1986_v7  ;;  %v1990_v56 = vmul.f32 1.442695, %v1987_v37  ;;  %v2012_v43 = vsel %vm979_vm13, %v2011_v3, 2147483647 }
0x293c   :  { %vm2013_vm8 = vcmp.lt.s32.totalorder %v2010_v39, %v2012_v43 }
0x293d   :  { %2687 = vpow2.f32 %v1988_v40  ;;  %v2014_v35 = vsel %vm2013_vm8, %v2010_v39, %v2012_v43 }
0x293e   :  { %2689 = vpow2.f32 %v1990_v56  ;;  %v2015_v41 = vrot.slane %v2014_v35, 4 }
0x2940   :  { %vm2016_vm14 = vcmp.lt.s32.totalorder %v2014_v35, %v2015_v41 }
0x2941   :  { %v2017_v5 = vsel %vm2016_vm14, %v2014_v35, %v2015_v41  ;;  %v2075_v35 = vpop.permute.xlu0 %2074 }
0x2942   :  { %v2018_v11 = vrot.slane %v2017_v5, 2 }
0x2943   :  { %v2688_v8 = vpop.eup %2687 }
0x2944   :  { %v2690_v55 = vpop.eup %2689  ;;  %v1992_v18 = vsel %vm4590_vm9, %v2688_v8, 0.0  ;;  %vm2019_vm1 = vcmp.lt.s32.totalorder %v2017_v5, %v2018_v11 }
0x2945   :  { %v1993_v63 = vsel %vm998_vm15, %v2690_v55, 0.0  ;;  %v2020_v9 = vsel %vm2019_vm1, %v2017_v5, %v2018_v11 }
0x2946   :  { %v1994_v48 = vadd.f32 %v1993_v63, %v1992_v18  ;;  %v2021_v31 = vrot.slane %v2020_v9, 1 }
0x2948   :  { %1995 = vadd.xlane.f32.xlu1 %v1994_v48  ;;  %vm2022_vm11 = vcmp.lt.s32.totalorder %v2020_v9, %v2021_v31 }
0x2949   :  { %v2023_v16 = vsel %vm2022_vm11, %v2020_v9, %v2021_v31 }
0x29bb   :  { %v1996_v51 = vpop.xlane.xlu1 %1995 }
0x29bc   :  { %v1997_v15 = vrot.slane %v1996_v51, 4 }
0x29be   :  { %v1998_v24 = vadd.f32 %v1997_v15, %v1996_v51 }
0x29c0   :  { %v1999_v52 = vrot.slane %v1998_v24, 2 }
0x29c2   :  { %v2000_v26 = vadd.f32 %v1999_v52, %v1998_v24 }
0x29c4   :  { %v2001_v19 = vrot.slane %v2000_v26, 1 }
0x29c6   :  { %v2002_v27 = vadd.f32 %v2001_v19, %v2000_v26 }
0x29c8   :  { %2502 = vpush %v2002_v27 }
0x29c9   :  { %2504 = vpush %v2023_v16 }
0x29f9   :  { %s2503_s22 = spop %2502 }
0x29fa   :  { %v2004_v33 = vstv %s2503_s22  ;;  %s2505_s30 = spop %2504 }
0x29fb   :  { %2691 = vlog2.f32 %v2004_v33  ;;  %v4249_v29 = vstv %s2505_s30 }
0x29fc   :  { %vm2027_vm7 = vcmp.eq.s32.totalorder %v4249_v29, 0  ;;  %v4253_v4 = vadd.s32 4294967295, %v4249_v29  ;;  %vm2033_vm1 = vcmp.eq.s32.totalorder %v3502_v50, %v4249_v29 }
0x29fd   :  { %vm2028_vm9 = vmxor %vm2027_vm7, %vm3075_vm10 }
0x29fe   :  { %vm4261_vm6 = vmand %vm2026_vm4, %vm2028_vm9  ;;  %vm2046_vm8 = vcmp.eq.s32.totalorder %v3499_v49, %v4253_v4  ;;  %vm2032_vm9 = vcmp.eq.s32.totalorder %v3499_v49, %v4249_v29 }
0x29ff   :  { %vm4271_vm14 = vmand %vm4261_vm6, %vm2040_vm2  ;;  %v2049_v2 = vsel %vm2046_vm8, %v3308_v44, 0.0  ;;  %v2050_v61 = vsel %vm2046_vm8, %v3520_v20, 0.0  ;;  %v4280_v34 = vsel %vm4261_vm6, %v2044_v60, %v4149_v57  ;;  %v4330_v60 = vsel %vm2026_vm4, %v4205_v42, %v4202_v58 }
0x2a00   :  { %v2043_v36 = vsel %vm4271_vm14, %v4253_v4, %v4156_v32  ;;  %v2051_v30 = vsel %vm1052_vm12, %v2049_v2, 0.0  ;;  %v2058_v38 = vsel %vm1060_vm0, %v2050_v61, 0.0  ;;  %vm4292_vm11 = vmand %vm4261_vm6, %vm2033_vm1  ;;  %vm4599_vm1 = vcmask 7168  }
0x2a01   :  { %v2692_v0 = vpop.eup %2691  ;;  %v2052_v54 = vrot.slane %v2051_v30, 4  ;;  %v2059_v23 = vrot.slane %v2058_v38, 4  ;;  %vm4300_vm2 = vmand %vm4261_vm6, %vm2032_vm9 }
0x2a02   :  { %v2006_v17 = vmul.f32 0.6931472, %v2692_v0 }
0x2a03   :  { %v2053_v59 = vadd.f32 %v2052_v54, %v2051_v30  ;;  %v2060_v7 = vadd.f32 %v2059_v23, %v2058_v38 }
0x2a04   :  { %v2007_v37 = vsub.f32 0.0, %v2006_v17 }
0x2a05   :  { %v2054_v40 = vrot.slane %v2053_v59, 2  ;;  %v2061_v56 = vrot.slane %v2060_v7, 2 }
0x2a06   :  { %v2030_v8 = vadd.f32 %v2007_v37, %v4180_v21  ;;  %v4362_v37 = vsel %vm4300_vm2, 1.0, %v4234_v45 }
0x2a07   :  { %v2055_v55 = vadd.f32 %v2054_v40, %v2053_v59  ;;  %v2062_v18 = vadd.f32 %v2061_v56, %v2060_v7  ;;  %v4367_v40 = vsel %vm4292_vm11, 1.0, %v4239_v46 }
0x2a08   :  { %v4308_v63 = vsel %vm2026_vm4, %v2030_v8, %v4180_v21 }
0x2a09   :  { %v2056_v48 = vrot.slane %v2055_v55, 1  ;;  %v2063_v3 = vrot.slane %v2062_v18, 1 }
0x2a0b   :  { %v2057_v39 = vadd.f32 %v2056_v48, %v2055_v55  ;;  %v2064_v43 = vadd.f32 %v2063_v3, %v2062_v18 }
0x2a0d   :  { %v4313_v41 = vsel %vm4261_vm6, %v2057_v39, %v4185_v1  ;;  %v4318_v5 = vsel %vm4261_vm6, %v2064_v43, %v4190_v62  ;;  %vm2071_vm6 = vmand %vm2026_vm4, %vm2027_vm7  ;;  %vm2138_vm4 = vcmp.gt.f32.partialorder %v4362_v37, 0.0  ;;  %vm2139_vm7 = vcmp.gt.f32.partialorder %v4367_v40, 0.0 }
0x2a0e   :  { %v2077_v11 = vadd.f32 %v2075_v35, %v4313_v41  ;;  %v2078_v62 = vadd.f32 %v2075_v35, %v4318_v5  ;;  %v4342_v38 = vsel %vm2071_vm6, 1, %v4221_v12 }
0x2a0f   :  { %vm2192_vm8 = vcmp.eq.s32.totalorder %v4342_v38, 0 }
0x2a10   :  { %v2079_v51 = vmul.f32 0.5, %v2077_v11  ;;  %v2080_v26 = vmul.f32 0.5, %v2078_v62 }
0x2a12   :  { %2693 = vtanh.f32 %v2079_v51 }
0x2a18   :  { %v2694_v21 = vpop.eup %2693 }
0x2a19   :  { %v2083_v15 = vadd.f32 1.0, %v2694_v21 }
0x2a1b   :  { %v2085_v24 = vmul.f32 0.5, %v2083_v15 }
0x2a1d   :  { %v2087_v9 = vmul.f32 %v2085_v24, %v4227_v10 }
0x2a1f   :  { %2089 = vrot.lane.b32.xlu2 %v2087_v9, %s3073_s29 }
0x2a79   :  { %v2090_v52 = vpop.permute.xlu2 %2089 }
0x2a7a   :  { %v2092_v1 = vadd.f32 %v2090_v52, %v4318_v5 }
0x2a7c   :  { %2695 = vtanh.f32 %v2092_v1 }
0x2a7d   :  { %2697 = vtanh.f32 %v2080_v26 }
0x2a82   :  { %v2696_v31 = vpop.eup %2695 }
0x2a83   :  { %2096 = vrot.lane.b32.xlu0 %v2696_v31, %s3074_s10  ;;  %v2698_v19 = vpop.eup %2697 }
0x2a84   :  { %v2084_v27 = vadd.f32 1.0, %v2698_v19 }
0x2a86   :  { %v2086_v16 = vmul.f32 0.5, %v2084_v27 }
0x2a88   :  { %v2094_v33 = vsub.f32 1.0, %v2086_v16  ;;  %v2100_v2 = vmul.f32 %v2086_v16, %v4330_v60 }
0x2af5   :  { %v2097_v28 = vpop.permute.xlu0 %2096 }
0x2af6   :  { %v2099_v61 = vmul.f32 %v2097_v28, %v2094_v33 }
0x2af8   :  { %v4333_v30 = vadd.f32 %v2100_v2, %v2099_v61 }
0x2afa   :  { %2460 = vmatmul.msk.f32.vlgmr.msrb.gmra.mxu1 %vm334_vm5, %v4333_v30 }
0x2b77   :  { %v2122_v0 = vpop.f32.mrf.mxu1 }
0x2b78   :  { %v2123_v58 = vadd.f32 %v3950_v22, %v2122_v0 }
0x2b7a   :  { %v2125_v42 = vperm.slane %v2123_v58, 0  ;;  %v4349_v54 = vsel %vm2192_vm8, %v2123_v58, %v4227_v10 }
0x2b7b   :  { %2240 = vrot.lane.b32.xlu2 %v4349_v54, %s3073_s29 }
0x2b7c   :  { %v2126_v29 = vadd.f32 %v2125_v42, %v3476_v13  ;;  %v2127_v23 = vadd.f32 %v2125_v42, %v3410_v47 }
0x2b7e   :  { %2699 = vtanh.f32 %v2126_v29 }
0x2b7f   :  { %2701 = vtanh.f32 %v2127_v23 }
0x2b84   :  { %v2700_v12 = vpop.eup %2699 }
0x2b85   :  { %v2702_v17 = vpop.eup %2701  ;;  %v2130_v22 = vmul.f32 %v3958_v6, %v2700_v12 }
0x2b86   :  { %v2131_v59 = vmul.f32 %v3958_v6, %v2702_v17 }
0x2b87   :  { %v2132_v7 = vsel %vm334_vm5, %v2130_v22, 0.0 }
0x2b88   :  { %v2135_v10 = vsel %vm384_vm3, %v2131_v59, 0.0  ;;  %2133 = vadd.xlane.f32.xlu0 %v2132_v7 }
0x2b89   :  { %2136 = vadd.xlane.f32.xlu1 %v2135_v10  ;;  %v2210_v10 = vadd.s32 1, %v4280_v34 }
0x2bd5   :  { %v2241_v4 = vpop.permute.xlu2 %2240 }
0x2bfb   :  { %v2134_v56 = vpop.xlane.xlu0 %2133 }
0x2bfc   :  { %v2137_v6 = vpop.xlane.xlu1 %2136  ;;  %v2140_v8 = vsel %vm2138_vm4, -1e+30, %v2134_v56 }
0x2bfd   :  { %v2141_v55 = vsel %vm2139_vm7, -1e+30, %v2137_v6 }
0x2bfe   :  { %v2142_v18 = vsel %vm979_vm13, %v2141_v55, -inf }
0x2bff   :  { %v2143_v48 = vmax.f32 %v2140_v8, %v2142_v18 }
0x2c01   :  { %v2144_v3 = vrot.slane %v2143_v48, 4 }
0x2c03   :  { %v2145_v53 = vmax.f32 %v2143_v48, %v2144_v3 }
0x2c05   :  { %v2146_v45 = vrot.slane %v2145_v53, 2 }
0x2c07   :  { %v2147_v39 = vmax.f32 %v2145_v53, %v2146_v45 }
0x2c09   :  { %v2148_v43 = vrot.slane %v2147_v39, 1 }
0x2c0b   :  { %v2149_v35 = vmax.f32 %v2147_v39, %v2148_v43 }
0x2c0d   :  { %2506 = vpush %v2149_v35 }
0x2c3e   :  { %s2507_s1 = spop %2506 }
0x2c3f   :  { %v2151_v46 = vstv %s2507_s1 }
0x2c40   :  { %v2152_v57 = vsub.f32 %v2140_v8, %v2151_v46  ;;  %v2153_v11 = vsub.f32 %v2141_v55, %v2151_v46  ;;  %vm2175_vm11 = vcmp.eq.f32.partialorder %v2141_v55, %v2151_v46  ;;  %vm2174_vm9 = vcmp.eq.f32.partialorder %v2140_v8, %v2151_v46 }
0x2c41   :  { %v2177_v31 = vsel %vm2175_vm11, %v3502_v50, 9  ;;  %v2176_v62 = vsel %vm2174_vm9, %v3499_v49, 9 }
0x2c42   :  { %v2154_v51 = vmul.f32 1.442695, %v2152_v57  ;;  %v2156_v21 = vmul.f32 1.442695, %v2153_v11  ;;  %v2178_v26 = vsel %vm979_vm13, %v2177_v31, 2147483647 }
0x2c43   :  { %vm2179_vm2 = vcmp.lt.s32.totalorder %v2176_v62, %v2178_v26 }
0x2c44   :  { %2703 = vpow2.f32 %v2154_v51  ;;  %v2180_v19 = vsel %vm2179_vm2, %v2176_v62, %v2178_v26 }
0x2c45   :  { %2705 = vpow2.f32 %v2156_v21  ;;  %v2181_v27 = vrot.slane %v2180_v19, 4 }
0x2c47   :  { %vm2182_vm6 = vcmp.lt.s32.totalorder %v2180_v19, %v2181_v27 }
0x2c48   :  { %v2183_v16 = vsel %vm2182_vm6, %v2180_v19, %v2181_v27 }
0x2c49   :  { %v2184_v33 = vrot.slane %v2183_v16, 2 }
0x2c4a   :  { %v2704_v15 = vpop.eup %2703 }
0x2c4b   :  { %v2706_v24 = vpop.eup %2705  ;;  %v2158_v9 = vsel %vm4599_vm1, %v2704_v15, 0.0  ;;  %vm2185_vm4 = vcmp.lt.s32.totalorder %v2183_v16, %v2184_v33 }
0x2c4c   :  { %v2159_v52 = vsel %vm998_vm15, %v2706_v24, 0.0  ;;  %v2186_v0 = vsel %vm2185_vm4, %v2183_v16, %v2184_v33 }
0x2c4d   :  { %v2160_v1 = vadd.f32 %v2159_v52, %v2158_v9  ;;  %v2187_v42 = vrot.slane %v2186_v0, 1 }
0x2c4f   :  { %2161 = vadd.xlane.f32.xlu1 %v2160_v1  ;;  %vm2188_vm7 = vcmp.lt.s32.totalorder %v2186_v0, %v2187_v42 }
0x2c50   :  { %v2189_v17 = vsel %vm2188_vm7, %v2186_v0, %v2187_v42 }
0x2cc2   :  { %v2162_v28 = vpop.xlane.xlu1 %2161 }
0x2cc3   :  { %v2163_v2 = vrot.slane %v2162_v28, 4 }
0x2cc5   :  { %v2164_v61 = vadd.f32 %v2163_v2, %v2162_v28 }
0x2cc7   :  { %v2165_v58 = vrot.slane %v2164_v61, 2 }
0x2cc9   :  { %v2166_v29 = vadd.f32 %v2165_v58, %v2164_v61 }
0x2ccb   :  { %v2167_v23 = vrot.slane %v2166_v29, 1 }
0x2ccd   :  { %v2168_v12 = vadd.f32 %v2167_v23, %v2166_v29 }
0x2ccf   :  { %2508 = vpush %v2168_v12 }
0x2cd0   :  { %2510 = vpush %v2189_v17 }
0x2d00   :  { %s2509_s13 = spop %2508 }
0x2d01   :  { %v2170_v22 = vstv %s2509_s13  ;;  %s2511_s19 = spop %2510 }
0x2d02   :  { %2707 = vlog2.f32 %v2170_v22  ;;  %v4377_v59 = vstv %s2511_s19  ;;  %v2727_v22 = vld [vmem:[%s4518_s16] sm:$0x1] }
0x2d03   :  { %vm2193_vm1 = vcmp.eq.s32.totalorder %v4377_v59, 0  ;;  %v2461_v7 = vadd.s32 4294967295, %v4377_v59  ;;  %vm2199_vm6 = vcmp.eq.s32.totalorder %v3502_v50, %v4377_v59  ;;  %vm2198_vm7 = vcmp.eq.s32.totalorder %v3499_v49, %v4377_v59 }
0x2d04   :  { %vm2194_vm11 = vmxor %vm2193_vm1, %vm3075_vm10 }
0x2d05   :  { %vm4387_vm9 = vmand %vm2192_vm8, %vm2194_vm11  ;;  %vm2212_vm2 = vcmp.eq.s32.totalorder %v3499_v49, %v2461_v7 }
0x2d06   :  { %v2215_v6 = vsel %vm2212_vm2, %v3308_v44, 0.0  ;;  %v2216_v8 = vsel %vm2212_vm2, %v3520_v20, 0.0  ;;  %vm4398_vm4 = vmand %vm4387_vm9, %vm2199_vm6  ;;  %v4407_v18 = vsel %vm4387_vm9, %v2210_v10, %v4280_v34  ;;  %vm2206_vm2 = vcmp.eq.s32.totalorder %v3507_v14, %v4280_v34 }
0x2d07   :  { %v2217_v48 = vsel %vm1052_vm12, %v2215_v6, 0.0  ;;  %v2224_v44 = vsel %vm1060_vm0, %v2216_v8, 0.0  ;;  %vm4413_vm11 = vmand %vm4387_vm9, %vm2198_vm7  ;;  %v2728_v8 = vld [vmem:[%s4519_s17] ss:$0 sm:$0xff]  ;;  %v2370_v59 = vadd.s32 1, %v4407_v18 }
0x2d08   :  { %v2708_v3 = vpop.eup %2707  ;;  %v2218_v53 = vrot.slane %v2217_v48, 4  ;;  %v2225_v45 = vrot.slane %v2224_v44, 4  ;;  %vm2207_vm6 = vmand %vm4387_vm9, %vm2206_vm2 }
0x2d09   :  { %v2172_v39 = vmul.f32 0.6931472, %v2708_v3  ;;  %v4426_v43 = vsel %vm2207_vm6, %v2461_v7, %v2043_v36 }
0x2d0a   :  { %v2219_v35 = vadd.f32 %v2218_v53, %v2217_v48  ;;  %v2226_v46 = vadd.f32 %v2225_v45, %v2224_v44 }
0x2d0b   :  { %v2173_v57 = vsub.f32 0.0, %v2172_v39 }
0x2d0c   :  { %v2220_v11 = vrot.slane %v2219_v35, 2  ;;  %v2227_v51 = vrot.slane %v2226_v46, 2 }
0x2d0d   :  { %v2196_v34 = vadd.f32 %v2173_v57, %v4308_v63 }
0x2d0e   :  { %v2221_v21 = vadd.f32 %v2220_v11, %v2219_v35  ;;  %v2228_v15 = vadd.f32 %v2227_v51, %v2226_v46 }
0x2d0f   :  { %v4432_v24 = vsel %vm2192_vm8, %v2196_v34, %v4308_v63 }
0x2d10   :  { %v2222_v25 = vrot.slane %v2221_v21, 1  ;;  %v2229_v9 = vrot.slane %v2228_v15, 1 }
0x2d12   :  { %v2223_v52 = vadd.f32 %v2222_v25, %v2221_v21  ;;  %v2230_v32 = vadd.f32 %v2229_v9, %v2228_v15 }
0x2d14   :  { %v2231_v36 = vsel %vm4387_vm9, %v2223_v52, %v4313_v41  ;;  %v2232_v1 = vsel %vm4387_vm9, %v2230_v32, %v4318_v5 }
0x2d15   :  { %v2243_v31 = vadd.f32 %v2241_v4, %v2231_v36  ;;  %v2244_v41 = vadd.f32 %v2241_v4, %v2232_v1 }
0x2d17   :  { %v2245_v62 = vmul.f32 0.5, %v2243_v31  ;;  %v2246_v2 = vmul.f32 0.5, %v2244_v41 }
0x2d19   :  { %2709 = vtanh.f32 %v2245_v62 }
0x2d1f   :  { %v2710_v26 = vpop.eup %2709 }
0x2d20   :  { %v2249_v19 = vadd.f32 1.0, %v2710_v26 }
0x2d22   :  { %v2251_v63 = vmul.f32 0.5, %v2249_v19 }
0x2d24   :  { %v2253_v27 = vmul.f32 %v2251_v63, %v4349_v54  ;;  %v2236_v54 = vsel %vm2192_vm8, %v4333_v30, %v4330_v60 }
0x2d26   :  { %2255 = vrot.lane.b32.xlu1 %v2253_v27, %s3073_s29 }
0x2d98   :  { %v2256_v16 = vpop.permute.xlu1 %2255 }
0x2d99   :  { %v2258_v33 = vadd.f32 %v2256_v16, %v2232_v1 }
0x2d9b   :  { %2711 = vtanh.f32 %v2258_v33 }
0x2d9c   :  { %2713 = vtanh.f32 %v2246_v2 }
0x2da1   :  { %v2712_v28 = vpop.eup %2711 }
0x2da2   :  { %2262 = vrot.lane.b32.xlu2 %v2712_v28, %s3074_s10  ;;  %v2714_v5 = vpop.eup %2713 }
0x2da3   :  { %v2250_v61 = vadd.f32 1.0, %v2714_v5 }
0x2da5   :  { %v2252_v0 = vmul.f32 0.5, %v2250_v61 }
0x2da7   :  { %v2260_v58 = vsub.f32 1.0, %v2252_v0  ;;  %v2266_v29 = vmul.f32 %v2252_v0, %v2236_v54 }
0x2dfc   :  { %v2263_v42 = vpop.permute.xlu2 %2262 }
0x2dfd   :  { %v2265_v23 = vmul.f32 %v2263_v42, %v2260_v58 }
0x2dff   :  { %v2267_v12 = vadd.f32 %v2266_v29, %v2265_v23 }
0x2e01   :  { %2462 = vmatmul.msk.f32.vlgmr.msrb.gmra.mxu3 %vm334_vm5, %v2267_v12 }
0x2e84   :  { %v2288_v17 = vpop.f32.mrf.mxu3 }
0x2e85   :  { %v2289_v7 = vadd.f32 %v2727_v22, %v2288_v17 }
0x2e87   :  { %v2291_v10 = vperm.slane %v2289_v7, 0 }
0x2e89   :  { %v2292_v56 = vadd.f32 %v2291_v10, %v3476_v13  ;;  %v2293_v6 = vadd.f32 %v2291_v10, %v3410_v47  ;;  %v2204_v47 = vsel %vm4413_vm11, 1.0, %v4362_v37  ;;  %v2205_v13 = vsel %vm4398_vm4, 1.0, %v4367_v40 }
0x2e8a   :  { %vm2304_vm12 = vcmp.gt.f32.partialorder %v2204_v47, 0.0  ;;  %vm2305_vm0 = vcmp.gt.f32.partialorder %v2205_v13, 0.0 }
0x2e8b   :  { %2715 = vtanh.f32 %v2292_v56 }
0x2e8c   :  { %2717 = vtanh.f32 %v2293_v6 }
0x2e91   :  { %v2716_v60 = vpop.eup %2715 }
0x2e92   :  { %v2718_v30 = vpop.eup %2717  ;;  %v2296_v48 = vmul.f32 %v2728_v8, %v2716_v60 }
0x2e93   :  { %v2297_v44 = vmul.f32 %v2728_v8, %v2718_v30 }
0x2e94   :  { %v2298_v3 = vsel %vm334_vm5, %v2296_v48, 0.0 }
0x2e95   :  { %v2301_v53 = vsel %vm384_vm3, %v2297_v44, 0.0  ;;  %2299 = vadd.xlane.f32.xlu1 %v2298_v3  ;;  %vm4606_vm3 = vcmask 7168  }
0x2e96   :  { %2302 = vadd.xlane.f32.xlu2 %v2301_v53 }
0x2f08   :  { %v2300_v45 = vpop.xlane.xlu1 %2299 }
0x2f09   :  { %v2303_v39 = vpop.xlane.xlu2 %2302  ;;  %v2306_v35 = vsel %vm2304_vm12, -1e+30, %v2300_v45  ;;  %vm2364_vm12 = vcmp.eq.s32.totalorder %v3507_v14, %v4407_v18 }
0x2f0a   :  { %v2307_v46 = vsel %vm2305_vm0, -1e+30, %v2303_v39  ;;  %vm2373_vm0 = vcmask 57344  }
0x2f0b   :  { %v2308_v57 = vsel %vm979_vm13, %v2307_v46, -inf }
0x2f0c   :  { %v2309_v11 = vmax.f32 %v2306_v35, %v2308_v57 }
0x2f0e   :  { %v2310_v51 = vrot.slane %v2309_v11, 4 }
0x2f10   :  { %v2311_v34 = vmax.f32 %v2309_v11, %v2310_v51 }
0x2f12   :  { %v2312_v21 = vrot.slane %v2311_v34, 2 }
0x2f14   :  { %v2313_v15 = vmax.f32 %v2311_v34, %v2312_v21 }
0x2f16   :  { %v2314_v25 = vrot.slane %v2313_v15, 1 }
0x2f18   :  { %v2315_v20 = vmax.f32 %v2313_v15, %v2314_v25 }
0x2f1a   :  { %2512 = vpush %v2315_v20 }
0x2f4b   :  { %s2513_s16 = spop %2512 }
0x2f4c   :  { %v2317_v37 = vstv %s2513_s16 }
0x2f4d   :  { %v2318_v55 = vsub.f32 %v2306_v35, %v2317_v37  ;;  %v2319_v40 = vsub.f32 %v2307_v46, %v2317_v37  ;;  %vm2341_vm5 = vcmp.eq.f32.partialorder %v2307_v46, %v2317_v37  ;;  %vm2340_vm14 = vcmp.eq.f32.partialorder %v2306_v35, %v2317_v37 }
0x2f4e   :  { %v2343_v62 = vsel %vm2341_vm5, %v3502_v50, 9  ;;  %v2342_v26 = vsel %vm2340_vm14, %v3499_v49, 9 }
0x2f4f   :  { %v2320_v9 = vmul.f32 1.442695, %v2318_v55  ;;  %v2322_v52 = vmul.f32 1.442695, %v2319_v40  ;;  %v2344_v19 = vsel %vm979_vm13, %v2343_v62, 2147483647  ;;  %vm2237_vm13 = vmand %vm2192_vm8, %vm2193_vm1 }
0x2f50   :  { %vm2345_vm9 = vcmp.lt.s32.totalorder %v2342_v26, %v2344_v19  ;;  %v2238_v29 = vsel %vm2237_vm13, 1, %v4342_v38 }
0x2f51   :  { %2719 = vpow2.f32 %v2320_v9  ;;  %v2346_v63 = vsel %vm2345_vm9, %v2342_v26, %v2344_v19  ;;  %vm4478_vm6 = vcmp.eq.s32.totalorder %v2238_v29, 0 }
0x2f52   :  { %2721 = vpow2.f32 %v2322_v52  ;;  %v2347_v27 = vrot.slane %v2346_v63, 4 }
0x2f54   :  { %vm2348_vm4 = vcmp.lt.s32.totalorder %v2346_v63, %v2347_v27 }
0x2f55   :  { %v2349_v16 = vsel %vm2348_vm4, %v2346_v63, %v2347_v27 }
0x2f56   :  { %v2350_v33 = vrot.slane %v2349_v16, 2 }
0x2f57   :  { %v2720_v32 = vpop.eup %2719 }
0x2f58   :  { %v2722_v4 = vpop.eup %2721  ;;  %v2324_v36 = vsel %vm4606_vm3, %v2720_v32, 0.0  ;;  %vm2351_vm7 = vcmp.lt.s32.totalorder %v2349_v16, %v2350_v33 }
0x2f59   :  { %v2325_v1 = vsel %vm998_vm15, %v2722_v4, 0.0  ;;  %v2352_v5 = vsel %vm2351_vm7, %v2349_v16, %v2350_v33 }
0x2f5a   :  { %v2326_v31 = vadd.f32 %v2325_v1, %v2324_v36  ;;  %v2353_v0 = vrot.slane %v2352_v5, 1 }
0x2f5c   :  { %2327 = vadd.xlane.f32.xlu0 %v2326_v31  ;;  %vm2354_vm11 = vcmp.lt.s32.totalorder %v2352_v5, %v2353_v0 }
0x2f5d   :  { %v2355_v49 = vsel %vm2354_vm11, %v2352_v5, %v2353_v0 }
0x2fcf   :  { %v2328_v28 = vpop.xlane.xlu0 %2327 }
0x2fd0   :  { %v2329_v41 = vrot.slane %v2328_v28, 4 }
0x2fd2   :  { %v2330_v2 = vadd.f32 %v2329_v41, %v2328_v28 }
0x2fd4   :  { %v2331_v61 = vrot.slane %v2330_v2, 2 }
0x2fd6   :  { %v2332_v58 = vadd.f32 %v2331_v61, %v2330_v2 }
0x2fd8   :  { %v2333_v54 = vrot.slane %v2332_v58, 1 }
0x2fda   :  { %v2334_v50 = vadd.f32 %v2333_v54, %v2332_v58 }
0x2fdc   :  { %2514 = vpush %v2334_v50 }
0x2fdd   :  { %2516 = vpush %v2355_v49 }
0x300d   :  { %s2515_s17 = spop %2514 }
0x300e   :  { %v2336_v42 = vstv %s2515_s17  ;;  %s2517_s2 = spop %2516 }
0x300f   :  { %2723 = vlog2.f32 %v2336_v42  ;;  %v2357_v23 = vstv %s2517_s2 }
0x3010   :  { %vm2359_vm2 = vcmp.eq.s32.totalorder %v2357_v23, 0  ;;  %v2463_v38 = vadd.s32 4294967295, %v2357_v23 }
0x3011   :  { %vm2360_vm8 = vmxor %vm2359_vm2, %vm3075_vm10 }
0x3012   :  { %vm2361_vm1 = vmand %vm4478_vm6, %vm2360_vm8 }
0x3013   :  { %vm2367_vm3 = vmand %vm2361_vm1, %vm2364_vm12  ;;  %v2371_v17 = vsel %vm2361_vm1, %v2370_v59, %v4407_v18 }
0x3014   :  { %v2369_v22 = vsel %vm2367_vm3, %v2463_v38, %v4426_v43  ;;  %2375 = vst.msk [vmem:[#allocation23] sm:$0x1] %vm998_vm15, %v2371_v17 }
0x3015   :  { %v2724_v7 = vpop.eup %2723  ;;  %2374 = vst.msk [vmem:[#allocation21] sm:$0x1] %vm2373_vm0, %v2369_v22 }
0x3016   :  { %v2338_v10 = vmul.f32 0.6931472, %v2724_v7  ;;  %2397 = dma.vmem_to_hbm [thread:$0]  %s2393_s5, 16, %s2395_s8, [#allocation22]  }
0x3017   :  { %2408 = dma.vmem_to_hbm [thread:$0]  %s2404_s18, 16, %s2406_s11, [#allocation22]  }
0x3018   :  { %v2339_v56 = vsub.f32 0.0, %v2338_v10 }
0x301a   :  { %v2362_v14 = vadd.f32 %v2339_v56, %v4432_v24 }
0x301c   :  { %v2363_v18 = vsel %vm4478_vm6, %v2362_v14, %v4432_v24 }
0x301d   :  { %2372 = vst.msk [vmem:[#allocation20] sm:$0x1] %vm998_vm15, %v2363_v18 }
0x301e   :  { %2386 = dma.vmem_to_hbm [thread:$0]  %s2382_s28, 16, %s2384_s14, [#allocation5]  }
0x301f   :  { %3053 = dma.done.wait [#allocation5], 16  }
0x3020   :  { %3054 = vsyncadd [#allocation5], 4294967280 }
0x3021   :  { %3055 = dma.done.wait [#allocation22], 32  }
0x3022   :  { %3056 = vsyncadd [#allocation22], 4294967264 }
0x3023   :  { %2421 = vsyncpa [#allocation4], 1 }
0x3024   :  { %2422 = vsyncpa [#allocation7], 1 }
0x3025   :  { %2423 = vsyncpa [#allocation10], 1 }
0x3026   :  { %2424 = vsyncpa [#allocation13], 1 }
0x3027   :  { %2425 = vsyncpa [#allocation16], 1 }
0x3028   :  { %2426 = vsyncpa [#allocation19], 1 }
0x3029   :  { %2427 = vsyncpa [#allocation5], 1 }
0x302a   :  { %2428 = vsyncpa [#allocation22], 1 }

</bundles_post_ra>
